<compile_context>
chip_gen: v5e
topology: v5e:2x2
jax: 0.10.0
libtpu: 0.0.40
codegen_flags: <defaults>
</compile_context>

<pallas_src>
import math

import jax
import jax.numpy as jnp
from jax.experimental import pallas as pl
from jax.experimental.pallas import tpu as pltpu


# ---------------------------------------------------------------------------
# helpers
# ---------------------------------------------------------------------------
def _erf(x):
  # Abramowitz & Stegun 7.1.26 rational approximation (max abs err ~1.5e-7).
  # Kept hand-rolled (exp/mul/add only) since a Mosaic lowering for an erf
  # primitive is not guaranteed; matches PyTorch's erf-based nn.GELU() to ~1e-7.
  a1, a2, a3, a4, a5 = 0.254829592, -0.284496736, 1.421413741, -1.453152027, 1.061405429
  p = 0.3275911
  sgn = jnp.where(x >= 0.0, 1.0, -1.0)
  ax = jnp.abs(x)
  t = 1.0 / (1.0 + p * ax)
  poly = ((((a5 * t + a4) * t + a3) * t + a2) * t + a1) * t
  return sgn * (1.0 - poly * jnp.exp(-ax * ax))


# ---------------------------------------------------------------------------
# fused forward kernel: one batch-block per grid step
# ---------------------------------------------------------------------------
def _fused_forward_kernel(len_ref, enc_ref, img_ref,
                          wc_ref, bc_ref,           # image encoder (conv3x3)
                          wt_ref, bt_ref,           # text encoder projection
                          wf_ref, bf_ref,           # fusion linear (K = 2*hid)
                          w1_ref, b1_ref, g_ref, be_ref, w2_ref, b2_ref,  # classifier
                          o_ref):
  Bt = enc_ref.shape[0]
  S, E = enc_ref.shape[1], enc_ref.shape[2]
  H = img_ref.shape[1] - 2
  W = img_ref.shape[2] - 2
  C = img_ref.shape[3]
  Cout = wc_ref.shape[2]
  HW = H * W

  # ---- image encoder stand-in: 3x3 conv (pad=1, stride=1) + ReLU + global avg pool
  # TODO(synk): actual image encoder is config-selected (config.COMPONENTS).
  wc = wc_ref[...]                                    # [9, C, Cout]
  bc = bc_ref[...]                                    # [1, Cout]
  # Row-chunk the conv so the accumulator stays small (no vreg spills).
  Hc = next(c for c in (4, 2, 1) if H % c == 0)
  pool_sum = jnp.zeros((Bt, Cout), jnp.float32)
  for h0 in range(0, H, Hc):
    acc = jnp.zeros((Bt * Hc * W, Cout), jnp.float32)
    for i in range(3):
      for j in range(3):
        patch = img_ref[:, h0 + i:h0 + i + Hc, j:j + W, :]   # [Bt, Hc, W, C]
        patch = patch.reshape(Bt * Hc * W, C)
        acc = acc + jnp.dot(patch, wc[i * 3 + j],
                            preferred_element_type=jnp.float32)
    h_act = jnp.maximum(acc + bc, 0.0)                       # [Bt*Hc*W, Cout]
    pool_sum = pool_sum + jnp.sum(h_act.reshape(Bt, Hc * W, Cout), axis=1)
  img_feat = pool_sum * (1.0 / float(HW))                    # [Bt, Cout]

  # ---- text encoder stand-in: length-masked mean pool + Linear + ReLU (fully batched)
  # TODO(synk): actual text encoder is config-selected (e.g. LSTM/BERT); token
  # ids / ocr are ignored by this pooled stand-in.
  lens = len_ref[...]                                        # [Bt, 1] int32
  pos = jax.lax.broadcasted_iota(jnp.int32, (Bt, S), 1)      # [Bt, S]
  mask = (pos < lens).astype(jnp.float32)                    # [Bt, S]
  denom = jnp.clip(lens, 1, S).astype(jnp.float32)           # [Bt, 1] (clamped to S)
  pooled = jnp.sum(enc_ref[...] * mask[:, :, None], axis=1) / denom   # [Bt, E]
  txt_feat = jnp.maximum(
      jnp.dot(pooled, wt_ref[...], preferred_element_type=jnp.float32) + bt_ref[...],
      0.0)                                                   # [Bt, hid]

  # ---- fusion stand-in: concat(text, image) -> Linear -> ReLU (single K=2*hid matmul)
  # TODO(synk): fusion method is config-selected; concat+linear stand-in.
  feat = jnp.concatenate([txt_feat, img_feat], axis=-1)      # [Bt, 2*hid]
  mm = jnp.maximum(
      jnp.dot(feat, wf_ref[...], preferred_element_type=jnp.float32) + bf_ref[...],
      0.0)                                                   # [Bt, F]

  # ---- Classifier (exact reference semantics):
  #   Linear(F,2F) -> GELU(erf) -> FusedLayerNorm(2F, eps=1e-12) -> Linear(2F, NC)
  h1 = jnp.dot(mm, w1_ref[...], preferred_element_type=jnp.float32) + b1_ref[...]
  gelu = 0.5 * h1 * (1.0 + _erf(h1 * (1.0 / math.sqrt(2.0))))
  mu = jnp.mean(gelu, axis=-1, keepdims=True)
  var = jnp.mean(jnp.square(gelu - mu), axis=-1, keepdims=True)
  ln = (gelu - mu) * jax.lax.rsqrt(var + 1e-12) * g_ref[...] + be_ref[...]
  # w2/b2 are zero-padded to a lane-dense (multiple of 128) width by the wrapper.
  o_ref[...] = (jnp.dot(ln, w2_ref[...], preferred_element_type=jnp.float32)
                + b2_ref[...])


def _full_spec(x):
  nd = x.ndim
  return pl.BlockSpec(x.shape, lambda i, _nd=nd: (0,) * _nd)


# ---------------------------------------------------------------------------
# full forward (ChartFCBaseline.forward)
# ---------------------------------------------------------------------------
def chartfc_forward(params, img, txt, txt_encode, txt_len, ocr=None, ocr_len=None):
  # TODO(synk): the ocr branch only swaps text-encoder inputs in the reference;
  # the pooled stand-in encoder ignores token ids / ocr.
  del txt, ocr, ocr_len
  B, C, H, W = img.shape
  S, E = txt_encode.shape[1], txt_encode.shape[2]
  NC = params["cls_w2"].shape[1]
  NCP = 128 * (-(-NC // 128))          # lane-dense padded logits width

  # Batch blocking: Bt rows per grid step; axis is "parallel" so it shards
  # across TensorCores on v7x at larger batch sizes (single step at B=2).
  Bt = B if B <= 8 else 8
  nblk = -(-B // Bt)
  Bpad = nblk * Bt

  # Image: conv padding=1 spatially, NCHW -> NHWC, pad batch.  (Tiny wrapper
  # glue on the ~8 KB input; the 9x im2col expansion happens in-kernel only.)
  imgp = jnp.pad(img, ((0, Bpad - B), (0, 0), (1, 1), (1, 1)))
  imgp = imgp.transpose(0, 2, 3, 1)                          # [Bpad, H+2, W+2, C]

  encp = jnp.pad(txt_encode, ((0, Bpad - B), (0, 0), (0, 0)))
  lens = jnp.pad(txt_len.astype(jnp.int32), ((0, Bpad - B),)).reshape(Bpad, 1)

  # Pad classifier head to a lane-dense output width (padded columns are zero).
  w2p = jnp.pad(params["cls_w2"], ((0, 0), (0, NCP - NC)))
  b2p = jnp.pad(params["cls_b2"], ((0, 0), (0, NCP - NC)))

  weights = (params["conv_w"], params["conv_b"],
             params["txt_w"], params["txt_b"],
             params["fuse_w"], params["fuse_b"],
             params["cls_w1"], params["cls_b1"],
             params["cls_gamma"], params["cls_beta"],
             w2p, b2p)

  in_specs = [
      pl.BlockSpec((Bt, 1), lambda i: (i, 0)),
      pl.BlockSpec((Bt, S, E), lambda i: (i, 0, 0)),
      pl.BlockSpec((Bt, H + 2, W + 2, C), lambda i: (i, 0, 0, 0)),
  ] + [_full_spec(w) for w in weights]

  out = pl.pallas_call(
      _fused_forward_kernel,
      out_shape=jax.ShapeDtypeStruct((Bpad, NCP), jnp.float32),
      grid=(nblk,),
      in_specs=in_specs,
      out_specs=pl.BlockSpec((Bt, NCP), lambda i: (i, 0)),
      compiler_params=pltpu.CompilerParams(
          dimension_semantics=("parallel",)),
  )(lens, encp, imgp, *weights)

  return out[:B, :NC]


def init_params(key, *, c_in=4, emb=32, hid=32, fusion_out_dim=32, num_classes=2):
  ks = jax.random.split(key, 6)
  n = lambda k, shp: jax.random.normal(k, shp, jnp.float32) * 0.02
  F = fusion_out_dim
  return {
      # image-encoder stand-in: 3x3 conv weights stored per-tap [9, C_in, hid]
      "conv_w": n(ks[0], (9, c_in, hid)),
      "conv_b": jnp.zeros((1, hid), jnp.float32),
      # text-encoder stand-in
      "txt_w": n(ks[1], (emb, hid)),
      "txt_b": jnp.zeros((1, hid), jnp.float32),
      # fusion stand-in: single Linear over concat([text, image])  (K = 2*hid)
      "fuse_w": n(ks[2], (2 * hid, F)),
      "fuse_b": jnp.zeros((1, F), jnp.float32),
      # Classifier (exact reference semantics)
      "cls_w1": n(ks[3], (F, 2 * F)),
      "cls_b1": jnp.zeros((1, 2 * F), jnp.float32),
      "cls_gamma": jnp.ones((1, 2 * F), jnp.float32),
      "cls_beta": jnp.zeros((1, 2 * F), jnp.float32),
      "cls_w2": n(ks[4], (2 * F, num_classes)),
      "cls_b2": jnp.zeros((1, num_classes), jnp.float32),
  }


if __name__ == "__main__":
  B, C, H, W = 2, 4, 16, 16
  S, E = 8, 32
  key = jax.random.PRNGKey(0)
  k_img, k_txt, k_enc, k_par = jax.random.split(key, 4)

  img = jax.random.normal(k_img, (B, C, H, W), jnp.float32)      # NCHW
  txt = jax.random.randint(k_txt, (B, S), 0, 100, jnp.int32)
  txt_encode = jax.random.normal(k_enc, (B, S, E), jnp.float32)
  txt_len = jnp.array([5, 8], jnp.int32)

  params = init_params(k_par, c_in=C, emb=E, hid=32,
                       fusion_out_dim=32, num_classes=2)

  fwd = jax.jit(chartfc_forward)
  out = fwd(params, img, txt, txt_encode, txt_len)
  jax.block_until_ready(out)
  assert out.shape == (B, 2) and bool(jnp.all(jnp.isfinite(out)))
  print("KERNEL_OK")
</pallas_src>

<mosaic_0001>
module attributes {stable_mosaic.version = 11 : i64} {
  func.func @_fused_forward_kernel(%arg0: i32, %arg1: memref<2x1xi32, #tpu.memory_space<vmem>>, %arg2: memref<2x8x32xf32, #tpu.memory_space<vmem>>, %arg3: memref<2x18x18x4xf32, #tpu.memory_space<vmem>>, %arg4: memref<9x4x32xf32, #tpu.memory_space<vmem>>, %arg5: memref<1x32xf32, #tpu.memory_space<vmem>>, %arg6: memref<32x32xf32, #tpu.memory_space<vmem>>, %arg7: memref<1x32xf32, #tpu.memory_space<vmem>>, %arg8: memref<64x32xf32, #tpu.memory_space<vmem>>, %arg9: memref<1x32xf32, #tpu.memory_space<vmem>>, %arg10: memref<32x64xf32, #tpu.memory_space<vmem>>, %arg11: memref<1x64xf32, #tpu.memory_space<vmem>>, %arg12: memref<1x64xf32, #tpu.memory_space<vmem>>, %arg13: memref<1x64xf32, #tpu.memory_space<vmem>>, %arg14: memref<64x128xf32, #tpu.memory_space<vmem>>, %arg15: memref<1x128xf32, #tpu.memory_space<vmem>>, %arg16: memref<2x128xf32, #tpu.memory_space<vmem>>) attributes {dimension_semantics = [#tpu.dimension_semantics<parallel>], iteration_bounds = array<i64: 1>, scalar_prefetch = 0 : i64, scratch_operands = 0 : i64, tpu.core_type = #tpu.core_type<tc>, window_params = [{transform_indices = @transform_0, window_bounds = array<i64: 2, 1>}, {transform_indices = @transform_1, window_bounds = array<i64: 2, 8, 32>}, {transform_indices = @transform_2, window_bounds = array<i64: 2, 18, 18, 4>}, {pipeline_mode = #tpu.pipeline_mode<synchronous>, transform_indices = @transform_3, window_bounds = array<i64: 9, 4, 32>}, {pipeline_mode = #tpu.pipeline_mode<synchronous>, transform_indices = @transform_4, window_bounds = array<i64: 1, 32>}, {pipeline_mode = #tpu.pipeline_mode<synchronous>, transform_indices = @transform_5, window_bounds = array<i64: 32, 32>}, {pipeline_mode = #tpu.pipeline_mode<synchronous>, transform_indices = @transform_6, window_bounds = array<i64: 1, 32>}, {pipeline_mode = #tpu.pipeline_mode<synchronous>, transform_indices = @transform_7, window_bounds = array<i64: 64, 32>}, {pipeline_mode = #tpu.pipeline_mode<synchronous>, transform_indices = @transform_8, window_bounds = array<i64: 1, 32>}, {pipeline_mode = #tpu.pipeline_mode<synchronous>, transform_indices = @transform_9, window_bounds = array<i64: 32, 64>}, {pipeline_mode = #tpu.pipeline_mode<synchronous>, transform_indices = @transform_10, window_bounds = array<i64: 1, 64>}, {pipeline_mode = #tpu.pipeline_mode<synchronous>, transform_indices = @transform_11, window_bounds = array<i64: 1, 64>}, {pipeline_mode = #tpu.pipeline_mode<synchronous>, transform_indices = @transform_12, window_bounds = array<i64: 1, 64>}, {pipeline_mode = #tpu.pipeline_mode<synchronous>, transform_indices = @transform_13, window_bounds = array<i64: 64, 128>}, {pipeline_mode = #tpu.pipeline_mode<synchronous>, transform_indices = @transform_14, window_bounds = array<i64: 1, 128>}, {transform_indices = @transform_15, window_bounds = array<i64: 2, 128>}]} {
    %c0 = arith.constant 0 : index
    %c0_0 = arith.constant 0 : index
    %c0_1 = arith.constant 0 : index
    %0 = vector.load %arg4[%c0, %c0_0, %c0_1] : memref<9x4x32xf32, #tpu.memory_space<vmem>>, vector<9x4x32xf32>
    %c0_2 = arith.constant 0 : index
    %c0_3 = arith.constant 0 : index
    %1 = vector.load %arg5[%c0_2, %c0_3] : memref<1x32xf32, #tpu.memory_space<vmem>>, vector<1x32xf32>
    %cst = arith.constant 0.000000e+00 : f32
    %2 = vector.broadcast %cst : f32 to vector<2x32xf32>
    %cst_4 = arith.constant 0.000000e+00 : f32
    %3 = vector.broadcast %cst_4 : f32 to vector<128x32xf32>
    %c0_5 = arith.constant 0 : index
    %c0_6 = arith.constant 0 : index
    %c0_7 = arith.constant 0 : index
    %c0_8 = arith.constant 0 : index
    %4 = vector.load %arg3[%c0_5, %c0_6, %c0_7, %c0_8] : memref<2x18x18x4xf32, #tpu.memory_space<vmem>>, vector<2x4x16x4xf32>
    %5 = vector.shape_cast %4 : vector<2x4x16x4xf32> to vector<128x4xf32>
    %6 = vector.extract_strided_slice %0 {offsets = [0, 0, 0], sizes = [1, 4, 32], strides = [1, 1, 1]} : vector<9x4x32xf32> to vector<1x4x32xf32>
    %7 = vector.shape_cast %6 : vector<1x4x32xf32> to vector<4x32xf32>
    %cst_9 = arith.constant dense<0.000000e+00> : vector<128x32xf32>
    %8 = tpu.matmul %5, %7, %cst_9 {dimension_numbers = #tpu.dot_dimension_numbers<[1], [0], [0], [1], [0, 0, 1, 1], [], []>} : vector<128x4xf32>, vector<4x32xf32>, vector<128x32xf32> -> vector<128x32xf32>
    %9 = arith.addf %3, %8 : vector<128x32xf32>
    %c0_10 = arith.constant 0 : index
    %c0_11 = arith.constant 0 : index
    %c1 = arith.constant 1 : index
    %c0_12 = arith.constant 0 : index
    %10 = vector.load %arg3[%c0_10, %c0_11, %c1, %c0_12] : memref<2x18x18x4xf32, #tpu.memory_space<vmem>>, vector<2x4x16x4xf32>
    %11 = vector.shape_cast %10 : vector<2x4x16x4xf32> to vector<128x4xf32>
    %12 = vector.extract_strided_slice %0 {offsets = [1, 0, 0], sizes = [1, 4, 32], strides = [1, 1, 1]} : vector<9x4x32xf32> to vector<1x4x32xf32>
    %13 = vector.shape_cast %12 : vector<1x4x32xf32> to vector<4x32xf32>
    %cst_13 = arith.constant dense<0.000000e+00> : vector<128x32xf32>
    %14 = tpu.matmul %11, %13, %cst_13 {dimension_numbers = #tpu.dot_dimension_numbers<[1], [0], [0], [1], [0, 0, 1, 1], [], []>} : vector<128x4xf32>, vector<4x32xf32>, vector<128x32xf32> -> vector<128x32xf32>
    %15 = arith.addf %9, %14 : vector<128x32xf32>
    %c0_14 = arith.constant 0 : index
    %c0_15 = arith.constant 0 : index
    %c2 = arith.constant 2 : index
    %c0_16 = arith.constant 0 : index
    %16 = vector.load %arg3[%c0_14, %c0_15, %c2, %c0_16] : memref<2x18x18x4xf32, #tpu.memory_space<vmem>>, vector<2x4x16x4xf32>
    %17 = vector.shape_cast %16 : vector<2x4x16x4xf32> to vector<128x4xf32>
    %18 = vector.extract_strided_slice %0 {offsets = [2, 0, 0], sizes = [1, 4, 32], strides = [1, 1, 1]} : vector<9x4x32xf32> to vector<1x4x32xf32>
    %19 = vector.shape_cast %18 : vector<1x4x32xf32> to vector<4x32xf32>
    %cst_17 = arith.constant dense<0.000000e+00> : vector<128x32xf32>
    %20 = tpu.matmul %17, %19, %cst_17 {dimension_numbers = #tpu.dot_dimension_numbers<[1], [0], [0], [1], [0, 0, 1, 1], [], []>} : vector<128x4xf32>, vector<4x32xf32>, vector<128x32xf32> -> vector<128x32xf32>
    %21 = arith.addf %15, %20 : vector<128x32xf32>
    %c0_18 = arith.constant 0 : index
    %c1_19 = arith.constant 1 : index
    %c0_20 = arith.constant 0 : index
    %c0_21 = arith.constant 0 : index
    %22 = vector.load %arg3[%c0_18, %c1_19, %c0_20, %c0_21] : memref<2x18x18x4xf32, #tpu.memory_space<vmem>>, vector<2x4x16x4xf32>
    %23 = vector.shape_cast %22 : vector<2x4x16x4xf32> to vector<128x4xf32>
    %24 = vector.extract_strided_slice %0 {offsets = [3, 0, 0], sizes = [1, 4, 32], strides = [1, 1, 1]} : vector<9x4x32xf32> to vector<1x4x32xf32>
    %25 = vector.shape_cast %24 : vector<1x4x32xf32> to vector<4x32xf32>
    %cst_22 = arith.constant dense<0.000000e+00> : vector<128x32xf32>
    %26 = tpu.matmul %23, %25, %cst_22 {dimension_numbers = #tpu.dot_dimension_numbers<[1], [0], [0], [1], [0, 0, 1, 1], [], []>} : vector<128x4xf32>, vector<4x32xf32>, vector<128x32xf32> -> vector<128x32xf32>
    %27 = arith.addf %21, %26 : vector<128x32xf32>
    %c0_23 = arith.constant 0 : index
    %c1_24 = arith.constant 1 : index
    %c1_25 = arith.constant 1 : index
    %c0_26 = arith.constant 0 : index
    %28 = vector.load %arg3[%c0_23, %c1_24, %c1_25, %c0_26] : memref<2x18x18x4xf32, #tpu.memory_space<vmem>>, vector<2x4x16x4xf32>
    %29 = vector.shape_cast %28 : vector<2x4x16x4xf32> to vector<128x4xf32>
    %30 = vector.extract_strided_slice %0 {offsets = [4, 0, 0], sizes = [1, 4, 32], strides = [1, 1, 1]} : vector<9x4x32xf32> to vector<1x4x32xf32>
    %31 = vector.shape_cast %30 : vector<1x4x32xf32> to vector<4x32xf32>
    %cst_27 = arith.constant dense<0.000000e+00> : vector<128x32xf32>
    %32 = tpu.matmul %29, %31, %cst_27 {dimension_numbers = #tpu.dot_dimension_numbers<[1], [0], [0], [1], [0, 0, 1, 1], [], []>} : vector<128x4xf32>, vector<4x32xf32>, vector<128x32xf32> -> vector<128x32xf32>
    %33 = arith.addf %27, %32 : vector<128x32xf32>
    %c0_28 = arith.constant 0 : index
    %c1_29 = arith.constant 1 : index
    %c2_30 = arith.constant 2 : index
    %c0_31 = arith.constant 0 : index
    %34 = vector.load %arg3[%c0_28, %c1_29, %c2_30, %c0_31] : memref<2x18x18x4xf32, #tpu.memory_space<vmem>>, vector<2x4x16x4xf32>
    %35 = vector.shape_cast %34 : vector<2x4x16x4xf32> to vector<128x4xf32>
    %36 = vector.extract_strided_slice %0 {offsets = [5, 0, 0], sizes = [1, 4, 32], strides = [1, 1, 1]} : vector<9x4x32xf32> to vector<1x4x32xf32>
    %37 = vector.shape_cast %36 : vector<1x4x32xf32> to vector<4x32xf32>
    %cst_32 = arith.constant dense<0.000000e+00> : vector<128x32xf32>
    %38 = tpu.matmul %35, %37, %cst_32 {dimension_numbers = #tpu.dot_dimension_numbers<[1], [0], [0], [1], [0, 0, 1, 1], [], []>} : vector<128x4xf32>, vector<4x32xf32>, vector<128x32xf32> -> vector<128x32xf32>
    %39 = arith.addf %33, %38 : vector<128x32xf32>
    %c0_33 = arith.constant 0 : index
    %c2_34 = arith.constant 2 : index
    %c0_35 = arith.constant 0 : index
    %c0_36 = arith.constant 0 : index
    %40 = vector.load %arg3[%c0_33, %c2_34, %c0_35, %c0_36] : memref<2x18x18x4xf32, #tpu.memory_space<vmem>>, vector<2x4x16x4xf32>
    %41 = vector.shape_cast %40 : vector<2x4x16x4xf32> to vector<128x4xf32>
    %42 = vector.extract_strided_slice %0 {offsets = [6, 0, 0], sizes = [1, 4, 32], strides = [1, 1, 1]} : vector<9x4x32xf32> to vector<1x4x32xf32>
    %43 = vector.shape_cast %42 : vector<1x4x32xf32> to vector<4x32xf32>
    %cst_37 = arith.constant dense<0.000000e+00> : vector<128x32xf32>
    %44 = tpu.matmul %41, %43, %cst_37 {dimension_numbers = #tpu.dot_dimension_numbers<[1], [0], [0], [1], [0, 0, 1, 1], [], []>} : vector<128x4xf32>, vector<4x32xf32>, vector<128x32xf32> -> vector<128x32xf32>
    %45 = arith.addf %39, %44 : vector<128x32xf32>
    %c0_38 = arith.constant 0 : index
    %c2_39 = arith.constant 2 : index
    %c1_40 = arith.constant 1 : index
    %c0_41 = arith.constant 0 : index
    %46 = vector.load %arg3[%c0_38, %c2_39, %c1_40, %c0_41] : memref<2x18x18x4xf32, #tpu.memory_space<vmem>>, vector<2x4x16x4xf32>
    %47 = vector.shape_cast %46 : vector<2x4x16x4xf32> to vector<128x4xf32>
    %48 = vector.extract_strided_slice %0 {offsets = [7, 0, 0], sizes = [1, 4, 32], strides = [1, 1, 1]} : vector<9x4x32xf32> to vector<1x4x32xf32>
    %49 = vector.shape_cast %48 : vector<1x4x32xf32> to vector<4x32xf32>
    %cst_42 = arith.constant dense<0.000000e+00> : vector<128x32xf32>
    %50 = tpu.matmul %47, %49, %cst_42 {dimension_numbers = #tpu.dot_dimension_numbers<[1], [0], [0], [1], [0, 0, 1, 1], [], []>} : vector<128x4xf32>, vector<4x32xf32>, vector<128x32xf32> -> vector<128x32xf32>
    %51 = arith.addf %45, %50 : vector<128x32xf32>
    %c0_43 = arith.constant 0 : index
    %c2_44 = arith.constant 2 : index
    %c2_45 = arith.constant 2 : index
    %c0_46 = arith.constant 0 : index
    %52 = vector.load %arg3[%c0_43, %c2_44, %c2_45, %c0_46] : memref<2x18x18x4xf32, #tpu.memory_space<vmem>>, vector<2x4x16x4xf32>
    %53 = vector.shape_cast %52 : vector<2x4x16x4xf32> to vector<128x4xf32>
    %54 = vector.extract_strided_slice %0 {offsets = [8, 0, 0], sizes = [1, 4, 32], strides = [1, 1, 1]} : vector<9x4x32xf32> to vector<1x4x32xf32>
    %55 = vector.shape_cast %54 : vector<1x4x32xf32> to vector<4x32xf32>
    %cst_47 = arith.constant dense<0.000000e+00> : vector<128x32xf32>
    %56 = tpu.matmul %53, %55, %cst_47 {dimension_numbers = #tpu.dot_dimension_numbers<[1], [0], [0], [1], [0, 0, 1, 1], [], []>} : vector<128x4xf32>, vector<4x32xf32>, vector<128x32xf32> -> vector<128x32xf32>
    %57 = arith.addf %51, %56 : vector<128x32xf32>
    %58 = vector.broadcast %1 : vector<1x32xf32> to vector<128x32xf32>
    %59 = arith.addf %57, %58 : vector<128x32xf32>
    %cst_48 = arith.constant 0.000000e+00 : f32
    %60 = vector.broadcast %cst_48 : f32 to vector<128x32xf32>
    %61 = arith.maximumf %59, %60 : vector<128x32xf32>
    %62 = vector.shape_cast %61 : vector<128x32xf32> to vector<2x64x32xf32>
    %cst_49 = arith.constant dense<0.000000e+00> : vector<2x32xf32>
    %63 = vector.multi_reduction <add>, %62, %cst_49 [1] : vector<2x64x32xf32> to vector<2x32xf32>
    %64 = arith.addf %2, %63 : vector<2x32xf32>
    %cst_50 = arith.constant 0.000000e+00 : f32
    %65 = vector.broadcast %cst_50 : f32 to vector<128x32xf32>
    %c0_51 = arith.constant 0 : index
    %c4 = arith.constant 4 : index
    %c0_52 = arith.constant 0 : index
    %c0_53 = arith.constant 0 : index
    %66 = vector.load %arg3[%c0_51, %c4, %c0_52, %c0_53] : memref<2x18x18x4xf32, #tpu.memory_space<vmem>>, vector<2x4x16x4xf32>
    %67 = vector.shape_cast %66 : vector<2x4x16x4xf32> to vector<128x4xf32>
    %68 = vector.extract_strided_slice %0 {offsets = [0, 0, 0], sizes = [1, 4, 32], strides = [1, 1, 1]} : vector<9x4x32xf32> to vector<1x4x32xf32>
    %69 = vector.shape_cast %68 : vector<1x4x32xf32> to vector<4x32xf32>
    %cst_54 = arith.constant dense<0.000000e+00> : vector<128x32xf32>
    %70 = tpu.matmul %67, %69, %cst_54 {dimension_numbers = #tpu.dot_dimension_numbers<[1], [0], [0], [1], [0, 0, 1, 1], [], []>} : vector<128x4xf32>, vector<4x32xf32>, vector<128x32xf32> -> vector<128x32xf32>
    %71 = arith.addf %65, %70 : vector<128x32xf32>
    %c0_55 = arith.constant 0 : index
    %c4_56 = arith.constant 4 : index
    %c1_57 = arith.constant 1 : index
    %c0_58 = arith.constant 0 : index
    %72 = vector.load %arg3[%c0_55, %c4_56, %c1_57, %c0_58] : memref<2x18x18x4xf32, #tpu.memory_space<vmem>>, vector<2x4x16x4xf32>
    %73 = vector.shape_cast %72 : vector<2x4x16x4xf32> to vector<128x4xf32>
    %74 = vector.extract_strided_slice %0 {offsets = [1, 0, 0], sizes = [1, 4, 32], strides = [1, 1, 1]} : vector<9x4x32xf32> to vector<1x4x32xf32>
    %75 = vector.shape_cast %74 : vector<1x4x32xf32> to vector<4x32xf32>
    %cst_59 = arith.constant dense<0.000000e+00> : vector<128x32xf32>
    %76 = tpu.matmul %73, %75, %cst_59 {dimension_numbers = #tpu.dot_dimension_numbers<[1], [0], [0], [1], [0, 0, 1, 1], [], []>} : vector<128x4xf32>, vector<4x32xf32>, vector<128x32xf32> -> vector<128x32xf32>
    %77 = arith.addf %71, %76 : vector<128x32xf32>
    %c0_60 = arith.constant 0 : index
    %c4_61 = arith.constant 4 : index
    %c2_62 = arith.constant 2 : index
    %c0_63 = arith.constant 0 : index
    %78 = vector.load %arg3[%c0_60, %c4_61, %c2_62, %c0_63] : memref<2x18x18x4xf32, #tpu.memory_space<vmem>>, vector<2x4x16x4xf32>
    %79 = vector.shape_cast %78 : vector<2x4x16x4xf32> to vector<128x4xf32>
    %80 = vector.extract_strided_slice %0 {offsets = [2, 0, 0], sizes = [1, 4, 32], strides = [1, 1, 1]} : vector<9x4x32xf32> to vector<1x4x32xf32>
    %81 = vector.shape_cast %80 : vector<1x4x32xf32> to vector<4x32xf32>
    %cst_64 = arith.constant dense<0.000000e+00> : vector<128x32xf32>
    %82 = tpu.matmul %79, %81, %cst_64 {dimension_numbers = #tpu.dot_dimension_numbers<[1], [0], [0], [1], [0, 0, 1, 1], [], []>} : vector<128x4xf32>, vector<4x32xf32>, vector<128x32xf32> -> vector<128x32xf32>
    %83 = arith.addf %77, %82 : vector<128x32xf32>
    %c0_65 = arith.constant 0 : index
    %c5 = arith.constant 5 : index
    %c0_66 = arith.constant 0 : index
    %c0_67 = arith.constant 0 : index
    %84 = vector.load %arg3[%c0_65, %c5, %c0_66, %c0_67] : memref<2x18x18x4xf32, #tpu.memory_space<vmem>>, vector<2x4x16x4xf32>
    %85 = vector.shape_cast %84 : vector<2x4x16x4xf32> to vector<128x4xf32>
    %86 = vector.extract_strided_slice %0 {offsets = [3, 0, 0], sizes = [1, 4, 32], strides = [1, 1, 1]} : vector<9x4x32xf32> to vector<1x4x32xf32>
    %87 = vector.shape_cast %86 : vector<1x4x32xf32> to vector<4x32xf32>
    %cst_68 = arith.constant dense<0.000000e+00> : vector<128x32xf32>
    %88 = tpu.matmul %85, %87, %cst_68 {dimension_numbers = #tpu.dot_dimension_numbers<[1], [0], [0], [1], [0, 0, 1, 1], [], []>} : vector<128x4xf32>, vector<4x32xf32>, vector<128x32xf32> -> vector<128x32xf32>
    %89 = arith.addf %83, %88 : vector<128x32xf32>
    %c0_69 = arith.constant 0 : index
    %c5_70 = arith.constant 5 : index
    %c1_71 = arith.constant 1 : index
    %c0_72 = arith.constant 0 : index
    %90 = vector.load %arg3[%c0_69, %c5_70, %c1_71, %c0_72] : memref<2x18x18x4xf32, #tpu.memory_space<vmem>>, vector<2x4x16x4xf32>
    %91 = vector.shape_cast %90 : vector<2x4x16x4xf32> to vector<128x4xf32>
    %92 = vector.extract_strided_slice %0 {offsets = [4, 0, 0], sizes = [1, 4, 32], strides = [1, 1, 1]} : vector<9x4x32xf32> to vector<1x4x32xf32>
    %93 = vector.shape_cast %92 : vector<1x4x32xf32> to vector<4x32xf32>
    %cst_73 = arith.constant dense<0.000000e+00> : vector<128x32xf32>
    %94 = tpu.matmul %91, %93, %cst_73 {dimension_numbers = #tpu.dot_dimension_numbers<[1], [0], [0], [1], [0, 0, 1, 1], [], []>} : vector<128x4xf32>, vector<4x32xf32>, vector<128x32xf32> -> vector<128x32xf32>
    %95 = arith.addf %89, %94 : vector<128x32xf32>
    %c0_74 = arith.constant 0 : index
    %c5_75 = arith.constant 5 : index
    %c2_76 = arith.constant 2 : index
    %c0_77 = arith.constant 0 : index
    %96 = vector.load %arg3[%c0_74, %c5_75, %c2_76, %c0_77] : memref<2x18x18x4xf32, #tpu.memory_space<vmem>>, vector<2x4x16x4xf32>
    %97 = vector.shape_cast %96 : vector<2x4x16x4xf32> to vector<128x4xf32>
    %98 = vector.extract_strided_slice %0 {offsets = [5, 0, 0], sizes = [1, 4, 32], strides = [1, 1, 1]} : vector<9x4x32xf32> to vector<1x4x32xf32>
    %99 = vector.shape_cast %98 : vector<1x4x32xf32> to vector<4x32xf32>
    %cst_78 = arith.constant dense<0.000000e+00> : vector<128x32xf32>
    %100 = tpu.matmul %97, %99, %cst_78 {dimension_numbers = #tpu.dot_dimension_numbers<[1], [0], [0], [1], [0, 0, 1, 1], [], []>} : vector<128x4xf32>, vector<4x32xf32>, vector<128x32xf32> -> vector<128x32xf32>
    %101 = arith.addf %95, %100 : vector<128x32xf32>
    %c0_79 = arith.constant 0 : index
    %c6 = arith.constant 6 : index
    %c0_80 = arith.constant 0 : index
    %c0_81 = arith.constant 0 : index
    %102 = vector.load %arg3[%c0_79, %c6, %c0_80, %c0_81] : memref<2x18x18x4xf32, #tpu.memory_space<vmem>>, vector<2x4x16x4xf32>
    %103 = vector.shape_cast %102 : vector<2x4x16x4xf32> to vector<128x4xf32>
    %104 = vector.extract_strided_slice %0 {offsets = [6, 0, 0], sizes = [1, 4, 32], strides = [1, 1, 1]} : vector<9x4x32xf32> to vector<1x4x32xf32>
    %105 = vector.shape_cast %104 : vector<1x4x32xf32> to vector<4x32xf32>
    %cst_82 = arith.constant dense<0.000000e+00> : vector<128x32xf32>
    %106 = tpu.matmul %103, %105, %cst_82 {dimension_numbers = #tpu.dot_dimension_numbers<[1], [0], [0], [1], [0, 0, 1, 1], [], []>} : vector<128x4xf32>, vector<4x32xf32>, vector<128x32xf32> -> vector<128x32xf32>
    %107 = arith.addf %101, %106 : vector<128x32xf32>
    %c0_83 = arith.constant 0 : index
    %c6_84 = arith.constant 6 : index
    %c1_85 = arith.constant 1 : index
    %c0_86 = arith.constant 0 : index
    %108 = vector.load %arg3[%c0_83, %c6_84, %c1_85, %c0_86] : memref<2x18x18x4xf32, #tpu.memory_space<vmem>>, vector<2x4x16x4xf32>
    %109 = vector.shape_cast %108 : vector<2x4x16x4xf32> to vector<128x4xf32>
    %110 = vector.extract_strided_slice %0 {offsets = [7, 0, 0], sizes = [1, 4, 32], strides = [1, 1, 1]} : vector<9x4x32xf32> to vector<1x4x32xf32>
    %111 = vector.shape_cast %110 : vector<1x4x32xf32> to vector<4x32xf32>
    %cst_87 = arith.constant dense<0.000000e+00> : vector<128x32xf32>
    %112 = tpu.matmul %109, %111, %cst_87 {dimension_numbers = #tpu.dot_dimension_numbers<[1], [0], [0], [1], [0, 0, 1, 1], [], []>} : vector<128x4xf32>, vector<4x32xf32>, vector<128x32xf32> -> vector<128x32xf32>
    %113 = arith.addf %107, %112 : vector<128x32xf32>
    %c0_88 = arith.constant 0 : index
    %c6_89 = arith.constant 6 : index
    %c2_90 = arith.constant 2 : index
    %c0_91 = arith.constant 0 : index
    %114 = vector.load %arg3[%c0_88, %c6_89, %c2_90, %c0_91] : memref<2x18x18x4xf32, #tpu.memory_space<vmem>>, vector<2x4x16x4xf32>
    %115 = vector.shape_cast %114 : vector<2x4x16x4xf32> to vector<128x4xf32>
    %116 = vector.extract_strided_slice %0 {offsets = [8, 0, 0], sizes = [1, 4, 32], strides = [1, 1, 1]} : vector<9x4x32xf32> to vector<1x4x32xf32>
    %117 = vector.shape_cast %116 : vector<1x4x32xf32> to vector<4x32xf32>
    %cst_92 = arith.constant dense<0.000000e+00> : vector<128x32xf32>
    %118 = tpu.matmul %115, %117, %cst_92 {dimension_numbers = #tpu.dot_dimension_numbers<[1], [0], [0], [1], [0, 0, 1, 1], [], []>} : vector<128x4xf32>, vector<4x32xf32>, vector<128x32xf32> -> vector<128x32xf32>
    %119 = arith.addf %113, %118 : vector<128x32xf32>
    %120 = vector.broadcast %1 : vector<1x32xf32> to vector<128x32xf32>
    %121 = arith.addf %119, %120 : vector<128x32xf32>
    %cst_93 = arith.constant 0.000000e+00 : f32
    %122 = vector.broadcast %cst_93 : f32 to vector<128x32xf32>
    %123 = arith.maximumf %121, %122 : vector<128x32xf32>
    %124 = vector.shape_cast %123 : vector<128x32xf32> to vector<2x64x32xf32>
    %cst_94 = arith.constant dense<0.000000e+00> : vector<2x32xf32>
    %125 = vector.multi_reduction <add>, %124, %cst_94 [1] : vector<2x64x32xf32> to vector<2x32xf32>
    %126 = arith.addf %64, %125 : vector<2x32xf32>
    %cst_95 = arith.constant 0.000000e+00 : f32
    %127 = vector.broadcast %cst_95 : f32 to vector<128x32xf32>
    %c0_96 = arith.constant 0 : index
    %c8 = arith.constant 8 : index
    %c0_97 = arith.constant 0 : index
    %c0_98 = arith.constant 0 : index
    %128 = vector.load %arg3[%c0_96, %c8, %c0_97, %c0_98] : memref<2x18x18x4xf32, #tpu.memory_space<vmem>>, vector<2x4x16x4xf32>
    %129 = vector.shape_cast %128 : vector<2x4x16x4xf32> to vector<128x4xf32>
    %130 = vector.extract_strided_slice %0 {offsets = [0, 0, 0], sizes = [1, 4, 32], strides = [1, 1, 1]} : vector<9x4x32xf32> to vector<1x4x32xf32>
    %131 = vector.shape_cast %130 : vector<1x4x32xf32> to vector<4x32xf32>
    %cst_99 = arith.constant dense<0.000000e+00> : vector<128x32xf32>
    %132 = tpu.matmul %129, %131, %cst_99 {dimension_numbers = #tpu.dot_dimension_numbers<[1], [0], [0], [1], [0, 0, 1, 1], [], []>} : vector<128x4xf32>, vector<4x32xf32>, vector<128x32xf32> -> vector<128x32xf32>
    %133 = arith.addf %127, %132 : vector<128x32xf32>
    %c0_100 = arith.constant 0 : index
    %c8_101 = arith.constant 8 : index
    %c1_102 = arith.constant 1 : index
    %c0_103 = arith.constant 0 : index
    %134 = vector.load %arg3[%c0_100, %c8_101, %c1_102, %c0_103] : memref<2x18x18x4xf32, #tpu.memory_space<vmem>>, vector<2x4x16x4xf32>
    %135 = vector.shape_cast %134 : vector<2x4x16x4xf32> to vector<128x4xf32>
    %136 = vector.extract_strided_slice %0 {offsets = [1, 0, 0], sizes = [1, 4, 32], strides = [1, 1, 1]} : vector<9x4x32xf32> to vector<1x4x32xf32>
    %137 = vector.shape_cast %136 : vector<1x4x32xf32> to vector<4x32xf32>
    %cst_104 = arith.constant dense<0.000000e+00> : vector<128x32xf32>
    %138 = tpu.matmul %135, %137, %cst_104 {dimension_numbers = #tpu.dot_dimension_numbers<[1], [0], [0], [1], [0, 0, 1, 1], [], []>} : vector<128x4xf32>, vector<4x32xf32>, vector<128x32xf32> -> vector<128x32xf32>
    %139 = arith.addf %133, %138 : vector<128x32xf32>
    %c0_105 = arith.constant 0 : index
    %c8_106 = arith.constant 8 : index
    %c2_107 = arith.constant 2 : index
    %c0_108 = arith.constant 0 : index
    %140 = vector.load %arg3[%c0_105, %c8_106, %c2_107, %c0_108] : memref<2x18x18x4xf32, #tpu.memory_space<vmem>>, vector<2x4x16x4xf32>
    %141 = vector.shape_cast %140 : vector<2x4x16x4xf32> to vector<128x4xf32>
    %142 = vector.extract_strided_slice %0 {offsets = [2, 0, 0], sizes = [1, 4, 32], strides = [1, 1, 1]} : vector<9x4x32xf32> to vector<1x4x32xf32>
    %143 = vector.shape_cast %142 : vector<1x4x32xf32> to vector<4x32xf32>
    %cst_109 = arith.constant dense<0.000000e+00> : vector<128x32xf32>
    %144 = tpu.matmul %141, %143, %cst_109 {dimension_numbers = #tpu.dot_dimension_numbers<[1], [0], [0], [1], [0, 0, 1, 1], [], []>} : vector<128x4xf32>, vector<4x32xf32>, vector<128x32xf32> -> vector<128x32xf32>
    %145 = arith.addf %139, %144 : vector<128x32xf32>
    %c0_110 = arith.constant 0 : index
    %c9 = arith.constant 9 : index
    %c0_111 = arith.constant 0 : index
    %c0_112 = arith.constant 0 : index
    %146 = vector.load %arg3[%c0_110, %c9, %c0_111, %c0_112] : memref<2x18x18x4xf32, #tpu.memory_space<vmem>>, vector<2x4x16x4xf32>
    %147 = vector.shape_cast %146 : vector<2x4x16x4xf32> to vector<128x4xf32>
    %148 = vector.extract_strided_slice %0 {offsets = [3, 0, 0], sizes = [1, 4, 32], strides = [1, 1, 1]} : vector<9x4x32xf32> to vector<1x4x32xf32>
    %149 = vector.shape_cast %148 : vector<1x4x32xf32> to vector<4x32xf32>
    %cst_113 = arith.constant dense<0.000000e+00> : vector<128x32xf32>
    %150 = tpu.matmul %147, %149, %cst_113 {dimension_numbers = #tpu.dot_dimension_numbers<[1], [0], [0], [1], [0, 0, 1, 1], [], []>} : vector<128x4xf32>, vector<4x32xf32>, vector<128x32xf32> -> vector<128x32xf32>
    %151 = arith.addf %145, %150 : vector<128x32xf32>
    %c0_114 = arith.constant 0 : index
    %c9_115 = arith.constant 9 : index
    %c1_116 = arith.constant 1 : index
    %c0_117 = arith.constant 0 : index
    %152 = vector.load %arg3[%c0_114, %c9_115, %c1_116, %c0_117] : memref<2x18x18x4xf32, #tpu.memory_space<vmem>>, vector<2x4x16x4xf32>
    %153 = vector.shape_cast %152 : vector<2x4x16x4xf32> to vector<128x4xf32>
    %154 = vector.extract_strided_slice %0 {offsets = [4, 0, 0], sizes = [1, 4, 32], strides = [1, 1, 1]} : vector<9x4x32xf32> to vector<1x4x32xf32>
    %155 = vector.shape_cast %154 : vector<1x4x32xf32> to vector<4x32xf32>
    %cst_118 = arith.constant dense<0.000000e+00> : vector<128x32xf32>
    %156 = tpu.matmul %153, %155, %cst_118 {dimension_numbers = #tpu.dot_dimension_numbers<[1], [0], [0], [1], [0, 0, 1, 1], [], []>} : vector<128x4xf32>, vector<4x32xf32>, vector<128x32xf32> -> vector<128x32xf32>
    %157 = arith.addf %151, %156 : vector<128x32xf32>
    %c0_119 = arith.constant 0 : index
    %c9_120 = arith.constant 9 : index
    %c2_121 = arith.constant 2 : index
    %c0_122 = arith.constant 0 : index
    %158 = vector.load %arg3[%c0_119, %c9_120, %c2_121, %c0_122] : memref<2x18x18x4xf32, #tpu.memory_space<vmem>>, vector<2x4x16x4xf32>
    %159 = vector.shape_cast %158 : vector<2x4x16x4xf32> to vector<128x4xf32>
    %160 = vector.extract_strided_slice %0 {offsets = [5, 0, 0], sizes = [1, 4, 32], strides = [1, 1, 1]} : vector<9x4x32xf32> to vector<1x4x32xf32>
    %161 = vector.shape_cast %160 : vector<1x4x32xf32> to vector<4x32xf32>
    %cst_123 = arith.constant dense<0.000000e+00> : vector<128x32xf32>
    %162 = tpu.matmul %159, %161, %cst_123 {dimension_numbers = #tpu.dot_dimension_numbers<[1], [0], [0], [1], [0, 0, 1, 1], [], []>} : vector<128x4xf32>, vector<4x32xf32>, vector<128x32xf32> -> vector<128x32xf32>
    %163 = arith.addf %157, %162 : vector<128x32xf32>
    %c0_124 = arith.constant 0 : index
    %c10 = arith.constant 10 : index
    %c0_125 = arith.constant 0 : index
    %c0_126 = arith.constant 0 : index
    %164 = vector.load %arg3[%c0_124, %c10, %c0_125, %c0_126] : memref<2x18x18x4xf32, #tpu.memory_space<vmem>>, vector<2x4x16x4xf32>
    %165 = vector.shape_cast %164 : vector<2x4x16x4xf32> to vector<128x4xf32>
    %166 = vector.extract_strided_slice %0 {offsets = [6, 0, 0], sizes = [1, 4, 32], strides = [1, 1, 1]} : vector<9x4x32xf32> to vector<1x4x32xf32>
    %167 = vector.shape_cast %166 : vector<1x4x32xf32> to vector<4x32xf32>
    %cst_127 = arith.constant dense<0.000000e+00> : vector<128x32xf32>
    %168 = tpu.matmul %165, %167, %cst_127 {dimension_numbers = #tpu.dot_dimension_numbers<[1], [0], [0], [1], [0, 0, 1, 1], [], []>} : vector<128x4xf32>, vector<4x32xf32>, vector<128x32xf32> -> vector<128x32xf32>
    %169 = arith.addf %163, %168 : vector<128x32xf32>
    %c0_128 = arith.constant 0 : index
    %c10_129 = arith.constant 10 : index
    %c1_130 = arith.constant 1 : index
    %c0_131 = arith.constant 0 : index
    %170 = vector.load %arg3[%c0_128, %c10_129, %c1_130, %c0_131] : memref<2x18x18x4xf32, #tpu.memory_space<vmem>>, vector<2x4x16x4xf32>
    %171 = vector.shape_cast %170 : vector<2x4x16x4xf32> to vector<128x4xf32>
    %172 = vector.extract_strided_slice %0 {offsets = [7, 0, 0], sizes = [1, 4, 32], strides = [1, 1, 1]} : vector<9x4x32xf32> to vector<1x4x32xf32>
    %173 = vector.shape_cast %172 : vector<1x4x32xf32> to vector<4x32xf32>
    %cst_132 = arith.constant dense<0.000000e+00> : vector<128x32xf32>
    %174 = tpu.matmul %171, %173, %cst_132 {dimension_numbers = #tpu.dot_dimension_numbers<[1], [0], [0], [1], [0, 0, 1, 1], [], []>} : vector<128x4xf32>, vector<4x32xf32>, vector<128x32xf32> -> vector<128x32xf32>
    %175 = arith.addf %169, %174 : vector<128x32xf32>
    %c0_133 = arith.constant 0 : index
    %c10_134 = arith.constant 10 : index
    %c2_135 = arith.constant 2 : index
    %c0_136 = arith.constant 0 : index
    %176 = vector.load %arg3[%c0_133, %c10_134, %c2_135, %c0_136] : memref<2x18x18x4xf32, #tpu.memory_space<vmem>>, vector<2x4x16x4xf32>
    %177 = vector.shape_cast %176 : vector<2x4x16x4xf32> to vector<128x4xf32>
    %178 = vector.extract_strided_slice %0 {offsets = [8, 0, 0], sizes = [1, 4, 32], strides = [1, 1, 1]} : vector<9x4x32xf32> to vector<1x4x32xf32>
    %179 = vector.shape_cast %178 : vector<1x4x32xf32> to vector<4x32xf32>
    %cst_137 = arith.constant dense<0.000000e+00> : vector<128x32xf32>
    %180 = tpu.matmul %177, %179, %cst_137 {dimension_numbers = #tpu.dot_dimension_numbers<[1], [0], [0], [1], [0, 0, 1, 1], [], []>} : vector<128x4xf32>, vector<4x32xf32>, vector<128x32xf32> -> vector<128x32xf32>
    %181 = arith.addf %175, %180 : vector<128x32xf32>
    %182 = vector.broadcast %1 : vector<1x32xf32> to vector<128x32xf32>
    %183 = arith.addf %181, %182 : vector<128x32xf32>
    %cst_138 = arith.constant 0.000000e+00 : f32
    %184 = vector.broadcast %cst_138 : f32 to vector<128x32xf32>
    %185 = arith.maximumf %183, %184 : vector<128x32xf32>
    %186 = vector.shape_cast %185 : vector<128x32xf32> to vector<2x64x32xf32>
    %cst_139 = arith.constant dense<0.000000e+00> : vector<2x32xf32>
    %187 = vector.multi_reduction <add>, %186, %cst_139 [1] : vector<2x64x32xf32> to vector<2x32xf32>
    %188 = arith.addf %126, %187 : vector<2x32xf32>
    %cst_140 = arith.constant 0.000000e+00 : f32
    %189 = vector.broadcast %cst_140 : f32 to vector<128x32xf32>
    %c0_141 = arith.constant 0 : index
    %c12 = arith.constant 12 : index
    %c0_142 = arith.constant 0 : index
    %c0_143 = arith.constant 0 : index
    %190 = vector.load %arg3[%c0_141, %c12, %c0_142, %c0_143] : memref<2x18x18x4xf32, #tpu.memory_space<vmem>>, vector<2x4x16x4xf32>
    %191 = vector.shape_cast %190 : vector<2x4x16x4xf32> to vector<128x4xf32>
    %192 = vector.extract_strided_slice %0 {offsets = [0, 0, 0], sizes = [1, 4, 32], strides = [1, 1, 1]} : vector<9x4x32xf32> to vector<1x4x32xf32>
    %193 = vector.shape_cast %192 : vector<1x4x32xf32> to vector<4x32xf32>
    %cst_144 = arith.constant dense<0.000000e+00> : vector<128x32xf32>
    %194 = tpu.matmul %191, %193, %cst_144 {dimension_numbers = #tpu.dot_dimension_numbers<[1], [0], [0], [1], [0, 0, 1, 1], [], []>} : vector<128x4xf32>, vector<4x32xf32>, vector<128x32xf32> -> vector<128x32xf32>
    %195 = arith.addf %189, %194 : vector<128x32xf32>
    %c0_145 = arith.constant 0 : index
    %c12_146 = arith.constant 12 : index
    %c1_147 = arith.constant 1 : index
    %c0_148 = arith.constant 0 : index
    %196 = vector.load %arg3[%c0_145, %c12_146, %c1_147, %c0_148] : memref<2x18x18x4xf32, #tpu.memory_space<vmem>>, vector<2x4x16x4xf32>
    %197 = vector.shape_cast %196 : vector<2x4x16x4xf32> to vector<128x4xf32>
    %198 = vector.extract_strided_slice %0 {offsets = [1, 0, 0], sizes = [1, 4, 32], strides = [1, 1, 1]} : vector<9x4x32xf32> to vector<1x4x32xf32>
    %199 = vector.shape_cast %198 : vector<1x4x32xf32> to vector<4x32xf32>
    %cst_149 = arith.constant dense<0.000000e+00> : vector<128x32xf32>
    %200 = tpu.matmul %197, %199, %cst_149 {dimension_numbers = #tpu.dot_dimension_numbers<[1], [0], [0], [1], [0, 0, 1, 1], [], []>} : vector<128x4xf32>, vector<4x32xf32>, vector<128x32xf32> -> vector<128x32xf32>
    %201 = arith.addf %195, %200 : vector<128x32xf32>
    %c0_150 = arith.constant 0 : index
    %c12_151 = arith.constant 12 : index
    %c2_152 = arith.constant 2 : index
    %c0_153 = arith.constant 0 : index
    %202 = vector.load %arg3[%c0_150, %c12_151, %c2_152, %c0_153] : memref<2x18x18x4xf32, #tpu.memory_space<vmem>>, vector<2x4x16x4xf32>
    %203 = vector.shape_cast %202 : vector<2x4x16x4xf32> to vector<128x4xf32>
    %204 = vector.extract_strided_slice %0 {offsets = [2, 0, 0], sizes = [1, 4, 32], strides = [1, 1, 1]} : vector<9x4x32xf32> to vector<1x4x32xf32>
    %205 = vector.shape_cast %204 : vector<1x4x32xf32> to vector<4x32xf32>
    %cst_154 = arith.constant dense<0.000000e+00> : vector<128x32xf32>
    %206 = tpu.matmul %203, %205, %cst_154 {dimension_numbers = #tpu.dot_dimension_numbers<[1], [0], [0], [1], [0, 0, 1, 1], [], []>} : vector<128x4xf32>, vector<4x32xf32>, vector<128x32xf32> -> vector<128x32xf32>
    %207 = arith.addf %201, %206 : vector<128x32xf32>
    %c0_155 = arith.constant 0 : index
    %c13 = arith.constant 13 : index
    %c0_156 = arith.constant 0 : index
    %c0_157 = arith.constant 0 : index
    %208 = vector.load %arg3[%c0_155, %c13, %c0_156, %c0_157] : memref<2x18x18x4xf32, #tpu.memory_space<vmem>>, vector<2x4x16x4xf32>
    %209 = vector.shape_cast %208 : vector<2x4x16x4xf32> to vector<128x4xf32>
    %210 = vector.extract_strided_slice %0 {offsets = [3, 0, 0], sizes = [1, 4, 32], strides = [1, 1, 1]} : vector<9x4x32xf32> to vector<1x4x32xf32>
    %211 = vector.shape_cast %210 : vector<1x4x32xf32> to vector<4x32xf32>
    %cst_158 = arith.constant dense<0.000000e+00> : vector<128x32xf32>
    %212 = tpu.matmul %209, %211, %cst_158 {dimension_numbers = #tpu.dot_dimension_numbers<[1], [0], [0], [1], [0, 0, 1, 1], [], []>} : vector<128x4xf32>, vector<4x32xf32>, vector<128x32xf32> -> vector<128x32xf32>
    %213 = arith.addf %207, %212 : vector<128x32xf32>
    %c0_159 = arith.constant 0 : index
    %c13_160 = arith.constant 13 : index
    %c1_161 = arith.constant 1 : index
    %c0_162 = arith.constant 0 : index
    %214 = vector.load %arg3[%c0_159, %c13_160, %c1_161, %c0_162] : memref<2x18x18x4xf32, #tpu.memory_space<vmem>>, vector<2x4x16x4xf32>
    %215 = vector.shape_cast %214 : vector<2x4x16x4xf32> to vector<128x4xf32>
    %216 = vector.extract_strided_slice %0 {offsets = [4, 0, 0], sizes = [1, 4, 32], strides = [1, 1, 1]} : vector<9x4x32xf32> to vector<1x4x32xf32>
    %217 = vector.shape_cast %216 : vector<1x4x32xf32> to vector<4x32xf32>
    %cst_163 = arith.constant dense<0.000000e+00> : vector<128x32xf32>
    %218 = tpu.matmul %215, %217, %cst_163 {dimension_numbers = #tpu.dot_dimension_numbers<[1], [0], [0], [1], [0, 0, 1, 1], [], []>} : vector<128x4xf32>, vector<4x32xf32>, vector<128x32xf32> -> vector<128x32xf32>
    %219 = arith.addf %213, %218 : vector<128x32xf32>
    %c0_164 = arith.constant 0 : index
    %c13_165 = arith.constant 13 : index
    %c2_166 = arith.constant 2 : index
    %c0_167 = arith.constant 0 : index
    %220 = vector.load %arg3[%c0_164, %c13_165, %c2_166, %c0_167] : memref<2x18x18x4xf32, #tpu.memory_space<vmem>>, vector<2x4x16x4xf32>
    %221 = vector.shape_cast %220 : vector<2x4x16x4xf32> to vector<128x4xf32>
    %222 = vector.extract_strided_slice %0 {offsets = [5, 0, 0], sizes = [1, 4, 32], strides = [1, 1, 1]} : vector<9x4x32xf32> to vector<1x4x32xf32>
    %223 = vector.shape_cast %222 : vector<1x4x32xf32> to vector<4x32xf32>
    %cst_168 = arith.constant dense<0.000000e+00> : vector<128x32xf32>
    %224 = tpu.matmul %221, %223, %cst_168 {dimension_numbers = #tpu.dot_dimension_numbers<[1], [0], [0], [1], [0, 0, 1, 1], [], []>} : vector<128x4xf32>, vector<4x32xf32>, vector<128x32xf32> -> vector<128x32xf32>
    %225 = arith.addf %219, %224 : vector<128x32xf32>
    %c0_169 = arith.constant 0 : index
    %c14 = arith.constant 14 : index
    %c0_170 = arith.constant 0 : index
    %c0_171 = arith.constant 0 : index
    %226 = vector.load %arg3[%c0_169, %c14, %c0_170, %c0_171] : memref<2x18x18x4xf32, #tpu.memory_space<vmem>>, vector<2x4x16x4xf32>
    %227 = vector.shape_cast %226 : vector<2x4x16x4xf32> to vector<128x4xf32>
    %228 = vector.extract_strided_slice %0 {offsets = [6, 0, 0], sizes = [1, 4, 32], strides = [1, 1, 1]} : vector<9x4x32xf32> to vector<1x4x32xf32>
    %229 = vector.shape_cast %228 : vector<1x4x32xf32> to vector<4x32xf32>
    %cst_172 = arith.constant dense<0.000000e+00> : vector<128x32xf32>
    %230 = tpu.matmul %227, %229, %cst_172 {dimension_numbers = #tpu.dot_dimension_numbers<[1], [0], [0], [1], [0, 0, 1, 1], [], []>} : vector<128x4xf32>, vector<4x32xf32>, vector<128x32xf32> -> vector<128x32xf32>
    %231 = arith.addf %225, %230 : vector<128x32xf32>
    %c0_173 = arith.constant 0 : index
    %c14_174 = arith.constant 14 : index
    %c1_175 = arith.constant 1 : index
    %c0_176 = arith.constant 0 : index
    %232 = vector.load %arg3[%c0_173, %c14_174, %c1_175, %c0_176] : memref<2x18x18x4xf32, #tpu.memory_space<vmem>>, vector<2x4x16x4xf32>
    %233 = vector.shape_cast %232 : vector<2x4x16x4xf32> to vector<128x4xf32>
    %234 = vector.extract_strided_slice %0 {offsets = [7, 0, 0], sizes = [1, 4, 32], strides = [1, 1, 1]} : vector<9x4x32xf32> to vector<1x4x32xf32>
    %235 = vector.shape_cast %234 : vector<1x4x32xf32> to vector<4x32xf32>
    %cst_177 = arith.constant dense<0.000000e+00> : vector<128x32xf32>
    %236 = tpu.matmul %233, %235, %cst_177 {dimension_numbers = #tpu.dot_dimension_numbers<[1], [0], [0], [1], [0, 0, 1, 1], [], []>} : vector<128x4xf32>, vector<4x32xf32>, vector<128x32xf32> -> vector<128x32xf32>
    %237 = arith.addf %231, %236 : vector<128x32xf32>
    %c0_178 = arith.constant 0 : index
    %c14_179 = arith.constant 14 : index
    %c2_180 = arith.constant 2 : index
    %c0_181 = arith.constant 0 : index
    %238 = vector.load %arg3[%c0_178, %c14_179, %c2_180, %c0_181] : memref<2x18x18x4xf32, #tpu.memory_space<vmem>>, vector<2x4x16x4xf32>
    %239 = vector.shape_cast %238 : vector<2x4x16x4xf32> to vector<128x4xf32>
    %240 = vector.extract_strided_slice %0 {offsets = [8, 0, 0], sizes = [1, 4, 32], strides = [1, 1, 1]} : vector<9x4x32xf32> to vector<1x4x32xf32>
    %241 = vector.shape_cast %240 : vector<1x4x32xf32> to vector<4x32xf32>
    %cst_182 = arith.constant dense<0.000000e+00> : vector<128x32xf32>
    %242 = tpu.matmul %239, %241, %cst_182 {dimension_numbers = #tpu.dot_dimension_numbers<[1], [0], [0], [1], [0, 0, 1, 1], [], []>} : vector<128x4xf32>, vector<4x32xf32>, vector<128x32xf32> -> vector<128x32xf32>
    %243 = arith.addf %237, %242 : vector<128x32xf32>
    %244 = vector.broadcast %1 : vector<1x32xf32> to vector<128x32xf32>
    %245 = arith.addf %243, %244 : vector<128x32xf32>
    %cst_183 = arith.constant 0.000000e+00 : f32
    %246 = vector.broadcast %cst_183 : f32 to vector<128x32xf32>
    %247 = arith.maximumf %245, %246 : vector<128x32xf32>
    %248 = vector.shape_cast %247 : vector<128x32xf32> to vector<2x64x32xf32>
    %cst_184 = arith.constant dense<0.000000e+00> : vector<2x32xf32>
    %249 = vector.multi_reduction <add>, %248, %cst_184 [1] : vector<2x64x32xf32> to vector<2x32xf32>
    %250 = arith.addf %188, %249 : vector<2x32xf32>
    %cst_185 = arith.constant 3.906250e-03 : f32
    %251 = vector.broadcast %cst_185 : f32 to vector<2x32xf32>
    %252 = arith.mulf %250, %251 : vector<2x32xf32>
    %c0_186 = arith.constant 0 : index
    %c0_187 = arith.constant 0 : index
    %253 = vector.load %arg1[%c0_186, %c0_187] : memref<2x1xi32, #tpu.memory_space<vmem>>, vector<2x1xi32>
    %254 = tpu.iota {dimensions = array<i32: 1>} : vector<2x8xi32>
    %255 = vector.broadcast %253 : vector<2x1xi32> to vector<2x8xi32>
    %256 = arith.cmpi slt, %254, %255 : vector<2x8xi32>
    %257 = arith.extui %256 : vector<2x8xi1> to vector<2x8xi32>
    %258 = arith.sitofp %257 : vector<2x8xi32> to vector<2x8xf32>
    %c1_i32 = arith.constant 1 : i32
    %c8_i32 = arith.constant 8 : i32
    %259 = vector.broadcast %c1_i32 : i32 to vector<2x1xi32>
    %260 = arith.maxsi %259, %253 : vector<2x1xi32>
    %261 = vector.broadcast %c8_i32 : i32 to vector<2x1xi32>
    %262 = arith.minsi %261, %260 : vector<2x1xi32>
    %263 = arith.sitofp %262 : vector<2x1xi32> to vector<2x1xf32>
    %c0_188 = arith.constant 0 : index
    %c0_189 = arith.constant 0 : index
    %c0_190 = arith.constant 0 : index
    %264 = vector.load %arg2[%c0_188, %c0_189, %c0_190] : memref<2x8x32xf32, #tpu.memory_space<vmem>>, vector<2x8x32xf32>
    %265 = vector.shape_cast %258 : vector<2x8xf32> to vector<2x8x1xf32>
    %266 = vector.broadcast %265 : vector<2x8x1xf32> to vector<2x8x32xf32>
    %267 = arith.mulf %264, %266 : vector<2x8x32xf32>
    %cst_191 = arith.constant dense<0.000000e+00> : vector<2x32xf32>
    %268 = vector.multi_reduction <add>, %267, %cst_191 [1] : vector<2x8x32xf32> to vector<2x32xf32>
    %269 = vector.broadcast %263 : vector<2x1xf32> to vector<2x32xf32>
    %270 = arith.divf %268, %269 : vector<2x32xf32>
    %c0_192 = arith.constant 0 : index
    %c0_193 = arith.constant 0 : index
    %271 = vector.load %arg6[%c0_192, %c0_193] : memref<32x32xf32, #tpu.memory_space<vmem>>, vector<32x32xf32>
    %cst_194 = arith.constant dense<0.000000e+00> : vector<2x32xf32>
    %272 = tpu.matmul %270, %271, %cst_194 {dimension_numbers = #tpu.dot_dimension_numbers<[1], [0], [0], [1], [0, 0, 1, 1], [], []>} : vector<2x32xf32>, vector<32x32xf32>, vector<2x32xf32> -> vector<2x32xf32>
    %c0_195 = arith.constant 0 : index
    %c0_196 = arith.constant 0 : index
    %273 = vector.load %arg7[%c0_195, %c0_196] : memref<1x32xf32, #tpu.memory_space<vmem>>, vector<1x32xf32>
    %274 = vector.broadcast %273 : vector<1x32xf32> to vector<2x32xf32>
    %275 = arith.addf %272, %274 : vector<2x32xf32>
    %cst_197 = arith.constant 0.000000e+00 : f32
    %276 = vector.broadcast %cst_197 : f32 to vector<2x32xf32>
    %277 = arith.maximumf %275, %276 : vector<2x32xf32>
    %278 = tpu.concatenate %277, %252 in 1 : vector<2x32xf32>, vector<2x32xf32> -> vector<2x64xf32>
    %c0_198 = arith.constant 0 : index
    %c0_199 = arith.constant 0 : index
    %279 = vector.load %arg8[%c0_198, %c0_199] : memref<64x32xf32, #tpu.memory_space<vmem>>, vector<64x32xf32>
    %cst_200 = arith.constant dense<0.000000e+00> : vector<2x32xf32>
    %280 = tpu.matmul %278, %279, %cst_200 {dimension_numbers = #tpu.dot_dimension_numbers<[1], [0], [0], [1], [0, 0, 1, 1], [], []>} : vector<2x64xf32>, vector<64x32xf32>, vector<2x32xf32> -> vector<2x32xf32>
    %c0_201 = arith.constant 0 : index
    %c0_202 = arith.constant 0 : index
    %281 = vector.load %arg9[%c0_201, %c0_202] : memref<1x32xf32, #tpu.memory_space<vmem>>, vector<1x32xf32>
    %282 = vector.broadcast %281 : vector<1x32xf32> to vector<2x32xf32>
    %283 = arith.addf %280, %282 : vector<2x32xf32>
    %cst_203 = arith.constant 0.000000e+00 : f32
    %284 = vector.broadcast %cst_203 : f32 to vector<2x32xf32>
    %285 = arith.maximumf %283, %284 : vector<2x32xf32>
    %c0_204 = arith.constant 0 : index
    %c0_205 = arith.constant 0 : index
    %286 = vector.load %arg10[%c0_204, %c0_205] : memref<32x64xf32, #tpu.memory_space<vmem>>, vector<32x64xf32>
    %cst_206 = arith.constant dense<0.000000e+00> : vector<2x64xf32>
    %287 = tpu.matmul %285, %286, %cst_206 {dimension_numbers = #tpu.dot_dimension_numbers<[1], [0], [0], [1], [0, 0, 1, 1], [], []>} : vector<2x32xf32>, vector<32x64xf32>, vector<2x64xf32> -> vector<2x64xf32>
    %c0_207 = arith.constant 0 : index
    %c0_208 = arith.constant 0 : index
    %288 = vector.load %arg11[%c0_207, %c0_208] : memref<1x64xf32, #tpu.memory_space<vmem>>, vector<1x64xf32>
    %289 = vector.broadcast %288 : vector<1x64xf32> to vector<2x64xf32>
    %290 = arith.addf %287, %289 : vector<2x64xf32>
    %cst_209 = arith.constant 5.000000e-01 : f32
    %291 = vector.broadcast %cst_209 : f32 to vector<2x64xf32>
    %292 = arith.mulf %291, %290 : vector<2x64xf32>
    %cst_210 = arith.constant 0.707106769 : f32
    %293 = vector.broadcast %cst_210 : f32 to vector<2x64xf32>
    %294 = arith.mulf %290, %293 : vector<2x64xf32>
    %cst_211 = arith.constant 0.000000e+00 : f32
    %295 = vector.broadcast %cst_211 : f32 to vector<2x64xf32>
    %296 = arith.cmpf oge, %294, %295 : vector<2x64xf32>
    %cst_212 = arith.constant 1.000000e+00 : f32
    %cst_213 = arith.constant -1.000000e+00 : f32
    %297 = vector.broadcast %cst_212 : f32 to vector<2x64xf32>
    %298 = vector.broadcast %cst_213 : f32 to vector<2x64xf32>
    %299 = arith.select %296, %297, %298 : vector<2x64xi1>, vector<2x64xf32>
    %300 = math.absf %294 : vector<2x64xf32>
    %cst_214 = arith.constant 0.327591091 : f32
    %301 = vector.broadcast %cst_214 : f32 to vector<2x64xf32>
    %302 = arith.mulf %301, %300 : vector<2x64xf32>
    %cst_215 = arith.constant 1.000000e+00 : f32
    %303 = vector.broadcast %cst_215 : f32 to vector<2x64xf32>
    %304 = arith.addf %303, %302 : vector<2x64xf32>
    %cst_216 = arith.constant 1.000000e+00 : f32
    %305 = vector.broadcast %cst_216 : f32 to vector<2x64xf32>
    %306 = arith.divf %305, %304 : vector<2x64xf32>
    %cst_217 = arith.constant 1.06140542 : f32
    %307 = vector.broadcast %cst_217 : f32 to vector<2x64xf32>
    %308 = arith.mulf %307, %306 : vector<2x64xf32>
    %cst_218 = arith.constant -1.45315206 : f32
    %309 = vector.broadcast %cst_218 : f32 to vector<2x64xf32>
    %310 = arith.addf %308, %309 : vector<2x64xf32>
    %311 = arith.mulf %310, %306 : vector<2x64xf32>
    %cst_219 = arith.constant 1.42141378 : f32
    %312 = vector.broadcast %cst_219 : f32 to vector<2x64xf32>
    %313 = arith.addf %311, %312 : vector<2x64xf32>
    %314 = arith.mulf %313, %306 : vector<2x64xf32>
    %cst_220 = arith.constant -0.284496725 : f32
    %315 = vector.broadcast %cst_220 : f32 to vector<2x64xf32>
    %316 = arith.addf %314, %315 : vector<2x64xf32>
    %317 = arith.mulf %316, %306 : vector<2x64xf32>
    %cst_221 = arith.constant 0.254829586 : f32
    %318 = vector.broadcast %cst_221 : f32 to vector<2x64xf32>
    %319 = arith.addf %317, %318 : vector<2x64xf32>
    %320 = arith.mulf %319, %306 : vector<2x64xf32>
    %cst_222 = arith.constant 0.000000e+00 : f32
    %321 = vector.broadcast %cst_222 : f32 to vector<2x64xf32>
    %322 = arith.subf %321, %300 : vector<2x64xf32>
    %323 = arith.mulf %322, %300 : vector<2x64xf32>
    %324 = math.exp %323 : vector<2x64xf32>
    %325 = arith.mulf %320, %324 : vector<2x64xf32>
    %cst_223 = arith.constant 1.000000e+00 : f32
    %326 = vector.broadcast %cst_223 : f32 to vector<2x64xf32>
    %327 = arith.subf %326, %325 : vector<2x64xf32>
    %328 = arith.mulf %299, %327 : vector<2x64xf32>
    %cst_224 = arith.constant 1.000000e+00 : f32
    %329 = vector.broadcast %cst_224 : f32 to vector<2x64xf32>
    %330 = arith.addf %329, %328 : vector<2x64xf32>
    %331 = arith.mulf %292, %330 : vector<2x64xf32>
    %cst_225 = arith.constant dense<0.000000e+00> : vector<2xf32>
    %332 = vector.multi_reduction <add>, %331, %cst_225 [1] : vector<2x64xf32> to vector<2xf32>
    %333 = vector.shape_cast %332 : vector<2xf32> to vector<2x1xf32>
    %cst_226 = arith.constant 6.400000e+01 : f32
    %334 = vector.broadcast %cst_226 : f32 to vector<2x1xf32>
    %335 = arith.divf %333, %334 : vector<2x1xf32>
    %336 = vector.broadcast %335 : vector<2x1xf32> to vector<2x64xf32>
    %337 = arith.subf %331, %336 : vector<2x64xf32>
    %338 = arith.mulf %337, %337 : vector<2x64xf32>
    %cst_227 = arith.constant dense<0.000000e+00> : vector<2xf32>
    %339 = vector.multi_reduction <add>, %338, %cst_227 [1] : vector<2x64xf32> to vector<2xf32>
    %340 = vector.shape_cast %339 : vector<2xf32> to vector<2x1xf32>
    %cst_228 = arith.constant 6.400000e+01 : f32
    %341 = vector.broadcast %cst_228 : f32 to vector<2x1xf32>
    %342 = arith.divf %340, %341 : vector<2x1xf32>
    %343 = vector.broadcast %335 : vector<2x1xf32> to vector<2x64xf32>
    %344 = arith.subf %331, %343 : vector<2x64xf32>
    %cst_229 = arith.constant 9.99999996E-13 : f32
    %345 = vector.broadcast %cst_229 : f32 to vector<2x1xf32>
    %346 = arith.addf %342, %345 : vector<2x1xf32>
    %347 = math.rsqrt %346 : vector<2x1xf32>
    %348 = vector.broadcast %347 : vector<2x1xf32> to vector<2x64xf32>
    %349 = arith.mulf %344, %348 : vector<2x64xf32>
    %c0_230 = arith.constant 0 : index
    %c0_231 = arith.constant 0 : index
    %350 = vector.load %arg12[%c0_230, %c0_231] : memref<1x64xf32, #tpu.memory_space<vmem>>, vector<1x64xf32>
    %351 = vector.broadcast %350 : vector<1x64xf32> to vector<2x64xf32>
    %352 = arith.mulf %349, %351 : vector<2x64xf32>
    %c0_232 = arith.constant 0 : index
    %c0_233 = arith.constant 0 : index
    %353 = vector.load %arg13[%c0_232, %c0_233] : memref<1x64xf32, #tpu.memory_space<vmem>>, vector<1x64xf32>
    %354 = vector.broadcast %353 : vector<1x64xf32> to vector<2x64xf32>
    %355 = arith.addf %352, %354 : vector<2x64xf32>
    %c0_234 = arith.constant 0 : index
    %c0_235 = arith.constant 0 : index
    %356 = vector.load %arg14[%c0_234, %c0_235] : memref<64x128xf32, #tpu.memory_space<vmem>>, vector<64x128xf32>
    %cst_236 = arith.constant dense<0.000000e+00> : vector<2x128xf32>
    %357 = tpu.matmul %355, %356, %cst_236 {dimension_numbers = #tpu.dot_dimension_numbers<[1], [0], [0], [1], [0, 0, 1, 1], [], []>} : vector<2x64xf32>, vector<64x128xf32>, vector<2x128xf32> -> vector<2x128xf32>
    %c0_237 = arith.constant 0 : index
    %c0_238 = arith.constant 0 : index
    %358 = vector.load %arg15[%c0_237, %c0_238] : memref<1x128xf32, #tpu.memory_space<vmem>>, vector<1x128xf32>
    %359 = vector.broadcast %358 : vector<1x128xf32> to vector<2x128xf32>
    %360 = arith.addf %357, %359 : vector<2x128xf32>
    %c0_239 = arith.constant 0 : index
    %c0_240 = arith.constant 0 : index
    %361 = vector.load %arg16[%c0_239, %c0_240] : memref<2x128xf32, #tpu.memory_space<vmem>>, vector<2x128xf32>
    tpu.vector_store %arg16[%c0_239, %c0_240], %360 {strides = array<i32>} : memref<2x128xf32, #tpu.memory_space<vmem>>, vector<2x128xf32>,
    return
  }
  func.func @transform_0(%arg0: i32) -> (i32, i32) {
    %c0_i32 = arith.constant 0 : i32
    %c0_i32_0 = arith.constant 0 : i32
    return %arg0, %c0_i32 : i32, i32
  }
  func.func @transform_1(%arg0: i32) -> (i32, i32, i32) {
    %c0_i32 = arith.constant 0 : i32
    %c0_i32_0 = arith.constant 0 : i32
    %c0_i32_1 = arith.constant 0 : i32
    return %arg0, %c0_i32, %c0_i32_0 : i32, i32, i32
  }
  func.func @transform_2(%arg0: i32) -> (i32, i32, i32, i32) {
    %c0_i32 = arith.constant 0 : i32
    %c0_i32_0 = arith.constant 0 : i32
    %c0_i32_1 = arith.constant 0 : i32
    %c0_i32_2 = arith.constant 0 : i32
    return %arg0, %c0_i32, %c0_i32_0, %c0_i32_1 : i32, i32, i32, i32
  }
  func.func @transform_3(%arg0: i32) -> (i32, i32, i32) {
    %c0_i32 = arith.constant 0 : i32
    %c0_i32_0 = arith.constant 0 : i32
    %c0_i32_1 = arith.constant 0 : i32
    %c0_i32_2 = arith.constant 0 : i32
    return %c0_i32, %c0_i32_0, %c0_i32_1 : i32, i32, i32
  }
  func.func @transform_4(%arg0: i32) -> (i32, i32) {
    %c0_i32 = arith.constant 0 : i32
    %c0_i32_0 = arith.constant 0 : i32
    %c0_i32_1 = arith.constant 0 : i32
    return %c0_i32, %c0_i32_0 : i32, i32
  }
  func.func @transform_5(%arg0: i32) -> (i32, i32) {
    %c0_i32 = arith.constant 0 : i32
    %c0_i32_0 = arith.constant 0 : i32
    %c0_i32_1 = arith.constant 0 : i32
    return %c0_i32, %c0_i32_0 : i32, i32
  }
  func.func @transform_6(%arg0: i32) -> (i32, i32) {
    %c0_i32 = arith.constant 0 : i32
    %c0_i32_0 = arith.constant 0 : i32
    %c0_i32_1 = arith.constant 0 : i32
    return %c0_i32, %c0_i32_0 : i32, i32
  }
  func.func @transform_7(%arg0: i32) -> (i32, i32) {
    %c0_i32 = arith.constant 0 : i32
    %c0_i32_0 = arith.constant 0 : i32
    %c0_i32_1 = arith.constant 0 : i32
    return %c0_i32, %c0_i32_0 : i32, i32
  }
  func.func @transform_8(%arg0: i32) -> (i32, i32) {
    %c0_i32 = arith.constant 0 : i32
    %c0_i32_0 = arith.constant 0 : i32
    %c0_i32_1 = arith.constant 0 : i32
    return %c0_i32, %c0_i32_0 : i32, i32
  }
  func.func @transform_9(%arg0: i32) -> (i32, i32) {
    %c0_i32 = arith.constant 0 : i32
    %c0_i32_0 = arith.constant 0 : i32
    %c0_i32_1 = arith.constant 0 : i32
    return %c0_i32, %c0_i32_0 : i32, i32
  }
  func.func @transform_10(%arg0: i32) -> (i32, i32) {
    %c0_i32 = arith.constant 0 : i32
    %c0_i32_0 = arith.constant 0 : i32
    %c0_i32_1 = arith.constant 0 : i32
    return %c0_i32, %c0_i32_0 : i32, i32
  }
  func.func @transform_11(%arg0: i32) -> (i32, i32) {
    %c0_i32 = arith.constant 0 : i32
    %c0_i32_0 = arith.constant 0 : i32
    %c0_i32_1 = arith.constant 0 : i32
    return %c0_i32, %c0_i32_0 : i32, i32
  }
  func.func @transform_12(%arg0: i32) -> (i32, i32) {
    %c0_i32 = arith.constant 0 : i32
    %c0_i32_0 = arith.constant 0 : i32
    %c0_i32_1 = arith.constant 0 : i32
    return %c0_i32, %c0_i32_0 : i32, i32
  }
  func.func @transform_13(%arg0: i32) -> (i32, i32) {
    %c0_i32 = arith.constant 0 : i32
    %c0_i32_0 = arith.constant 0 : i32
    %c0_i32_1 = arith.constant 0 : i32
    return %c0_i32, %c0_i32_0 : i32, i32
  }
  func.func @transform_14(%arg0: i32) -> (i32, i32) {
    %c0_i32 = arith.constant 0 : i32
    %c0_i32_0 = arith.constant 0 : i32
    %c0_i32_1 = arith.constant 0 : i32
    return %c0_i32, %c0_i32_0 : i32, i32
  }
  func.func @transform_15(%arg0: i32) -> (i32, i32) {
    %c0_i32 = arith.constant 0 : i32
    %c0_i32_0 = arith.constant 0 : i32
    return %arg0, %c0_i32 : i32, i32
  }
}

</mosaic_0001>

<bundles_post_ra>
// kernel: chartfc_forward.1
= control target key start
LH: loop header
LB: loop body
LE: loop exit
PB: predicated region body
PF: predicated region fallthrough
CT: control target
= control target key end

     0   :  { %vm142_vm0 = vcmask 1043456   ;;  %vm93_vm1 = vcmask 31744   ;;  %s10192_s0 = inlined_call_operand.vmem [shape: s32[2,1], index: 0, kind: input, shape index: {}]   ;;  %s10193_s1 = inlined_call_operand.vmem [shape: f32[2,8,32], index: 1, kind: input, shape index: {}]   ;;  %s10194_s2 = inlined_call_operand.vmem [shape: f32[2,18,18,4], index: 2, kind: input, shape index: {}]   ;;  %s10195_s3 = inlined_call_operand.vmem [shape: f32[9,4,32], index: 3, kind: input, shape index: {}]   ;;  %s10196_s4 = inlined_call_operand.vmem [shape: f32[1,32], index: 4, kind: input, shape index: {}]   ;;  %s10197_s5 = inlined_call_operand.vmem [shape: f32[32,32], index: 5, kind: input, shape index: {}]   ;;  %s10198_s6 = inlined_call_operand.vmem [shape: f32[1,32], index: 6, kind: input, shape index: {}]   ;;  %s10199_s7 = inlined_call_operand.vmem [shape: f32[64,32], index: 7, kind: input, shape index: {}]   ;;  %s10200_s8 = inlined_call_operand.vmem [shape: f32[1,32], index: 8, kind: input, shape index: {}]   ;;  %s10201_s9 = inlined_call_operand.vmem [shape: f32[32,64], index: 9, kind: input, shape index: {}]   ;;  %s10202_s10 = inlined_call_operand.vmem [shape: f32[1,64], index: 10, kind: input, shape index: {}]   ;;  %s10203_s11 = inlined_call_operand.vmem [shape: f32[1,64], index: 11, kind: input, shape index: {}]   ;;  %s10204_s12 = inlined_call_operand.vmem [shape: f32[1,64], index: 12, kind: input, shape index: {}]   ;;  %s10205_s13 = inlined_call_operand.vmem [shape: f32[64,128], index: 13, kind: input, shape index: {}]   ;;  %s10206_s14 = inlined_call_operand.vmem [shape: f32[1,128], index: 14, kind: input, shape index: {}]   ;;  %s10207_s15 = inlined_call_operand.hbm [shape: f32[2,128], index: 15, kind: output, shape index: {}]  }
   0x1   :  { %v7135_v0 = vld [vmem:[%s10195_s3 + $0x4] sm:$0xf]  ;;  %v53_v1 = vld [vmem:[%s10195_s3 + $0x8] sm:$0xf]  ;;  %v7149_v3 = vld [vmem:[%s10195_s3 + $0xc] sm:$0xf] }
   0x2   :  { %v77_v2 = vld [vmem:[%s10194_s2 + $0x1] sm:$0xff]  ;;  %5829 = vmatpush.msk.msra.mxu0 %vm142_vm0, %v7135_v0  ;;  %5863 = vmatpush.msk.msra.mxu2 %vm142_vm0, %v53_v1  ;;  %v5880_v5 = vld [vmem:[%s10194_s2 + $0x18] sm:$0xff]  ;;  %v7178_v9 = vld [vmem:[%s10195_s3 + $0x10] sm:$0xf] }
   0x3   :  { %v327_v4 = vld [vmem:[%s10194_s2 + $0x2] sm:$0xff]  ;;  %5896 = vmatpush.msk.msra.mxu3 %vm142_vm0, %v7149_v3  ;;  %5830 = vmatmul.msk.f32.vlgmr.msra.gmra.mxu0 %vm93_vm1, %v77_v2  ;;  %v7163_v6 = vld [vmem:[%s10195_s3 + $0x18] sm:$0xf]  ;;  %v7183_v10 = vld [vmem:[%s10195_s3 + $0x1c] sm:$0xf] }
   0x4   :  { %v7168_v7 = vld [vmem:[%s10195_s3] sm:$0xf]  ;;  %5864 = vmatmul.msk.f32.vlgmr.msra.gmra.mxu2 %vm93_vm1, %v327_v4  ;;  %5897 = vmatmul.msk.f32.vlgmr.msra.gmra.mxu3 %vm93_vm1, %v5880_v5  ;;  %v7188_v11 = vld [vmem:[%s10195_s3 + $0x14] sm:$0xf]  ;;  %v78_v12 = vld [vmem:[%s10194_s2 + $0x9] sm:$0xff] }
   0x5   :  { %v61_v8 = vld [vmem:[%s10194_s2] sm:$0xff]  ;;  %5995 = vmatpush.msk.msrb.mxu2 %vm142_vm0, %v7163_v6  ;;  %5846 = vmatpush.msk.msra.mxu1 %vm142_vm0, %v7168_v7  ;;  %v328_v13 = vld [vmem:[%s10194_s2 + $0xa] sm:$0xff] }
   0x6   :  { %5847 = vmatmul.msk.f32.vlgmr.msra.gmra.mxu1 %vm93_vm1, %v61_v8  ;;  %5929 = vmatpush.msk.msrb.mxu0 %vm142_vm0, %v7178_v9  ;;  %v5881_v14 = vld [vmem:[%s10194_s2 + $0x20] sm:$0xff]  ;;  %v62_v15 = vld [vmem:[%s10194_s2 + $0x8] sm:$0xff] }
   0x7   :  { %6028 = vmatpush.msk.msrb.mxu3 %vm142_vm0, %v7183_v10  ;;  %5962 = vmatpush.msk.msrb.mxu1 %vm142_vm0, %v7188_v11 }
   0x8   :  { %6127 = vmatpush.msk.msra.mxu2 %vm142_vm0, %v7168_v7 }
   0x9   :  { %6160 = vmatpush.msk.msra.mxu3 %vm142_vm0, %v53_v1  ;;  %6110 = vmatpush.msk.msra.mxu1 %vm142_vm0, %v7135_v0 }
   0xb   :  { %5831 = vmatmul.msk.f32.gmra.mxu0 %vm93_vm1, %v78_v12 }
   0xc   :  { %5865 = vmatmul.msk.f32.gmra.mxu2 %vm93_vm1, %v328_v13  ;;  %5898 = vmatmul.msk.f32.gmra.mxu3 %vm93_vm1, %v5881_v14 }
   0xd   :  { %20 = vsyncpa [#allocation3], 0  ;;  %v7225_v16 = vld [vmem:[%s10194_s2 + $0x19] sm:$0xff]  ;;  %v7235_v18 = vld [vmem:[%s10194_s2 + $0x30] sm:$0xff]  ;;  %vm1400_vm2 = vcmask 261120   ;;  %vm5597_vm14 = vcmask 1041409  }
   0xe   :  { %5848 = vmatmul.msk.f32.gmra.mxu1 %vm93_vm1, %v62_v15  ;;  %v7230_v17 = vld [vmem:[%s10194_s2 + $0x1a] sm:$0xff]  ;;  %v7252_v20 = vld [vmem:[%s10194_s2 + $0x22] sm:$0xff]  ;;  %v7269_v22 = vld [vmem:[%s10194_s2 + $0x31] sm:$0xff]  ;;  %vm5641_vm15 = vcmask 523264   ;;  %s7051_s29 = smov [#allocation2]  }
   0xf   :  { %v7247_v19 = vld [vmem:[%s10194_s2 + $0x21] sm:$0xff]  ;;  %v7257_v21 = vld [vmem:[%s10194_s2 + $0x38] sm:$0xff]  ;;  %v7302_v27 = vld [vmem:[%s10194_s2 + $0x50] sm:$0xff] }
  0x10   :  { %v7274_v23 = vld [vmem:[%s10194_s2 + $0x32] sm:$0xff]  ;;  %v7279_v24 = vld [vmem:[%s10194_s2 + $0x48] sm:$0xff]  ;;  %v7297_v26 = vld [vmem:[%s10194_s2 + $0x3a] sm:$0xff] }
  0x11   :  { %v7292_v25 = vld [vmem:[%s10194_s2 + $0x39] sm:$0xff]  ;;  %v7315_v28 = vld [vmem:[%s10194_s2 + $0x49] sm:$0xff]  ;;  %v7338_v31 = vld [vmem:[%s10194_s2 + $0x51] sm:$0xff] }
  0x12   :  { %v7320_v29 = vld [vmem:[%s10194_s2 + $0x4a] sm:$0xff]  ;;  %v7325_v30 = vld [vmem:[%s10194_s2 + $0x60] sm:$0xff]  ;;  %v7343_v32 = vld [vmem:[%s10194_s2 + $0x52] sm:$0xff] }
  0x13   :  { %5832 = vmatmul.msk.f32.gmra.mxu0 %vm93_vm1, %v7225_v16  ;;  %v7348_v33 = vld [vmem:[%s10194_s2 + $0x68] sm:$0xff]  ;;  %v85_v34 = vld [vmem:[%s10194_s2 + $0x1b1] sm:$0xff]  ;;  %v86_v38 = vld [vmem:[%s10194_s2 + $0x1b9] sm:$0xff] }
  0x14   :  { %5866 = vmatmul.msk.f32.gmra.mxu2 %vm93_vm1, %v7230_v17  ;;  %5899 = vmatmul.msk.f32.gmra.mxu3 %vm93_vm1, %v7235_v18  ;;  %v335_v35 = vld [vmem:[%s10194_s2 + $0x1b2] sm:$0xff]  ;;  %v5888_v36 = vld [vmem:[%s10194_s2 + $0x1c8] sm:$0xff]  ;;  %v336_v39 = vld [vmem:[%s10194_s2 + $0x1ba] sm:$0xff] }
  0x15   :  { %v69_v37 = vld [vmem:[%s10194_s2 + $0x1b0] sm:$0xff]  ;;  %v70_v41 = vld [vmem:[%s10194_s2 + $0x1b8] sm:$0xff]  ;;  %v7403_v44 = vld [vmem:[%s10194_s2 + $0x1e0] sm:$0xff] }
  0x16   :  { %5849 = vmatmul.msk.f32.gmra.mxu1 %vm93_vm1, %v5880_v5  ;;  %v5889_v40 = vld [vmem:[%s10194_s2 + $0x1d0] sm:$0xff]  ;;  %v7425_v47 = vld [vmem:[%s10194_s2 + $0x1e8] sm:$0xff]  ;;  %v7447_v50 = vld [vmem:[%s10194_s2 + $0x1f8] sm:$0xff] }
  0x17   :  { %v7393_v42 = vld [vmem:[%s10194_s2 + $0x1c9] sm:$0xff]  ;;  %v7415_v45 = vld [vmem:[%s10194_s2 + $0x1d1] sm:$0xff]  ;;  %v7437_v48 = vld [vmem:[%s10194_s2 + $0x1e1] sm:$0xff] }
  0x18   :  { %v7398_v43 = vld [vmem:[%s10194_s2 + $0x1ca] sm:$0xff]  ;;  %v7420_v46 = vld [vmem:[%s10194_s2 + $0x1d2] sm:$0xff]  ;;  %v7442_v49 = vld [vmem:[%s10194_s2 + $0x1e2] sm:$0xff] }
  0x19   :  { %v7460_v51 = vld [vmem:[%s10195_s3 + $0x20] sm:$0xf]  ;;  %v7467_v52 = vld [vmem:[%s10194_s2 + $0x1e9] sm:$0xff]  ;;  %v7523_v60 = vld [vmem:[%s10194_s2 + $0x218] sm:$0xff] }
  0x1a   :  { %6061 = vmatpush.msk.msra.mxu0 %vm142_vm0, %v7460_v51  ;;  %v7472_v53 = vld [vmem:[%s10194_s2 + $0x1ea] sm:$0xff]  ;;  %v7477_v54 = vld [vmem:[%s10194_s2 + $0x200] sm:$0xff] }
  0x1b   :  { %5833 = vmatmul.msk.f32.gmra.mxu0 %vm93_vm1, %v7247_v19  ;;  %v7490_v55 = vld [vmem:[%s10194_s2 + $0x1f9] sm:$0xff]  ;;  %v7500_v57 = vld [vmem:[%s10194_s2 + $0x210] sm:$0xff]  ;;  %v7513_v58 = vld [vmem:[%s10194_s2 + $0x201] sm:$0xff] }
  0x1c   :  { %5867 = vmatmul.msk.f32.gmra.mxu2 %vm93_vm1, %v7252_v20  ;;  %5900 = vmatmul.msk.f32.gmra.mxu3 %vm93_vm1, %v7257_v21  ;;  %v7495_v56 = vld [vmem:[%s10194_s2 + $0x1fa] sm:$0xff]  ;;  %v7518_v59 = vld [vmem:[%s10194_s2 + $0x202] sm:$0xff] }
  0x1e   :  { %5850 = vmatmul.msk.f32.gmra.mxu1 %vm93_vm1, %v5881_v14 }
  0x23   :  { %5834 = vmatmul.msk.f32.gmra.mxu0 %vm93_vm1, %v7269_v22 }
  0x24   :  { %5868 = vmatmul.msk.f32.gmra.mxu2 %vm93_vm1, %v7274_v23  ;;  %5901 = vmatmul.msk.f32.gmra.mxu3 %vm93_vm1, %v7279_v24 }
  0x26   :  { %5851 = vmatmul.msk.f32.gmra.mxu1 %vm93_vm1, %v7235_v18 }
  0x2b   :  { %5835 = vmatmul.msk.f32.gmra.mxu0 %vm93_vm1, %v7292_v25 }
  0x2c   :  { %5869 = vmatmul.msk.f32.gmra.mxu2 %vm93_vm1, %v7297_v26  ;;  %5902 = vmatmul.msk.f32.gmra.mxu3 %vm93_vm1, %v7302_v27 }
  0x2e   :  { %5852 = vmatmul.msk.f32.gmra.mxu1 %vm93_vm1, %v7257_v21 }
  0x33   :  { %5836 = vmatmul.msk.f32.gmra.mxu0 %vm93_vm1, %v7315_v28 }
  0x34   :  { %5870 = vmatmul.msk.f32.gmra.mxu2 %vm93_vm1, %v7320_v29  ;;  %5903 = vmatmul.msk.f32.gmra.mxu3 %vm93_vm1, %v7325_v30 }
  0x36   :  { %5853 = vmatmul.msk.f32.gmra.mxu1 %vm93_vm1, %v7279_v24 }
  0x3b   :  { %5837 = vmatmul.msk.f32.gmra.mxu0 %vm93_vm1, %v7338_v31 }
  0x3c   :  { %5871 = vmatmul.msk.f32.gmra.mxu2 %vm93_vm1, %v7343_v32  ;;  %5904 = vmatmul.msk.f32.gmra.mxu3 %vm93_vm1, %v7348_v33 }
  0x3e   :  { %5854 = vmatmul.msk.f32.gmra.mxu1 %vm93_vm1, %v7302_v27 }
  0x43   :  { %5838 = vmatmul.msk.f32.gmra.mxu0 %vm93_vm1, %v85_v34 }
  0x44   :  { %5872 = vmatmul.msk.f32.gmra.mxu2 %vm93_vm1, %v335_v35  ;;  %5905 = vmatmul.msk.f32.gmra.mxu3 %vm93_vm1, %v5888_v36 }
  0x46   :  { %5855 = vmatmul.msk.f32.gmra.mxu1 %vm93_vm1, %v69_v37 }
  0x4b   :  { %5839 = vmatmul.msk.f32.gmra.mxu0 %vm93_vm1, %v86_v38  ;;  %v7582_v38 = vld [vmem:[%s10194_s2 + $0x61] sm:$0xff] }
  0x4c   :  { %5873 = vmatmul.msk.f32.gmra.mxu2 %vm93_vm1, %v336_v39  ;;  %5906 = vmatmul.msk.f32.gmra.mxu3 %vm93_vm1, %v5889_v40 }
  0x4e   :  { %5856 = vmatmul.msk.f32.gmra.mxu1 %vm93_vm1, %v70_v41 }
  0x53   :  { %5840 = vmatmul.msk.f32.gmra.mxu0 %vm93_vm1, %v7393_v42 }
  0x54   :  { %5874 = vmatmul.msk.f32.gmra.mxu2 %vm93_vm1, %v7398_v43  ;;  %5907 = vmatmul.msk.f32.gmra.mxu3 %vm93_vm1, %v7403_v44 }
  0x56   :  { %5857 = vmatmul.msk.f32.gmra.mxu1 %vm93_vm1, %v5888_v36 }
  0x5b   :  { %5841 = vmatmul.msk.f32.gmra.mxu0 %vm93_vm1, %v7415_v45 }
  0x5c   :  { %5875 = vmatmul.msk.f32.gmra.mxu2 %vm93_vm1, %v7420_v46  ;;  %5908 = vmatmul.msk.f32.gmra.mxu3 %vm93_vm1, %v7425_v47 }
  0x5e   :  { %5858 = vmatmul.msk.f32.gmra.mxu1 %vm93_vm1, %v5889_v40 }
  0x63   :  { %5842 = vmatmul.msk.f32.gmra.mxu0 %vm93_vm1, %v7437_v48 }
  0x64   :  { %5876 = vmatmul.msk.f32.gmra.mxu2 %vm93_vm1, %v7442_v49  ;;  %5909 = vmatmul.msk.f32.gmra.mxu3 %vm93_vm1, %v7447_v50 }
  0x66   :  { %5859 = vmatmul.msk.f32.gmra.mxu1 %vm93_vm1, %v7403_v44 }
  0x6b   :  { %5843 = vmatmul.msk.f32.gmra.mxu0 %vm93_vm1, %v7467_v52 }
  0x6c   :  { %5877 = vmatmul.msk.f32.gmra.mxu2 %vm93_vm1, %v7472_v53  ;;  %5910 = vmatmul.msk.f32.gmra.mxu3 %vm93_vm1, %v7477_v54 }
  0x6e   :  { %5860 = vmatmul.msk.f32.gmra.mxu1 %vm93_vm1, %v7425_v47 }
  0x73   :  { %5844 = vmatmul.msk.f32.gmra.mxu0 %vm93_vm1, %v7490_v55 }
  0x74   :  { %5878 = vmatmul.msk.f32.gmra.mxu2 %vm93_vm1, %v7495_v56  ;;  %5911 = vmatmul.msk.f32.gmra.mxu3 %vm93_vm1, %v7500_v57 }
  0x76   :  { %5861 = vmatmul.msk.f32.gmra.mxu1 %vm93_vm1, %v7447_v50 }
  0x7b   :  { %5845 = vmatmul.msk.f32.gmra.mxu0 %vm93_vm1, %v7513_v58 }
  0x7c   :  { %5879 = vmatmul.msk.f32.gmra.mxu2 %vm93_vm1, %v7518_v59  ;;  %5912 = vmatmul.msk.f32.gmra.mxu3 %vm93_vm1, %v7523_v60 }
  0x7e   :  { %5862 = vmatmul.msk.f32.gmra.mxu1 %vm93_vm1, %v7477_v54 }
  0x80   :  { %v163_v61 = vpop.f32.mrf.mxu0 }
  0x83   :  { %v279_v62 = vpop.f32.mrf.mxu1  ;;  %5930 = vmatmul.msk.f32.vlgmr.msrb.gmra.mxu0 %vm93_vm1, %v7225_v16 }
  0x84   :  { %5996 = vmatmul.msk.f32.vlgmr.msrb.gmra.mxu2 %vm93_vm1, %v7235_v18  ;;  %6029 = vmatmul.msk.f32.vlgmr.msrb.gmra.mxu3 %vm93_vm1, %v7269_v22  ;;  %v280_v63 = vadd.f32 %v279_v62, %v163_v61 }
  0x85   :  { %6259 = vmatpush.msk.msrb.mxu2 %vm142_vm0, %v7188_v11  ;;  %6193 = vmatpush.msk.msrb.mxu0 %vm142_vm0, %v7149_v3 }
  0x86   :  { %5963 = vmatmul.msk.f32.vlgmr.msrb.gmra.mxu1 %vm93_vm1, %v7230_v17  ;;  %6292 = vmatpush.msk.msrb.mxu3 %vm142_vm0, %v7163_v6 }
  0x87   :  { %v411_v1 = vpop.f32.mrf.mxu2  ;;  %v560_v2 = vpop.f32.mrf.mxu3  ;;  %6226 = vmatpush.msk.msrb.mxu1 %vm142_vm0, %v7178_v9 }
  0x88   :  { %v459_v4 = vadd.f32 %v411_v1, %v280_v63  ;;  %v166_v5 = vpop.f32.mrf.mxu0  ;;  %v7597_v63 = vld [vmem:[%s10194_s2 + $0x69] sm:$0xff] }
  0x8a   :  { %v7549_v8 = vadd.f32 %v560_v2, %v459_v4 }
  0x8b   :  { %v282_v11 = vpop.f32.mrf.mxu1  ;;  %5931 = vmatmul.msk.f32.gmra.mxu0 %vm93_vm1, %v7247_v19 }
  0x8c   :  { %5997 = vmatmul.msk.f32.gmra.mxu2 %vm93_vm1, %v7257_v21  ;;  %6030 = vmatmul.msk.f32.gmra.mxu3 %vm93_vm1, %v7292_v25  ;;  %v283_v3 = vadd.f32 %v282_v11, %v166_v5 }
  0x8e   :  { %5964 = vmatmul.msk.f32.gmra.mxu1 %vm93_vm1, %v7252_v20 }
  0x8f   :  { %v414_v6 = vpop.f32.mrf.mxu2  ;;  %v563_v9 = vpop.f32.mrf.mxu3 }
  0x90   :  { %v460_v12 = vadd.f32 %v414_v6, %v283_v3  ;;  %v169_v13 = vpop.f32.mrf.mxu0  ;;  %v7612_v6 = vld [vmem:[%s10194_s2 + $0x78] sm:$0xff] }
  0x92   :  { %v7559_v14 = vadd.f32 %v563_v9, %v460_v12 }
  0x93   :  { %v285_v15 = vpop.f32.mrf.mxu1  ;;  %5932 = vmatmul.msk.f32.gmra.mxu0 %vm93_vm1, %v7269_v22 }
  0x94   :  { %5998 = vmatmul.msk.f32.gmra.mxu2 %vm93_vm1, %v7279_v24  ;;  %6031 = vmatmul.msk.f32.gmra.mxu3 %vm93_vm1, %v7315_v28  ;;  %v286_v16 = vadd.f32 %v285_v15, %v169_v13  ;;  %v7626_v13 = vld [vmem:[%s10194_s2 + $0x62] sm:$0xff] }
  0x96   :  { %5965 = vmatmul.msk.f32.gmra.mxu1 %vm93_vm1, %v7274_v23 }
  0x97   :  { %v417_v17 = vpop.f32.mrf.mxu2  ;;  %v566_v18 = vpop.f32.mrf.mxu3 }
  0x98   :  { %v461_v19 = vadd.f32 %v417_v17, %v286_v16  ;;  %v172_v20 = vpop.f32.mrf.mxu0 }
  0x9a   :  { %v7569_v21 = vadd.f32 %v566_v18, %v461_v19 }
  0x9b   :  { %v288_v34 = vpop.f32.mrf.mxu1  ;;  %5933 = vmatmul.msk.f32.gmra.mxu0 %vm93_vm1, %v7292_v25 }
  0x9c   :  { %5999 = vmatmul.msk.f32.gmra.mxu2 %vm93_vm1, %v7302_v27  ;;  %6032 = vmatmul.msk.f32.gmra.mxu3 %vm93_vm1, %v7338_v31  ;;  %v289_v22 = vadd.f32 %v288_v34, %v172_v20  ;;  %v7637_v20 = vld [vmem:[%s10194_s2 + $0x80] sm:$0xff] }
  0x9d   :  { %v7642_v34 = vld [vmem:[%s10194_s2 + $0x81] sm:$0xff] }
  0x9e   :  { %5966 = vmatmul.msk.f32.gmra.mxu1 %vm93_vm1, %v7297_v26 }
  0x9f   :  { %v420_v24 = vpop.f32.mrf.mxu2  ;;  %v569_v35 = vpop.f32.mrf.mxu3 }
  0xa0   :  { %v462_v36 = vadd.f32 %v420_v24, %v289_v22  ;;  %v175_v37 = vpop.f32.mrf.mxu0 }
  0xa2   :  { %v7584_v25 = vadd.f32 %v569_v35, %v462_v36  ;;  %v7651_v35 = vld [vmem:[%s10194_s2 + $0x6a] sm:$0xff] }
  0xa3   :  { %v291_v39 = vpop.f32.mrf.mxu1  ;;  %5934 = vmatmul.msk.f32.gmra.mxu0 %vm93_vm1, %v7315_v28 }
  0xa4   :  { %6000 = vmatmul.msk.f32.gmra.mxu2 %vm93_vm1, %v7325_v30  ;;  %6033 = vmatmul.msk.f32.gmra.mxu3 %vm93_vm1, %v7582_v38  ;;  %v292_v27 = vadd.f32 %v291_v39, %v175_v37 }
  0xa6   :  { %5967 = vmatmul.msk.f32.gmra.mxu1 %vm93_vm1, %v7320_v29 }
  0xa7   :  { %v423_v40 = vpop.f32.mrf.mxu2  ;;  %v572_v41 = vpop.f32.mrf.mxu3 }
  0xa8   :  { %v463_v61 = vadd.f32 %v423_v40, %v292_v27  ;;  %v178_v62 = vpop.f32.mrf.mxu0 }
  0xaa   :  { %v7599_v28 = vadd.f32 %v572_v41, %v463_v61 }
  0xab   :  { %v294_v1 = vpop.f32.mrf.mxu1  ;;  %5935 = vmatmul.msk.f32.gmra.mxu0 %vm93_vm1, %v7338_v31  ;;  %v7617_v31 = vld [vmem:[%s10194_s2 + $0x79] sm:$0xff] }
  0xac   :  { %6001 = vmatmul.msk.f32.gmra.mxu2 %vm93_vm1, %v7348_v33  ;;  %6034 = vmatmul.msk.f32.gmra.mxu3 %vm93_vm1, %v7597_v63  ;;  %v295_v2 = vadd.f32 %v294_v1, %v178_v62 }
  0xae   :  { %5968 = vmatmul.msk.f32.gmra.mxu1 %vm93_vm1, %v7343_v32 }
  0xaf   :  { %v426_v4 = vpop.f32.mrf.mxu2  ;;  %v575_v5 = vpop.f32.mrf.mxu3 }
  0xb0   :  { %v464_v11 = vadd.f32 %v426_v4, %v295_v2  ;;  %v181_v3 = vpop.f32.mrf.mxu0 }
  0xb2   :  { %v7619_v9 = vadd.f32 %v575_v5, %v464_v11 }
  0xb3   :  { %v297_v12 = vpop.f32.mrf.mxu1  ;;  %5936 = vmatmul.msk.f32.gmra.mxu0 %vm93_vm1, %v7582_v38 }
  0xb4   :  { %6002 = vmatmul.msk.f32.gmra.mxu2 %vm93_vm1, %v7612_v6  ;;  %6035 = vmatmul.msk.f32.gmra.mxu3 %vm93_vm1, %v7617_v31  ;;  %v298_v15 = vadd.f32 %v297_v12, %v181_v3 }
  0xb6   :  { %5969 = vmatmul.msk.f32.gmra.mxu1 %vm93_vm1, %v7626_v13 }
  0xb7   :  { %v429_v16 = vpop.f32.mrf.mxu2  ;;  %v578_v17 = vpop.f32.mrf.mxu3 }
  0xb8   :  { %v465_v18 = vadd.f32 %v429_v16, %v298_v15  ;;  %v184_v19 = vpop.f32.mrf.mxu0 }
  0xba   :  { %v7644_v22 = vadd.f32 %v578_v17, %v465_v18 }
  0xbb   :  { %v300_v24 = vpop.f32.mrf.mxu1  ;;  %5937 = vmatmul.msk.f32.gmra.mxu0 %vm93_vm1, %v7597_v63 }
  0xbc   :  { %6003 = vmatmul.msk.f32.gmra.mxu2 %vm93_vm1, %v7637_v20  ;;  %6036 = vmatmul.msk.f32.gmra.mxu3 %vm93_vm1, %v7642_v34  ;;  %v301_v36 = vadd.f32 %v300_v24, %v184_v19 }
  0xbe   :  { %5970 = vmatmul.msk.f32.gmra.mxu1 %vm93_vm1, %v7651_v35 }
  0xbf   :  { %v432_v37 = vpop.f32.mrf.mxu2  ;;  %v581_v39 = vpop.f32.mrf.mxu3 }
  0xc0   :  { %v466_v27 = vadd.f32 %v432_v37, %v301_v36  ;;  %v187_v40 = vpop.f32.mrf.mxu0 }
  0xc2   :  { %v7659_v41 = vadd.f32 %v581_v39, %v466_v27 }
  0xc3   :  { %v303_v61 = vpop.f32.mrf.mxu1  ;;  %5938 = vmatmul.msk.f32.gmra.mxu0 %vm93_vm1, %v7393_v42 }
  0xc4   :  { %6004 = vmatmul.msk.f32.gmra.mxu2 %vm93_vm1, %v7403_v44  ;;  %6037 = vmatmul.msk.f32.gmra.mxu3 %vm93_vm1, %v7437_v48  ;;  %v304_v62 = vadd.f32 %v303_v61, %v187_v40  ;;  %v7702_v40 = vld [vmem:[%s10194_s2 + $0x211] sm:$0xff] }
  0xc6   :  { %5971 = vmatmul.msk.f32.gmra.mxu1 %vm93_vm1, %v7398_v43 }
  0xc7   :  { %v435_v1 = vpop.f32.mrf.mxu2  ;;  %v584_v2 = vpop.f32.mrf.mxu3 }
  0xc8   :  { %v467_v4 = vadd.f32 %v435_v1, %v304_v62  ;;  %v190_v5 = vpop.f32.mrf.mxu0 }
  0xca   :  { %v7669_v11 = vadd.f32 %v584_v2, %v467_v4 }
  0xcb   :  { %v306_v3 = vpop.f32.mrf.mxu1  ;;  %5939 = vmatmul.msk.f32.gmra.mxu0 %vm93_vm1, %v7415_v45 }
  0xcc   :  { %6005 = vmatmul.msk.f32.gmra.mxu2 %vm93_vm1, %v7425_v47  ;;  %6038 = vmatmul.msk.f32.gmra.mxu3 %vm93_vm1, %v7467_v52  ;;  %v307_v42 = vadd.f32 %v306_v3, %v190_v5  ;;  %v7717_v5 = vld [vmem:[%s10194_s2 + $0x219] sm:$0xff] }
  0xce   :  { %5972 = vmatmul.msk.f32.gmra.mxu1 %vm93_vm1, %v7420_v46 }
  0xcf   :  { %v438_v43 = vpop.f32.mrf.mxu2  ;;  %v587_v44 = vpop.f32.mrf.mxu3 }
  0xd0   :  { %v468_v12 = vadd.f32 %v438_v43, %v307_v42  ;;  %v193_v15 = vpop.f32.mrf.mxu0 }
  0xd2   :  { %v7679_v16 = vadd.f32 %v587_v44, %v468_v12 }
  0xd3   :  { %v309_v17 = vpop.f32.mrf.mxu1  ;;  %5940 = vmatmul.msk.f32.gmra.mxu0 %vm93_vm1, %v7437_v48 }
  0xd4   :  { %6006 = vmatmul.msk.f32.gmra.mxu2 %vm93_vm1, %v7447_v50  ;;  %6039 = vmatmul.msk.f32.gmra.mxu3 %vm93_vm1, %v7490_v55  ;;  %v310_v45 = vadd.f32 %v309_v17, %v193_v15  ;;  %v7732_v17 = vld [vmem:[%s10194_s2 + $0x228] sm:$0xff] }
  0xd6   :  { %5973 = vmatmul.msk.f32.gmra.mxu1 %vm93_vm1, %v7442_v49 }
  0xd7   :  { %v441_v46 = vpop.f32.mrf.mxu2  ;;  %v590_v47 = vpop.f32.mrf.mxu3 }
  0xd8   :  { %v469_v18 = vadd.f32 %v441_v46, %v310_v45  ;;  %v196_v19 = vpop.f32.mrf.mxu0 }
  0xda   :  { %v7689_v24 = vadd.f32 %v590_v47, %v469_v18  ;;  %v7746_v47 = vld [vmem:[%s10194_s2 + $0x212] sm:$0xff] }
  0xdb   :  { %v312_v36 = vpop.f32.mrf.mxu1  ;;  %5941 = vmatmul.msk.f32.gmra.mxu0 %vm93_vm1, %v7467_v52 }
  0xdc   :  { %6007 = vmatmul.msk.f32.gmra.mxu2 %vm93_vm1, %v7477_v54  ;;  %6040 = vmatmul.msk.f32.gmra.mxu3 %vm93_vm1, %v7513_v58  ;;  %v313_v48 = vadd.f32 %v312_v36, %v196_v19 }
  0xde   :  { %5974 = vmatmul.msk.f32.gmra.mxu1 %vm93_vm1, %v7472_v53 }
  0xdf   :  { %v444_v50 = vpop.f32.mrf.mxu2  ;;  %v593_v37 = vpop.f32.mrf.mxu3 }
  0xe0   :  { %v470_v39 = vadd.f32 %v444_v50, %v313_v48  ;;  %v199_v27 = vpop.f32.mrf.mxu0 }
  0xe2   :  { %v7704_v52 = vadd.f32 %v593_v37, %v470_v39  ;;  %v7757_v37 = vld [vmem:[%s10194_s2 + $0x230] sm:$0xff] }
  0xe3   :  { %v315_v61 = vpop.f32.mrf.mxu1  ;;  %5942 = vmatmul.msk.f32.gmra.mxu0 %vm93_vm1, %v7490_v55  ;;  %v7762_v39 = vld [vmem:[%s10194_s2 + $0x231] sm:$0xff] }
  0xe4   :  { %6008 = vmatmul.msk.f32.gmra.mxu2 %vm93_vm1, %v7500_v57  ;;  %6041 = vmatmul.msk.f32.gmra.mxu3 %vm93_vm1, %v7702_v40  ;;  %v316_v54 = vadd.f32 %v315_v61, %v199_v27 }
  0xe6   :  { %5975 = vmatmul.msk.f32.gmra.mxu1 %vm93_vm1, %v7495_v56 }
  0xe7   :  { %v447_v62 = vpop.f32.mrf.mxu2  ;;  %v596_v1 = vpop.f32.mrf.mxu3 }
  0xe8   :  { %v471_v2 = vadd.f32 %v447_v62, %v316_v54  ;;  %v202_v4 = vpop.f32.mrf.mxu0  ;;  %v7771_v54 = vld [vmem:[%s10194_s2 + $0x21a] sm:$0xff] }
  0xea   :  { %v7719_v55 = vadd.f32 %v596_v1, %v471_v2 }
  0xeb   :  { %v318_v3 = vpop.f32.mrf.mxu1  ;;  %5943 = vmatmul.msk.f32.gmra.mxu0 %vm93_vm1, %v7513_v58  ;;  %v7737_v58 = vld [vmem:[%s10194_s2 + $0x229] sm:$0xff] }
  0xec   :  { %6009 = vmatmul.msk.f32.gmra.mxu2 %vm93_vm1, %v7523_v60  ;;  %6042 = vmatmul.msk.f32.gmra.mxu3 %vm93_vm1, %v7717_v5  ;;  %v319_v42 = vadd.f32 %v318_v3, %v202_v4 }
  0xee   :  { %5976 = vmatmul.msk.f32.gmra.mxu1 %vm93_vm1, %v7518_v59 }
  0xef   :  { %v450_v43 = vpop.f32.mrf.mxu2  ;;  %v599_v44 = vpop.f32.mrf.mxu3 }
  0xf0   :  { %v472_v12 = vadd.f32 %v450_v43, %v319_v42  ;;  %v205_v15 = vpop.f32.mrf.mxu0 }
  0xf2   :  { %v7739_v45 = vadd.f32 %v599_v44, %v472_v12 }
  0xf3   :  { %v321_v46 = vpop.f32.mrf.mxu1  ;;  %5944 = vmatmul.msk.f32.gmra.mxu0 %vm93_vm1, %v7702_v40 }
  0xf4   :  { %6010 = vmatmul.msk.f32.gmra.mxu2 %vm93_vm1, %v7732_v17  ;;  %6043 = vmatmul.msk.f32.gmra.mxu3 %vm93_vm1, %v7737_v58  ;;  %v322_v18 = vadd.f32 %v321_v46, %v205_v15 }
  0xf6   :  { %5977 = vmatmul.msk.f32.gmra.mxu1 %vm93_vm1, %v7746_v47 }
  0xf7   :  { %v453_v19 = vpop.f32.mrf.mxu2  ;;  %v602_v36 = vpop.f32.mrf.mxu3 }
  0xf8   :  { %v473_v48 = vadd.f32 %v453_v19, %v322_v18  ;;  %v208_v50 = vpop.f32.mrf.mxu0 }
  0xfa   :  { %v7764_v27 = vadd.f32 %v602_v36, %v473_v48 }
  0xfb   :  { %v324_v61 = vpop.f32.mrf.mxu1  ;;  %5945 = vmatmul.msk.f32.gmra.mxu0 %vm93_vm1, %v7717_v5 }
  0xfc   :  { %6011 = vmatmul.msk.f32.gmra.mxu2 %vm93_vm1, %v7757_v37  ;;  %6044 = vmatmul.msk.f32.gmra.mxu3 %vm93_vm1, %v7762_v39  ;;  %v325_v62 = vadd.f32 %v324_v61, %v208_v50 }
  0xfe   :  { %5978 = vmatmul.msk.f32.gmra.mxu1 %vm93_vm1, %v7771_v54 }
  0xff   :  { %v456_v1 = vpop.f32.mrf.mxu2  ;;  %v605_v2 = vpop.f32.mrf.mxu3 }
 0x100   :  { %v474_v4 = vadd.f32 %v456_v1, %v325_v62  ;;  %v708_v3 = vpop.f32.mrf.mxu0 }
 0x101   :  { %v756_v43 = vadd.f32 %v708_v3, %v7549_v8 }
 0x102   :  { %v7779_v42 = vadd.f32 %v605_v2, %v474_v4 }
 0x103   :  { %v856_v44 = vpop.f32.mrf.mxu1  ;;  %6062 = vmatmul.msk.f32.vlgmr.msra.gmra.mxu0 %vm93_vm1, %v7274_v23 }
 0x104   :  { %6128 = vmatmul.msk.f32.vlgmr.msra.gmra.mxu2 %vm93_vm1, %v7325_v30  ;;  %6161 = vmatmul.msk.f32.vlgmr.msra.gmra.mxu3 %vm93_vm1, %v7626_v13  ;;  %v904_v12 = vadd.f32 %v856_v44, %v756_v43 }
 0x105   :  { %6407 = vmatpush.msk.msra.mxu2 %vm142_vm0, %v7135_v0  ;;  %6325 = vmatpush.msk.msra.mxu0 %vm142_vm0, %v7183_v10 }
 0x106   :  { %6111 = vmatmul.msk.f32.vlgmr.msra.gmra.mxu1 %vm93_vm1, %v7582_v38  ;;  %6424 = vmatpush.msk.msra.mxu3 %vm142_vm0, %v7168_v7 }
 0x107   :  { %v1005_v23 = vpop.f32.mrf.mxu2  ;;  %v1153_v8 = vpop.f32.mrf.mxu3  ;;  %6358 = vmatpush.msk.msra.mxu1 %vm142_vm0, %v7460_v51 }
 0x108   :  { %v1053_v30 = vadd.f32 %v1005_v23, %v904_v12  ;;  %v711_v15 = vpop.f32.mrf.mxu0 }
 0x109   :  { %v757_v0 = vadd.f32 %v711_v15, %v7559_v14  ;;  %v7812_v14 = vld [vmem:[%s10194_s2 + $0x7a] sm:$0xff]  ;;  %v7859_v15 = vld [vmem:[%s10194_s2 + $0x91] sm:$0xff] }
 0x10a   :  { %v7798_v46 = vadd.f32 %v1153_v8, %v1053_v30 }
 0x10b   :  { %v859_v18 = vpop.f32.mrf.mxu1  ;;  %6063 = vmatmul.msk.f32.gmra.mxu0 %vm93_vm1, %v7297_v26 }
 0x10c   :  { %6129 = vmatmul.msk.f32.gmra.mxu2 %vm93_vm1, %v7348_v33  ;;  %6162 = vmatmul.msk.f32.gmra.mxu3 %vm93_vm1, %v7651_v35  ;;  %v905_v7 = vadd.f32 %v859_v18, %v757_v0 }
 0x10e   :  { %6112 = vmatmul.msk.f32.gmra.mxu1 %vm93_vm1, %v7597_v63 }
 0x10f   :  { %v1008_v10 = vpop.f32.mrf.mxu2  ;;  %v1156_v51 = vpop.f32.mrf.mxu3 }
 0x110   :  { %v1054_v38 = vadd.f32 %v1008_v10, %v905_v7  ;;  %v714_v19 = vpop.f32.mrf.mxu0 }
 0x111   :  { %v758_v33 = vadd.f32 %v714_v19, %v7569_v21  ;;  %v7828_v21 = vld [vmem:[%s10194_s2 + $0x82] sm:$0xff] }
 0x112   :  { %v7814_v26 = vadd.f32 %v1156_v51, %v1054_v38  ;;  %v7875_v51 = vld [vmem:[%s10194_s2 + $0x9a] sm:$0xff] }
 0x113   :  { %v862_v36 = vpop.f32.mrf.mxu1  ;;  %6064 = vmatmul.msk.f32.gmra.mxu0 %vm93_vm1, %v7320_v29 }
 0x114   :  { %6130 = vmatmul.msk.f32.gmra.mxu2 %vm93_vm1, %v7612_v6  ;;  %6163 = vmatmul.msk.f32.gmra.mxu3 %vm93_vm1, %v7812_v14  ;;  %v906_v63 = vadd.f32 %v862_v36, %v758_v33  ;;  %v7885_v36 = vld [vmem:[%s10194_s2 + $0x99] sm:$0xff] }
 0x116   :  { %6113 = vmatmul.msk.f32.gmra.mxu1 %vm93_vm1, %v7617_v31 }
 0x117   :  { %v1011_v48 = vpop.f32.mrf.mxu2  ;;  %v1159_v50 = vpop.f32.mrf.mxu3 }
 0x118   :  { %v1055_v61 = vadd.f32 %v1011_v48, %v906_v63  ;;  %v717_v62 = vpop.f32.mrf.mxu0 }
 0x119   :  { %v759_v1 = vadd.f32 %v717_v62, %v7584_v25  ;;  %v7844_v25 = vld [vmem:[%s10194_s2 + $0x90] sm:$0xff] }
 0x11a   :  { %v7830_v29 = vadd.f32 %v1159_v50, %v1055_v61  ;;  %v7901_v62 = vld [vmem:[%s10194_s2 + $0xaa] sm:$0xff] }
 0x11b   :  { %v865_v2 = vpop.f32.mrf.mxu1  ;;  %6065 = vmatmul.msk.f32.gmra.mxu0 %vm93_vm1, %v7343_v32  ;;  %v7849_v32 = vld [vmem:[%s10194_s2 + $0x92] sm:$0xff] }
 0x11c   :  { %6131 = vmatmul.msk.f32.gmra.mxu2 %vm93_vm1, %v7637_v20  ;;  %6164 = vmatmul.msk.f32.gmra.mxu3 %vm93_vm1, %v7828_v21  ;;  %v907_v4 = vadd.f32 %v865_v2, %v759_v1 }
 0x11e   :  { %6114 = vmatmul.msk.f32.gmra.mxu1 %vm93_vm1, %v7642_v34 }
 0x11f   :  { %v1014_v3 = vpop.f32.mrf.mxu2  ;;  %v1162_v43 = vpop.f32.mrf.mxu3 }
 0x120   :  { %v1056_v44 = vadd.f32 %v1014_v3, %v907_v4  ;;  %v720_v12 = vpop.f32.mrf.mxu0  ;;  %v7911_v3 = vld [vmem:[%s10194_s2 + $0xa9] sm:$0xff] }
 0x121   :  { %v760_v8 = vadd.f32 %v720_v12, %v7599_v28 }
 0x122   :  { %v7851_v23 = vadd.f32 %v1162_v43, %v1056_v44 }
 0x123   :  { %v868_v30 = vpop.f32.mrf.mxu1  ;;  %6066 = vmatmul.msk.f32.gmra.mxu0 %vm93_vm1, %v7626_v13  ;;  %v7870_v13 = vld [vmem:[%s10194_s2 + $0x98] sm:$0xff] }
 0x124   :  { %6132 = vmatmul.msk.f32.gmra.mxu2 %vm93_vm1, %v7844_v25  ;;  %6165 = vmatmul.msk.f32.gmra.mxu3 %vm93_vm1, %v7849_v32  ;;  %v908_v0 = vadd.f32 %v868_v30, %v760_v8  ;;  %v7922_v30 = vld [vmem:[%s10194_s2 + $0xb0] sm:$0xff] }
 0x126   :  { %6115 = vmatmul.msk.f32.gmra.mxu1 %vm93_vm1, %v7859_v15 }
 0x127   :  { %v1017_v28 = vpop.f32.mrf.mxu2  ;;  %v1165_v18 = vpop.f32.mrf.mxu3 }
 0x128   :  { %v1057_v7 = vadd.f32 %v1017_v28, %v908_v0  ;;  %v723_v10 = vpop.f32.mrf.mxu0  ;;  %v7927_v0 = vld [vmem:[%s10194_s2 + $0xb2] sm:$0xff] }
 0x129   :  { %v761_v19 = vadd.f32 %v723_v10, %v7619_v9  ;;  %v7937_v10 = vld [vmem:[%s10194_s2 + $0xb1] sm:$0xff] }
 0x12a   :  { %v7877_v38 = vadd.f32 %v1165_v18, %v1057_v7 }
 0x12b   :  { %v871_v33 = vpop.f32.mrf.mxu1  ;;  %6067 = vmatmul.msk.f32.gmra.mxu0 %vm93_vm1, %v7651_v35  ;;  %v7896_v35 = vld [vmem:[%s10194_s2 + $0xa8] sm:$0xff] }
 0x12c   :  { %6133 = vmatmul.msk.f32.gmra.mxu2 %vm93_vm1, %v7870_v13  ;;  %6166 = vmatmul.msk.f32.gmra.mxu3 %vm93_vm1, %v7875_v51  ;;  %v909_v63 = vadd.f32 %v871_v33, %v761_v19 }
 0x12e   :  { %6116 = vmatmul.msk.f32.gmra.mxu1 %vm93_vm1, %v7885_v36 }
 0x12f   :  { %v1020_v9 = vpop.f32.mrf.mxu2  ;;  %v1168_v48 = vpop.f32.mrf.mxu3 }
 0x130   :  { %v1058_v50 = vadd.f32 %v1020_v9, %v909_v63  ;;  %v726_v61 = vpop.f32.mrf.mxu0 }
 0x131   :  { %v762_v2 = vadd.f32 %v726_v61, %v7644_v22 }
 0x132   :  { %v7903_v1 = vadd.f32 %v1168_v48, %v1058_v50 }
 0x133   :  { %v874_v4 = vpop.f32.mrf.mxu1  ;;  %6068 = vmatmul.msk.f32.gmra.mxu0 %vm93_vm1, %v7812_v14 }
 0x134   :  { %6134 = vmatmul.msk.f32.gmra.mxu2 %vm93_vm1, %v7896_v35  ;;  %6167 = vmatmul.msk.f32.gmra.mxu3 %vm93_vm1, %v7901_v62  ;;  %v910_v43 = vadd.f32 %v874_v4, %v762_v2 }
 0x136   :  { %6117 = vmatmul.msk.f32.gmra.mxu1 %vm93_vm1, %v7911_v3 }
 0x137   :  { %v1023_v22 = vpop.f32.mrf.mxu2  ;;  %v1171_v44 = vpop.f32.mrf.mxu3 }
 0x138   :  { %v1059_v12 = vadd.f32 %v1023_v22, %v910_v43  ;;  %v729_v8 = vpop.f32.mrf.mxu0 }
 0x139   :  { %v763_v18 = vadd.f32 %v729_v8, %v7659_v41 }
 0x13a   :  { %v7929_v28 = vadd.f32 %v1171_v44, %v1059_v12 }
 0x13b   :  { %v877_v7 = vpop.f32.mrf.mxu1  ;;  %6069 = vmatmul.msk.f32.gmra.mxu0 %vm93_vm1, %v7828_v21 }
 0x13c   :  { %6135 = vmatmul.msk.f32.gmra.mxu2 %vm93_vm1, %v7922_v30  ;;  %6168 = vmatmul.msk.f32.gmra.mxu3 %vm93_vm1, %v7927_v0  ;;  %v911_v19 = vadd.f32 %v877_v7, %v763_v18 }
 0x13e   :  { %6118 = vmatmul.msk.f32.gmra.mxu1 %vm93_vm1, %v7937_v10 }
 0x13f   :  { %v1026_v41 = vpop.f32.mrf.mxu2  ;;  %v1174_v33 = vpop.f32.mrf.mxu3 }
 0x140   :  { %v1060_v63 = vadd.f32 %v1026_v41, %v911_v19  ;;  %v732_v9 = vpop.f32.mrf.mxu0 }
 0x141   :  { %v764_v50 = vadd.f32 %v732_v9, %v7669_v11 }
 0x142   :  { %v7945_v48 = vadd.f32 %v1174_v33, %v1060_v63 }
 0x143   :  { %v880_v61 = vpop.f32.mrf.mxu1  ;;  %6070 = vmatmul.msk.f32.gmra.mxu0 %vm93_vm1, %v7442_v49 }
 0x144   :  { %6136 = vmatmul.msk.f32.gmra.mxu2 %vm93_vm1, %v7500_v57  ;;  %6169 = vmatmul.msk.f32.gmra.mxu3 %vm93_vm1, %v7746_v47  ;;  %v912_v2 = vadd.f32 %v880_v61, %v764_v50 }
 0x146   :  { %6119 = vmatmul.msk.f32.gmra.mxu1 %vm93_vm1, %v7702_v40 }
 0x147   :  { %v1029_v4 = vpop.f32.mrf.mxu2  ;;  %v1177_v43 = vpop.f32.mrf.mxu3 }
 0x148   :  { %v1061_v22 = vadd.f32 %v1029_v4, %v912_v2  ;;  %v735_v44 = vpop.f32.mrf.mxu0 }
 0x149   :  { %v765_v11 = vadd.f32 %v735_v44, %v7679_v16  ;;  %v7970_v16 = vld [vmem:[%s10194_s2 + $0x22a] sm:$0xff] }
 0x14a   :  { %v7956_v12 = vadd.f32 %v1177_v43, %v1061_v22 }
 0x14b   :  { %v883_v8 = vpop.f32.mrf.mxu1  ;;  %6071 = vmatmul.msk.f32.gmra.mxu0 %vm93_vm1, %v7472_v53 }
 0x14c   :  { %6137 = vmatmul.msk.f32.gmra.mxu2 %vm93_vm1, %v7523_v60  ;;  %6170 = vmatmul.msk.f32.gmra.mxu3 %vm93_vm1, %v7771_v54  ;;  %v913_v49 = vadd.f32 %v883_v8, %v765_v11 }
 0x14e   :  { %6120 = vmatmul.msk.f32.gmra.mxu1 %vm93_vm1, %v7717_v5 }
 0x14f   :  { %v1032_v57 = vpop.f32.mrf.mxu2  ;;  %v1180_v40 = vpop.f32.mrf.mxu3 }
 0x150   :  { %v1062_v18 = vadd.f32 %v1032_v57, %v913_v49  ;;  %v738_v7 = vpop.f32.mrf.mxu0  ;;  %v8017_v57 = vld [vmem:[%s10194_s2 + $0x241] sm:$0xff] }
 0x151   :  { %v766_v60 = vadd.f32 %v738_v7, %v7689_v24  ;;  %v7986_v24 = vld [vmem:[%s10194_s2 + $0x232] sm:$0xff] }
 0x152   :  { %v7972_v53 = vadd.f32 %v1180_v40, %v1062_v18 }
 0x153   :  { %v886_v19 = vpop.f32.mrf.mxu1  ;;  %6072 = vmatmul.msk.f32.gmra.mxu0 %vm93_vm1, %v7495_v56 }
 0x154   :  { %6138 = vmatmul.msk.f32.gmra.mxu2 %vm93_vm1, %v7732_v17  ;;  %6171 = vmatmul.msk.f32.gmra.mxu3 %vm93_vm1, %v7970_v16  ;;  %v914_v5 = vadd.f32 %v886_v19, %v766_v60  ;;  %v8033_v19 = vld [vmem:[%s10194_s2 + $0x24a] sm:$0xff] }
 0x156   :  { %6121 = vmatmul.msk.f32.gmra.mxu1 %vm93_vm1, %v7737_v58 }
 0x157   :  { %v1035_v41 = vpop.f32.mrf.mxu2  ;;  %v1183_v33 = vpop.f32.mrf.mxu3 }
 0x158   :  { %v1063_v63 = vadd.f32 %v1035_v41, %v914_v5  ;;  %v741_v9 = vpop.f32.mrf.mxu0 }
 0x159   :  { %v767_v50 = vadd.f32 %v741_v9, %v7704_v52  ;;  %v8002_v52 = vld [vmem:[%s10194_s2 + $0x240] sm:$0xff] }
 0x15a   :  { %v7988_v56 = vadd.f32 %v1183_v33, %v1063_v63  ;;  %v8043_v63 = vld [vmem:[%s10194_s2 + $0x249] sm:$0xff] }
 0x15b   :  { %v889_v61 = vpop.f32.mrf.mxu1  ;;  %6073 = vmatmul.msk.f32.gmra.mxu0 %vm93_vm1, %v7518_v59  ;;  %v8007_v59 = vld [vmem:[%s10194_s2 + $0x242] sm:$0xff] }
 0x15c   :  { %6139 = vmatmul.msk.f32.gmra.mxu2 %vm93_vm1, %v7757_v37  ;;  %6172 = vmatmul.msk.f32.gmra.mxu3 %vm93_vm1, %v7986_v24  ;;  %v915_v2 = vadd.f32 %v889_v61, %v767_v50 }
 0x15e   :  { %6122 = vmatmul.msk.f32.gmra.mxu1 %vm93_vm1, %v7762_v39 }
 0x15f   :  { %v1038_v4 = vpop.f32.mrf.mxu2  ;;  %v1186_v43 = vpop.f32.mrf.mxu3 }
 0x160   :  { %v1064_v22 = vadd.f32 %v1038_v4, %v915_v2  ;;  %v744_v44 = vpop.f32.mrf.mxu0  ;;  %v8059_v4 = vld [vmem:[%s10194_s2 + $0x25a] sm:$0xff] }
 0x161   :  { %v768_v8 = vadd.f32 %v744_v44, %v7719_v55 }
 0x162   :  { %v8009_v11 = vadd.f32 %v1186_v43, %v1064_v22 }
 0x163   :  { %v892_v49 = vpop.f32.mrf.mxu1  ;;  %6074 = vmatmul.msk.f32.gmra.mxu0 %vm93_vm1, %v7746_v47  ;;  %v8028_v47 = vld [vmem:[%s10194_s2 + $0x248] sm:$0xff] }
 0x164   :  { %6140 = vmatmul.msk.f32.gmra.mxu2 %vm93_vm1, %v8002_v52  ;;  %6173 = vmatmul.msk.f32.gmra.mxu3 %vm93_vm1, %v8007_v59  ;;  %v916_v40 = vadd.f32 %v892_v49, %v768_v8  ;;  %v8069_v8 = vld [vmem:[%s10194_s2 + $0x259] sm:$0xff] }
 0x166   :  { %6123 = vmatmul.msk.f32.gmra.mxu1 %vm93_vm1, %v8017_v57 }
 0x167   :  { %v1041_v55 = vpop.f32.mrf.mxu2  ;;  %v1189_v18 = vpop.f32.mrf.mxu3 }
 0x168   :  { %v1065_v7 = vadd.f32 %v1041_v55, %v916_v40  ;;  %v747_v60 = vpop.f32.mrf.mxu0 }
 0x169   :  { %v769_v41 = vadd.f32 %v747_v60, %v7739_v45  ;;  %v8085_v60 = vld [vmem:[%s10194_s2 + $0x262] sm:$0xff] }
 0x16a   :  { %v8035_v5 = vadd.f32 %v1189_v18, %v1065_v7  ;;  %v8080_v7 = vld [vmem:[%s10194_s2 + $0x260] sm:$0xff] }
 0x16b   :  { %v895_v33 = vpop.f32.mrf.mxu1  ;;  %6075 = vmatmul.msk.f32.gmra.mxu0 %vm93_vm1, %v7771_v54  ;;  %v8054_v54 = vld [vmem:[%s10194_s2 + $0x258] sm:$0xff] }
 0x16c   :  { %6141 = vmatmul.msk.f32.gmra.mxu2 %vm93_vm1, %v8028_v47  ;;  %6174 = vmatmul.msk.f32.gmra.mxu3 %vm93_vm1, %v8033_v19  ;;  %v917_v9 = vadd.f32 %v895_v33, %v769_v41 }
 0x16e   :  { %6124 = vmatmul.msk.f32.gmra.mxu1 %vm93_vm1, %v8043_v63 }
 0x16f   :  { %v1044_v45 = vpop.f32.mrf.mxu2  ;;  %v1192_v50 = vpop.f32.mrf.mxu3 }
 0x170   :  { %v1066_v61 = vadd.f32 %v1044_v45, %v917_v9  ;;  %v750_v2 = vpop.f32.mrf.mxu0  ;;  %v8095_v45 = vld [vmem:[%s10194_s2 + $0x261] sm:$0xff] }
 0x171   :  { %v770_v22 = vadd.f32 %v750_v2, %v7764_v27 }
 0x172   :  { %v8061_v43 = vadd.f32 %v1192_v50, %v1066_v61 }
 0x173   :  { %v898_v44 = vpop.f32.mrf.mxu1  ;;  %6076 = vmatmul.msk.f32.gmra.mxu0 %vm93_vm1, %v7970_v16 }
 0x174   :  { %6142 = vmatmul.msk.f32.gmra.mxu2 %vm93_vm1, %v8054_v54  ;;  %6175 = vmatmul.msk.f32.gmra.mxu3 %vm93_vm1, %v8059_v4  ;;  %v918_v49 = vadd.f32 %v898_v44, %v770_v22 }
 0x176   :  { %6125 = vmatmul.msk.f32.gmra.mxu1 %vm93_vm1, %v8069_v8 }
 0x177   :  { %v1047_v27 = vpop.f32.mrf.mxu2  ;;  %v1195_v40 = vpop.f32.mrf.mxu3 }
 0x178   :  { %v1067_v55 = vadd.f32 %v1047_v27, %v918_v49  ;;  %v753_v18 = vpop.f32.mrf.mxu0  ;;  %v8109_v27 = vld [vmem:[%s10196_s4] ss:$0 sm:$0xff] }
 0x179   :  { %v771_v33 = vadd.f32 %v753_v18, %v7779_v42 }
 0x17a   :  { %v8087_v41 = vadd.f32 %v1195_v40, %v1067_v55  ;;  %v8120_v55 = vld [vmem:[%s10195_s3 + $0x10] sm:$0xf] }
 0x17b   :  { %v901_v9 = vpop.f32.mrf.mxu1  ;;  %6077 = vmatmul.msk.f32.gmra.mxu0 %vm93_vm1, %v7986_v24 }
 0x17c   :  { %6143 = vmatmul.msk.f32.gmra.mxu2 %vm93_vm1, %v8080_v7  ;;  %6176 = vmatmul.msk.f32.gmra.mxu3 %vm93_vm1, %v8085_v60  ;;  %v919_v50 = vadd.f32 %v901_v9, %v771_v33  ;;  %v8141_v9 = vld [vmem:[%s10195_s3 + $0xc] sm:$0xf] }
 0x17e   :  { %6126 = vmatmul.msk.f32.gmra.mxu1 %vm93_vm1, %v8095_v45 }
 0x17f   :  { %v1050_v42 = vpop.f32.mrf.mxu2  ;;  %v1198_v61 = vpop.f32.mrf.mxu3 }
 0x180   :  { %v1068_v2 = vadd.f32 %v1050_v42, %v919_v50  ;;  %v1301_v22 = vpop.f32.mrf.mxu0 }
 0x181   :  { %v1349_v49 = vadd.f32 %v1301_v22, %v7798_v46  ;;  %v8127_v46 = vld [vmem:[%s10195_s3 + $0x8] sm:$0xf] }
 0x182   :  { %v8103_v44 = vadd.f32 %v1198_v61, %v1068_v2  ;;  %10211 = vst [vmem:[#allocation5_spill] sm:$0xff] %v8127_v46 }
 0x183   :  { %v1543_v40 = vpop.f32.mrf.mxu1  ;;  %6194 = vmatmul.msk.f32.vlgmr.msrb.gmra.mxu0 %vm93_vm1, %v7612_v6  ;;  %v7008_v6 = vld [vmem:[%s10195_s3 + $0x14] sm:$0xf] }
 0x184   :  { %6260 = vmatmul.msk.f32.vlgmr.msrb.gmra.mxu2 %vm93_vm1, %v7812_v14  ;;  %6293 = vmatmul.msk.f32.vlgmr.msrb.gmra.mxu3 %vm93_vm1, %v7844_v25  ;;  %v1368_v14 = vadd.f32 %v8109_v27, %v1349_v49 }
 0x185   :  { %6523 = vmatpush.msk.msrb.mxu2 %vm142_vm0, %v8120_v55  ;;  %6457 = vmatpush.msk.msrb.mxu0 %vm142_vm0, %v8127_v46 }
 0x186   :  { %6227 = vmatmul.msk.f32.vlgmr.msrb.gmra.mxu1 %vm93_vm1, %v7617_v31  ;;  %6556 = vmatpush.msk.msrb.mxu3 %vm142_vm0, %v7008_v6  ;;  %v1384_v2 = vmax.f32 %v1368_v14, 0.0 }
 0x187   :  { %v1656_v18 = vpop.f32.mrf.mxu2  ;;  %v1785_v33 = vpop.f32.mrf.mxu3  ;;  %6490 = vmatpush.msk.msrb.mxu1 %vm142_vm0, %v8141_v9 }
 0x188   :  { %v1657_v50 = vadd.f32 %v1656_v18, %v1543_v40  ;;  %v1304_v31 = vpop.f32.mrf.mxu0 }
 0x189   :  { %v1350_v42 = vadd.f32 %v1304_v31, %v7814_v26  ;;  %v1401_v26 = vsel %vm1400_vm2, %v1384_v2, 0.0 }
 0x18a   :  { %v8146_v61 = vadd.f32 %v1785_v33, %v1657_v50 }
 0x18b   :  { %v1369_v22 = vadd.f32 %v8109_v27, %v1350_v42  ;;  %v1546_v49 = vpop.f32.mrf.mxu1  ;;  %6195 = vmatmul.msk.f32.gmra.mxu0 %vm93_vm1, %v7637_v20 }
 0x18c   :  { %6261 = vmatmul.msk.f32.gmra.mxu2 %vm93_vm1, %v7828_v21  ;;  %6294 = vmatmul.msk.f32.gmra.mxu3 %vm93_vm1, %v7870_v13 }
 0x18d   :  { %v1385_v40 = vmax.f32 %v1369_v22, 0.0 }
 0x18e   :  { %6228 = vmatmul.msk.f32.gmra.mxu1 %vm93_vm1, %v7642_v34 }
 0x18f   :  { %v1402_v6 = vsel %vm1400_vm2, %v1385_v40, 0.0  ;;  %v1659_v14 = vpop.f32.mrf.mxu2  ;;  %v1788_v18 = vpop.f32.mrf.mxu3 }
 0x190   :  { %v1403_v33 = vadd.f32 %v1402_v6, %v1401_v26  ;;  %v1660_v50 = vadd.f32 %v1659_v14, %v1546_v49  ;;  %v1307_v20 = vpop.f32.mrf.mxu0 }
 0x191   :  { %v1351_v31 = vadd.f32 %v1307_v20, %v7830_v29 }
 0x192   :  { %v8160_v42 = vadd.f32 %v1788_v18, %v1660_v50 }
 0x193   :  { %v1370_v21 = vadd.f32 %v8109_v27, %v1351_v31  ;;  %v1549_v46 = vpop.f32.mrf.mxu1  ;;  %6196 = vmatmul.msk.f32.gmra.mxu0 %vm93_vm1, %v7844_v25 }
 0x194   :  { %6262 = vmatmul.msk.f32.gmra.mxu2 %vm93_vm1, %v7849_v32  ;;  %6295 = vmatmul.msk.f32.gmra.mxu3 %vm93_vm1, %v7896_v35 }
 0x195   :  { %v1386_v34 = vmax.f32 %v1370_v21, 0.0 }
 0x196   :  { %6229 = vmatmul.msk.f32.gmra.mxu1 %vm93_vm1, %v7859_v15 }
 0x197   :  { %v1404_v29 = vsel %vm1400_vm2, %v1386_v34, 0.0  ;;  %v1662_v2 = vpop.f32.mrf.mxu2  ;;  %v1791_v22 = vpop.f32.mrf.mxu3 }
 0x198   :  { %v1405_v49 = vadd.f32 %v1404_v29, %v1403_v33  ;;  %v1663_v40 = vadd.f32 %v1662_v2, %v1549_v46  ;;  %v1310_v26 = vpop.f32.mrf.mxu0 }
 0x199   :  { %v1352_v6 = vadd.f32 %v1310_v26, %v7851_v23 }
 0x19a   :  { %v8173_v25 = vadd.f32 %v1791_v22, %v1663_v40 }
 0x19b   :  { %v1371_v32 = vadd.f32 %v8109_v27, %v1352_v6  ;;  %v1552_v14 = vpop.f32.mrf.mxu1  ;;  %6197 = vmatmul.msk.f32.gmra.mxu0 %vm93_vm1, %v7870_v13  ;;  %v8189_v13 = vld [vmem:[%s10194_s2 + $0xc0] sm:$0xff] }
 0x19c   :  { %6263 = vmatmul.msk.f32.gmra.mxu2 %vm93_vm1, %v7875_v51  ;;  %6296 = vmatmul.msk.f32.gmra.mxu3 %vm93_vm1, %v7922_v30 }
 0x19d   :  { %v1387_v18 = vmax.f32 %v1371_v32, 0.0 }
 0x19e   :  { %6230 = vmatmul.msk.f32.gmra.mxu1 %vm93_vm1, %v7885_v36 }
 0x19f   :  { %v1406_v23 = vsel %vm1400_vm2, %v1387_v18, 0.0  ;;  %v1665_v46 = vpop.f32.mrf.mxu2  ;;  %v1794_v33 = vpop.f32.mrf.mxu3 }
 0x1a0   :  { %v1407_v50 = vadd.f32 %v1406_v23, %v1405_v49  ;;  %v1666_v20 = vadd.f32 %v1665_v46, %v1552_v14  ;;  %v1313_v31 = vpop.f32.mrf.mxu0 }
 0x1a1   :  { %v1353_v21 = vadd.f32 %v1313_v31, %v7877_v38 }
 0x1a2   :  { %v8191_v51 = vadd.f32 %v1794_v33, %v1666_v20 }
 0x1a3   :  { %v1372_v34 = vadd.f32 %v8109_v27, %v1353_v21  ;;  %v1555_v29 = vpop.f32.mrf.mxu1  ;;  %6198 = vmatmul.msk.f32.gmra.mxu0 %vm93_vm1, %v7896_v35  ;;  %v8207_v35 = vld [vmem:[%s10194_s2 + $0xc8] sm:$0xff] }
 0x1a4   :  { %6264 = vmatmul.msk.f32.gmra.mxu2 %vm93_vm1, %v7901_v62  ;;  %6297 = vmatmul.msk.f32.gmra.mxu3 %vm93_vm1, %v8189_v13 }
 0x1a5   :  { %v1388_v38 = vmax.f32 %v1372_v34, 0.0 }
 0x1a6   :  { %6231 = vmatmul.msk.f32.gmra.mxu1 %vm93_vm1, %v7911_v3 }
 0x1a7   :  { %v1408_v2 = vsel %vm1400_vm2, %v1388_v38, 0.0  ;;  %v1668_v22 = vpop.f32.mrf.mxu2  ;;  %v1797_v49 = vpop.f32.mrf.mxu3 }
 0x1a8   :  { %v1409_v40 = vadd.f32 %v1408_v2, %v1407_v50  ;;  %v1669_v26 = vadd.f32 %v1668_v22, %v1555_v29  ;;  %v1316_v6 = vpop.f32.mrf.mxu0 }
 0x1a9   :  { %v1354_v32 = vadd.f32 %v1316_v6, %v7903_v1 }
 0x1aa   :  { %v8209_v62 = vadd.f32 %v1797_v49, %v1669_v26 }
 0x1ab   :  { %v1373_v14 = vadd.f32 %v8109_v27, %v1354_v32  ;;  %v1558_v18 = vpop.f32.mrf.mxu1  ;;  %6199 = vmatmul.msk.f32.gmra.mxu0 %vm93_vm1, %v7922_v30  ;;  %v8225_v30 = vld [vmem:[%s10194_s2 + $0xc2] sm:$0xff] }
 0x1ac   :  { %6265 = vmatmul.msk.f32.gmra.mxu2 %vm93_vm1, %v7927_v0  ;;  %6298 = vmatmul.msk.f32.gmra.mxu3 %vm93_vm1, %v8207_v35  ;;  %v8230_v0 = vld [vmem:[%s10194_s2 + $0xd8] sm:$0xff] }
 0x1ad   :  { %v1389_v1 = vmax.f32 %v1373_v14, 0.0 }
 0x1ae   :  { %6232 = vmatmul.msk.f32.gmra.mxu1 %vm93_vm1, %v7937_v10 }
 0x1af   :  { %v1410_v23 = vsel %vm1400_vm2, %v1389_v1, 0.0  ;;  %v1671_v46 = vpop.f32.mrf.mxu2  ;;  %v1800_v33 = vpop.f32.mrf.mxu3  ;;  %v8258_v1 = vld [vmem:[%s10194_s2 + $0xe0] sm:$0xff] }
 0x1b0   :  { %v1411_v50 = vadd.f32 %v1410_v23, %v1409_v40  ;;  %v1672_v20 = vadd.f32 %v1671_v46, %v1558_v18  ;;  %v1319_v31 = vpop.f32.mrf.mxu0  ;;  %v8253_v18 = vld [vmem:[%s10194_s2 + $0xca] sm:$0xff] }
 0x1b1   :  { %v1355_v21 = vadd.f32 %v1319_v31, %v7929_v28  ;;  %v8240_v28 = vld [vmem:[%s10194_s2 + $0xc1] sm:$0xff] }
 0x1b2   :  { %v8232_v34 = vadd.f32 %v1800_v33, %v1672_v20 }
 0x1b3   :  { %v1374_v29 = vadd.f32 %v8109_v27, %v1355_v21  ;;  %v1561_v38 = vpop.f32.mrf.mxu1  ;;  %6200 = vmatmul.msk.f32.gmra.mxu0 %vm93_vm1, %v8189_v13 }
 0x1b4   :  { %6266 = vmatmul.msk.f32.gmra.mxu2 %vm93_vm1, %v8225_v30  ;;  %6299 = vmatmul.msk.f32.gmra.mxu3 %vm93_vm1, %v8230_v0 }
 0x1b5   :  { %v1390_v2 = vmax.f32 %v1374_v29, 0.0 }
 0x1b6   :  { %6233 = vmatmul.msk.f32.gmra.mxu1 %vm93_vm1, %v8240_v28 }
 0x1b7   :  { %v1412_v22 = vsel %vm1400_vm2, %v1390_v2, 0.0  ;;  %v1674_v49 = vpop.f32.mrf.mxu2  ;;  %v1803_v40 = vpop.f32.mrf.mxu3 }
 0x1b8   :  { %v1413_v26 = vadd.f32 %v1412_v22, %v1411_v50  ;;  %v1675_v6 = vadd.f32 %v1674_v49, %v1561_v38  ;;  %v1322_v32 = vpop.f32.mrf.mxu0 }
 0x1b9   :  { %v1356_v14 = vadd.f32 %v1322_v32, %v7945_v48  ;;  %v8268_v48 = vld [vmem:[%s10194_s2 + $0xc9] sm:$0xff] }
 0x1ba   :  { %v8260_v23 = vadd.f32 %v1803_v40, %v1675_v6 }
 0x1bb   :  { %v1375_v46 = vadd.f32 %v8109_v27, %v1356_v14  ;;  %v1564_v33 = vpop.f32.mrf.mxu1  ;;  %6201 = vmatmul.msk.f32.gmra.mxu0 %vm93_vm1, %v8207_v35 }
 0x1bc   :  { %6267 = vmatmul.msk.f32.gmra.mxu2 %vm93_vm1, %v8253_v18  ;;  %6300 = vmatmul.msk.f32.gmra.mxu3 %vm93_vm1, %v8258_v1 }
 0x1bd   :  { %v1391_v50 = vmax.f32 %v1375_v46, 0.0 }
 0x1be   :  { %6234 = vmatmul.msk.f32.gmra.mxu1 %vm93_vm1, %v8268_v48 }
 0x1bf   :  { %v1414_v20 = vsel %vm1400_vm2, %v1391_v50, 0.0  ;;  %v1677_v31 = vpop.f32.mrf.mxu2  ;;  %v1806_v21 = vpop.f32.mrf.mxu3 }
 0x1c0   :  { %v8277_v29 = vadd.f32 %v1414_v20, %v1413_v26  ;;  %v1678_v38 = vadd.f32 %v1677_v31, %v1564_v33  ;;  %v1325_v2 = vpop.f32.mrf.mxu0 }
 0x1c1   :  { %v1357_v49 = vadd.f32 %v1325_v2, %v7956_v12 }
 0x1c2   :  { %v8279_v22 = vadd.f32 %v1806_v21, %v1678_v38 }
 0x1c3   :  { %v1567_v40 = vpop.f32.mrf.mxu1  ;;  %6202 = vmatmul.msk.f32.gmra.mxu0 %vm93_vm1, %v7732_v17  ;;  %v1376_v26 = vadd.f32 %v8109_v27, %v1357_v49 }
 0x1c4   :  { %6268 = vmatmul.msk.f32.gmra.mxu2 %vm93_vm1, %v7970_v16  ;;  %6301 = vmatmul.msk.f32.gmra.mxu3 %vm93_vm1, %v8002_v52 }
 0x1c5   :  { %v1392_v17 = vmax.f32 %v1376_v26, 0.0 }
 0x1c6   :  { %6235 = vmatmul.msk.f32.gmra.mxu1 %vm93_vm1, %v7737_v58 }
 0x1c7   :  { %v1680_v6 = vpop.f32.mrf.mxu2  ;;  %v1809_v32 = vpop.f32.mrf.mxu3 }
 0x1c8   :  { %v1681_v14 = vadd.f32 %v1680_v6, %v1567_v40  ;;  %v1328_v46 = vpop.f32.mrf.mxu0 }
 0x1c9   :  { %v1358_v12 = vadd.f32 %v1328_v46, %v7972_v53  ;;  %v1422_v53 = vsel %vm1400_vm2, %v1392_v17, 0.0 }
 0x1ca   :  { %v8292_v33 = vadd.f32 %v1809_v32, %v1681_v14 }
 0x1cb   :  { %v1377_v50 = vadd.f32 %v8109_v27, %v1358_v12  ;;  %v1570_v16 = vpop.f32.mrf.mxu1  ;;  %6203 = vmatmul.msk.f32.gmra.mxu0 %vm93_vm1, %v7757_v37 }
 0x1cc   :  { %6269 = vmatmul.msk.f32.gmra.mxu2 %vm93_vm1, %v7986_v24  ;;  %6302 = vmatmul.msk.f32.gmra.mxu3 %vm93_vm1, %v8028_v47 }
 0x1cd   :  { %v1393_v58 = vmax.f32 %v1377_v50, 0.0 }
 0x1ce   :  { %6236 = vmatmul.msk.f32.gmra.mxu1 %vm93_vm1, %v7762_v39 }
 0x1cf   :  { %v1423_v20 = vsel %vm1400_vm2, %v1393_v58, 0.0  ;;  %v1683_v31 = vpop.f32.mrf.mxu2  ;;  %v1812_v21 = vpop.f32.mrf.mxu3 }
 0x1d0   :  { %v1424_v38 = vadd.f32 %v1423_v20, %v1422_v53  ;;  %v1684_v2 = vadd.f32 %v1683_v31, %v1570_v16  ;;  %v1331_v49 = vpop.f32.mrf.mxu0 }
 0x1d1   :  { %v1359_v37 = vadd.f32 %v1331_v49, %v7988_v56 }
 0x1d2   :  { %v8306_v40 = vadd.f32 %v1812_v21, %v1684_v2 }
 0x1d3   :  { %v1378_v24 = vadd.f32 %v8109_v27, %v1359_v37  ;;  %v1573_v26 = vpop.f32.mrf.mxu1  ;;  %6204 = vmatmul.msk.f32.gmra.mxu0 %vm93_vm1, %v8002_v52 }
 0x1d4   :  { %6270 = vmatmul.msk.f32.gmra.mxu2 %vm93_vm1, %v8007_v59  ;;  %6303 = vmatmul.msk.f32.gmra.mxu3 %vm93_vm1, %v8054_v54 }
 0x1d5   :  { %v1394_v39 = vmax.f32 %v1378_v24, 0.0 }
 0x1d6   :  { %6237 = vmatmul.msk.f32.gmra.mxu1 %vm93_vm1, %v8017_v57 }
 0x1d7   :  { %v1425_v56 = vsel %vm1400_vm2, %v1394_v39, 0.0  ;;  %v1686_v6 = vpop.f32.mrf.mxu2  ;;  %v1815_v32 = vpop.f32.mrf.mxu3 }
 0x1d8   :  { %v1426_v14 = vadd.f32 %v1425_v56, %v1424_v38  ;;  %v1687_v46 = vadd.f32 %v1686_v6, %v1573_v26  ;;  %v1334_v12 = vpop.f32.mrf.mxu0 }
 0x1d9   :  { %v1360_v17 = vadd.f32 %v1334_v12, %v8009_v11 }
 0x1da   :  { %v8319_v52 = vadd.f32 %v1815_v32, %v1687_v46 }
 0x1db   :  { %v1379_v59 = vadd.f32 %v8109_v27, %v1360_v17  ;;  %v1576_v50 = vpop.f32.mrf.mxu1  ;;  %6205 = vmatmul.msk.f32.gmra.mxu0 %vm93_vm1, %v8028_v47  ;;  %v8335_v47 = vld [vmem:[%s10194_s2 + $0x270] sm:$0xff] }
 0x1dc   :  { %6271 = vmatmul.msk.f32.gmra.mxu2 %vm93_vm1, %v8033_v19  ;;  %6304 = vmatmul.msk.f32.gmra.mxu3 %vm93_vm1, %v8080_v7 }
 0x1dd   :  { %v1395_v16 = vmax.f32 %v1379_v59, 0.0 }
 0x1de   :  { %6238 = vmatmul.msk.f32.gmra.mxu1 %vm93_vm1, %v8043_v63 }
 0x1df   :  { %v1427_v11 = vsel %vm1400_vm2, %v1395_v16, 0.0  ;;  %v1689_v58 = vpop.f32.mrf.mxu2  ;;  %v1818_v53 = vpop.f32.mrf.mxu3 }
 0x1e0   :  { %v1428_v20 = vadd.f32 %v1427_v11, %v1426_v14  ;;  %v1690_v31 = vadd.f32 %v1689_v58, %v1576_v50  ;;  %v1337_v21 = vpop.f32.mrf.mxu0 }
 0x1e1   :  { %v1361_v38 = vadd.f32 %v1337_v21, %v8035_v5 }
 0x1e2   :  { %v8337_v19 = vadd.f32 %v1818_v53, %v1690_v31 }
 0x1e3   :  { %v1380_v2 = vadd.f32 %v8109_v27, %v1361_v38  ;;  %v1579_v49 = vpop.f32.mrf.mxu1  ;;  %6206 = vmatmul.msk.f32.gmra.mxu0 %vm93_vm1, %v8054_v54  ;;  %v8353_v54 = vld [vmem:[%s10194_s2 + $0x278] sm:$0xff] }
 0x1e4   :  { %6272 = vmatmul.msk.f32.gmra.mxu2 %vm93_vm1, %v8059_v4  ;;  %6305 = vmatmul.msk.f32.gmra.mxu3 %vm93_vm1, %v8335_v47 }
 0x1e5   :  { %v1396_v5 = vmax.f32 %v1380_v2, 0.0 }
 0x1e6   :  { %6239 = vmatmul.msk.f32.gmra.mxu1 %vm93_vm1, %v8069_v8 }
 0x1e7   :  { %v1429_v37 = vsel %vm1400_vm2, %v1396_v5, 0.0  ;;  %v1692_v24 = vpop.f32.mrf.mxu2  ;;  %v1821_v26 = vpop.f32.mrf.mxu3 }
 0x1e8   :  { %v1430_v39 = vadd.f32 %v1429_v37, %v1428_v20  ;;  %v1693_v56 = vadd.f32 %v1692_v24, %v1579_v49  ;;  %v1340_v6 = vpop.f32.mrf.mxu0 }
 0x1e9   :  { %v1362_v32 = vadd.f32 %v1340_v6, %v8061_v43 }
 0x1ea   :  { %v8355_v4 = vadd.f32 %v1821_v26, %v1693_v56  ;;  %v8404_v56 = vld [vmem:[%s10194_s2 + $0x290] sm:$0xff] }
 0x1eb   :  { %v1381_v14 = vadd.f32 %v8109_v27, %v1362_v32  ;;  %v1582_v46 = vpop.f32.mrf.mxu1  ;;  %6207 = vmatmul.msk.f32.gmra.mxu0 %vm93_vm1, %v8080_v7  ;;  %v8371_v7 = vld [vmem:[%s10194_s2 + $0x272] sm:$0xff] }
 0x1ec   :  { %6273 = vmatmul.msk.f32.gmra.mxu2 %vm93_vm1, %v8085_v60  ;;  %6306 = vmatmul.msk.f32.gmra.mxu3 %vm93_vm1, %v8353_v54  ;;  %v8376_v60 = vld [vmem:[%s10194_s2 + $0x288] sm:$0xff] }
 0x1ed   :  { %v1397_v43 = vmax.f32 %v1381_v14, 0.0 }
 0x1ee   :  { %6240 = vmatmul.msk.f32.gmra.mxu1 %vm93_vm1, %v8095_v45 }
 0x1ef   :  { %v1431_v12 = vsel %vm1400_vm2, %v1397_v43, 0.0  ;;  %v1695_v17 = vpop.f32.mrf.mxu2  ;;  %v1824_v59 = vpop.f32.mrf.mxu3 }
 0x1f0   :  { %v1432_v50 = vadd.f32 %v1431_v12, %v1430_v39  ;;  %v1696_v16 = vadd.f32 %v1695_v17, %v1582_v46  ;;  %v1343_v11 = vpop.f32.mrf.mxu0  ;;  %v8399_v39 = vld [vmem:[%s10194_s2 + $0x27a] sm:$0xff] }
 0x1f1   :  { %v1363_v58 = vadd.f32 %v1343_v11, %v8087_v41  ;;  %v8386_v41 = vld [vmem:[%s10194_s2 + $0x271] sm:$0xff] }
 0x1f2   :  { %v8378_v53 = vadd.f32 %v1824_v59, %v1696_v16 }
 0x1f3   :  { %v1382_v20 = vadd.f32 %v8109_v27, %v1363_v58  ;;  %v1585_v31 = vpop.f32.mrf.mxu1  ;;  %6208 = vmatmul.msk.f32.gmra.mxu0 %vm93_vm1, %v8335_v47 }
 0x1f4   :  { %6274 = vmatmul.msk.f32.gmra.mxu2 %vm93_vm1, %v8371_v7  ;;  %6307 = vmatmul.msk.f32.gmra.mxu3 %vm93_vm1, %v8376_v60 }
 0x1f5   :  { %v1398_v21 = vmax.f32 %v1382_v20, 0.0 }
 0x1f6   :  { %6241 = vmatmul.msk.f32.gmra.mxu1 %vm93_vm1, %v8386_v41 }
 0x1f7   :  { %v1433_v38 = vsel %vm1400_vm2, %v1398_v21, 0.0  ;;  %v1698_v2 = vpop.f32.mrf.mxu2  ;;  %v1827_v49 = vpop.f32.mrf.mxu3  ;;  %v8440_v21 = vld [vmem:[%s10195_s3 + $0x20] sm:$0xf] }
 0x1f8   :  { %v1434_v5 = vadd.f32 %v1433_v38, %v1432_v50  ;;  %v1699_v37 = vadd.f32 %v1698_v2, %v1585_v31  ;;  %v1346_v24 = vpop.f32.mrf.mxu0  ;;  %v6342_v31 = vld [vmem:[%s10194_s2 + $0x92] sm:$0xff] }
 0x1f9   :  { %v1364_v26 = vadd.f32 %v1346_v24, %v8103_v44  ;;  %v8414_v44 = vld [vmem:[%s10194_s2 + $0x279] sm:$0xff] }
 0x1fa   :  { %v8406_v6 = vadd.f32 %v1827_v49, %v1699_v37  ;;  %v8456_v49 = vld [vmem:[%s10195_s3 + $0x1c] sm:$0xf] }
 0x1fb   :  { %v1383_v32 = vadd.f32 %v8109_v27, %v1364_v26  ;;  %v1588_v14 = vpop.f32.mrf.mxu1  ;;  %6209 = vmatmul.msk.f32.gmra.mxu0 %vm93_vm1, %v8353_v54 }
 0x1fc   :  { %6275 = vmatmul.msk.f32.gmra.mxu2 %vm93_vm1, %v8399_v39  ;;  %6308 = vmatmul.msk.f32.gmra.mxu3 %vm93_vm1, %v8404_v56 }
 0x1fd   :  { %v1399_v46 = vmax.f32 %v1383_v32, 0.0 }
 0x1fe   :  { %6242 = vmatmul.msk.f32.gmra.mxu1 %vm93_vm1, %v8414_v44 }
 0x1ff   :  { %v1435_v43 = vsel %vm1400_vm2, %v1399_v46, 0.0  ;;  %v1701_v12 = vpop.f32.mrf.mxu2  ;;  %v1830_v17 = vpop.f32.mrf.mxu3 }
 0x200   :  { %v8423_v59 = vadd.f32 %v1435_v43, %v1434_v5  ;;  %v1702_v50 = vadd.f32 %v1701_v12, %v1588_v14  ;;  %v1931_v16 = vpop.f32.mrf.mxu0  ;;  %v6343_v14 = vld [vmem:[%s10194_s2 + $0x9a] sm:$0xff] }
 0x201   :  { %v1979_v58 = vadd.f32 %v1931_v16, %v8146_v61 }
 0x202   :  { %v8425_v11 = vadd.f32 %v1830_v17, %v1702_v50 }
 0x203   :  { %v2076_v20 = vpop.f32.mrf.mxu1  ;;  %6326 = vmatmul.msk.f32.vlgmr.msra.gmra.mxu0 %vm93_vm1, %v7859_v15  ;;  %v7011_v15 = vld [vmem:[%s10195_s3 + $0x18] sm:$0xf] }
 0x204   :  { %6408 = vmatmul.msk.f32.vlgmr.msra.gmra.mxu2 %vm93_vm1, %v8240_v28  ;;  %6425 = vmatmul.msk.f32.vlgmr.msra.gmra.mxu3 %vm93_vm1, %v8189_v13  ;;  %v2124_v61 = vadd.f32 %v2076_v20, %v1979_v58  ;;  %v7012_v13 = vld [vmem:[%s10195_s3 + $0x4] sm:$0xf] }
 0x205   :  { %6655 = vmatpush.msk.msra.mxu2 %vm142_vm0, %v8440_v21  ;;  %6589 = vmatpush.msk.msra.mxu0 %vm142_vm0, %v7011_v15 }
 0x206   :  { %6359 = vmatmul.msk.f32.vlgmr.msra.gmra.mxu1 %vm93_vm1, %v6342_v31  ;;  %6704 = vmatpush.msk.msra.mxu3 %vm142_vm0, %v7012_v13 }
 0x207   :  { %v2221_v38 = vpop.f32.mrf.mxu2  ;;  %v2367_v2 = vpop.f32.mrf.mxu3  ;;  %6622 = vmatpush.msk.msra.mxu1 %vm142_vm0, %v8456_v49 }
 0x208   :  { %v2269_v5 = vadd.f32 %v2221_v38, %v2124_v61  ;;  %v1934_v37 = vpop.f32.mrf.mxu0 }
 0x209   :  { %v1980_v26 = vadd.f32 %v1934_v37, %v8160_v42 }
 0x20a   :  { %v8460_v24 = vadd.f32 %v2367_v2, %v2269_v5  ;;  %v6345_v5 = vld [vmem:[%s10194_s2 + $0xb2] sm:$0xff] }
 0x20b   :  { %v2079_v32 = vpop.f32.mrf.mxu1  ;;  %6327 = vmatmul.msk.f32.gmra.mxu0 %vm93_vm1, %v7885_v36  ;;  %v8476_v36 = vld [vmem:[%s10194_s2 + $0xd9] sm:$0xff] }
 0x20c   :  { %6409 = vmatmul.msk.f32.gmra.mxu2 %vm93_vm1, %v8268_v48  ;;  %6426 = vmatmul.msk.f32.gmra.mxu3 %vm93_vm1, %v8207_v35  ;;  %v2125_v46 = vadd.f32 %v2079_v32, %v1980_v26  ;;  %v6344_v35 = vld [vmem:[%s10194_s2 + $0xaa] sm:$0xff] }
 0x20e   :  { %6360 = vmatmul.msk.f32.gmra.mxu1 %vm93_vm1, %v6343_v14 }
 0x20f   :  { %v2224_v43 = vpop.f32.mrf.mxu2  ;;  %v2370_v12 = vpop.f32.mrf.mxu3 }
 0x210   :  { %v2270_v42 = vadd.f32 %v2224_v43, %v2125_v46  ;;  %v1937_v17 = vpop.f32.mrf.mxu0  ;;  %v8517_v46 = vld [vmem:[%s10194_s2 + $0xf0] sm:$0xff] }
 0x211   :  { %v1981_v16 = vadd.f32 %v1937_v17, %v8173_v25 }
 0x212   :  { %v8478_v50 = vadd.f32 %v2370_v12, %v2270_v42 }
 0x213   :  { %v2082_v58 = vpop.f32.mrf.mxu1  ;;  %6328 = vmatmul.msk.f32.gmra.mxu0 %vm93_vm1, %v7911_v3  ;;  %v8494_v3 = vld [vmem:[%s10194_s2 + $0xe1] sm:$0xff] }
 0x214   :  { %6410 = vmatmul.msk.f32.gmra.mxu2 %vm93_vm1, %v8476_v36  ;;  %6427 = vmatmul.msk.f32.gmra.mxu3 %vm93_vm1, %v8230_v0  ;;  %v2126_v20 = vadd.f32 %v2082_v58, %v1981_v16 }
 0x216   :  { %6361 = vmatmul.msk.f32.gmra.mxu1 %vm93_vm1, %v6344_v35 }
 0x217   :  { %v2227_v31 = vpop.f32.mrf.mxu2  ;;  %v2373_v15 = vpop.f32.mrf.mxu3 }
 0x218   :  { %v2271_v25 = vadd.f32 %v2227_v31, %v2126_v20  ;;  %v1940_v61 = vpop.f32.mrf.mxu0 }
 0x219   :  { %v1982_v38 = vadd.f32 %v1940_v61, %v8191_v51 }
 0x21a   :  { %v8496_v13 = vadd.f32 %v2373_v15, %v2271_v25 }
 0x21b   :  { %v2085_v2 = vpop.f32.mrf.mxu1  ;;  %6329 = vmatmul.msk.f32.gmra.mxu0 %vm93_vm1, %v7937_v10  ;;  %v8512_v10 = vld [vmem:[%s10194_s2 + $0xf1] sm:$0xff] }
 0x21c   :  { %6411 = vmatmul.msk.f32.gmra.mxu2 %vm93_vm1, %v8494_v3  ;;  %6428 = vmatmul.msk.f32.gmra.mxu3 %vm93_vm1, %v8258_v1  ;;  %v2127_v37 = vadd.f32 %v2085_v2, %v1982_v38 }
 0x21e   :  { %6362 = vmatmul.msk.f32.gmra.mxu1 %vm93_vm1, %v6345_v5 }
 0x21f   :  { %v2230_v26 = vpop.f32.mrf.mxu2  ;;  %v2376_v32 = vpop.f32.mrf.mxu3 }
 0x220   :  { %v2272_v51 = vadd.f32 %v2230_v26, %v2127_v37  ;;  %v1943_v14 = vpop.f32.mrf.mxu0 }
 0x221   :  { %v1983_v12 = vadd.f32 %v1943_v14, %v8209_v62  ;;  %v8533_v62 = vld [vmem:[%s10194_s2 + $0xf9] sm:$0xff] }
 0x222   :  { %v8519_v43 = vadd.f32 %v2376_v32, %v2272_v51  ;;  %v8569_v14 = vld [vmem:[%s10194_s2 + $0xda] sm:$0xff] }
 0x223   :  { %v2088_v42 = vpop.f32.mrf.mxu1  ;;  %6330 = vmatmul.msk.f32.gmra.mxu0 %vm93_vm1, %v8240_v28  ;;  %v8538_v28 = vld [vmem:[%s10194_s2 + $0xf8] sm:$0xff] }
 0x224   :  { %6412 = vmatmul.msk.f32.gmra.mxu2 %vm93_vm1, %v8512_v10  ;;  %6429 = vmatmul.msk.f32.gmra.mxu3 %vm93_vm1, %v8517_v46  ;;  %v2128_v17 = vadd.f32 %v2088_v42, %v1983_v12 }
 0x226   :  { %6363 = vmatmul.msk.f32.gmra.mxu1 %vm93_vm1, %v8225_v30 }
 0x227   :  { %v2233_v16 = vpop.f32.mrf.mxu2  ;;  %v2379_v58 = vpop.f32.mrf.mxu3 }
 0x228   :  { %v2273_v35 = vadd.f32 %v2233_v16, %v2128_v17  ;;  %v1946_v20 = vpop.f32.mrf.mxu0 }
 0x229   :  { %v1984_v15 = vadd.f32 %v1946_v20, %v8232_v34  ;;  %v8554_v34 = vld [vmem:[%s10194_s2 + $0x109] sm:$0xff] }
 0x22a   :  { %v8540_v31 = vadd.f32 %v2379_v58, %v2273_v35  ;;  %v8580_v58 = vld [vmem:[%s10194_s2 + $0x111] sm:$0xff] }
 0x22b   :  { %v2091_v25 = vpop.f32.mrf.mxu1  ;;  %6331 = vmatmul.msk.f32.gmra.mxu0 %vm93_vm1, %v8268_v48  ;;  %v8559_v48 = vld [vmem:[%s10194_s2 + $0x108] sm:$0xff]  ;;  %v8585_v35 = vld [vmem:[%s10194_s2 + $0x110] sm:$0xff] }
 0x22c   :  { %6413 = vmatmul.msk.f32.gmra.mxu2 %vm93_vm1, %v8533_v62  ;;  %6430 = vmatmul.msk.f32.gmra.mxu3 %vm93_vm1, %v8538_v28  ;;  %v2129_v61 = vadd.f32 %v2091_v25, %v1984_v15 }
 0x22e   :  { %6364 = vmatmul.msk.f32.gmra.mxu1 %vm93_vm1, %v8253_v18 }
 0x22f   :  { %v2236_v38 = vpop.f32.mrf.mxu2  ;;  %v2382_v2 = vpop.f32.mrf.mxu3 }
 0x230   :  { %v2274_v5 = vadd.f32 %v2236_v38, %v2129_v61  ;;  %v1949_v37 = vpop.f32.mrf.mxu0  ;;  %v8595_v61 = vld [vmem:[%s10194_s2 + $0xe2] sm:$0xff] }
 0x231   :  { %v1985_v32 = vadd.f32 %v1949_v37, %v8260_v23 }
 0x232   :  { %v8561_v26 = vadd.f32 %v2382_v2, %v2274_v5 }
 0x233   :  { %v2094_v51 = vpop.f32.mrf.mxu1  ;;  %6332 = vmatmul.msk.f32.gmra.mxu0 %vm93_vm1, %v8476_v36 }
 0x234   :  { %6414 = vmatmul.msk.f32.gmra.mxu2 %vm93_vm1, %v8554_v34  ;;  %6431 = vmatmul.msk.f32.gmra.mxu3 %vm93_vm1, %v8559_v48  ;;  %v2130_v12 = vadd.f32 %v2094_v51, %v1985_v32 }
 0x236   :  { %6365 = vmatmul.msk.f32.gmra.mxu1 %vm93_vm1, %v8569_v14 }
 0x237   :  { %v2239_v23 = vpop.f32.mrf.mxu2  ;;  %v2385_v42 = vpop.f32.mrf.mxu3 }
 0x238   :  { %v2275_v17 = vadd.f32 %v2239_v23, %v2130_v12  ;;  %v1952_v16 = vpop.f32.mrf.mxu0  ;;  %v6350_v23 = vld [vmem:[%s10194_s2 + $0x242] sm:$0xff] }
 0x239   :  { %v1986_v15 = vadd.f32 %v1952_v16, %v8279_v22 }
 0x23a   :  { %v8587_v20 = vadd.f32 %v2385_v42, %v2275_v17 }
 0x23b   :  { %v2097_v25 = vpop.f32.mrf.mxu1  ;;  %6333 = vmatmul.msk.f32.gmra.mxu0 %vm93_vm1, %v8494_v3 }
 0x23c   :  { %6415 = vmatmul.msk.f32.gmra.mxu2 %vm93_vm1, %v8580_v58  ;;  %6432 = vmatmul.msk.f32.gmra.mxu3 %vm93_vm1, %v8585_v35  ;;  %v2131_v38 = vadd.f32 %v2097_v25, %v1986_v15 }
 0x23e   :  { %6366 = vmatmul.msk.f32.gmra.mxu1 %vm93_vm1, %v8595_v61 }
 0x23f   :  { %v2242_v22 = vpop.f32.mrf.mxu2  ;;  %v2388_v2 = vpop.f32.mrf.mxu3 }
 0x240   :  { %v2276_v5 = vadd.f32 %v2242_v22, %v2131_v38  ;;  %v1955_v37 = vpop.f32.mrf.mxu0  ;;  %v6351_v22 = vld [vmem:[%s10194_s2 + $0x24a] sm:$0xff] }
 0x241   :  { %v1987_v51 = vadd.f32 %v1955_v37, %v8292_v33 }
 0x242   :  { %v8603_v32 = vadd.f32 %v2388_v2, %v2276_v5 }
 0x243   :  { %v2100_v12 = vpop.f32.mrf.mxu1  ;;  %6334 = vmatmul.msk.f32.gmra.mxu0 %vm93_vm1, %v8017_v57 }
 0x244   :  { %6416 = vmatmul.msk.f32.gmra.mxu2 %vm93_vm1, %v8386_v41  ;;  %6433 = vmatmul.msk.f32.gmra.mxu3 %vm93_vm1, %v8335_v47  ;;  %v2132_v42 = vadd.f32 %v2100_v12, %v1987_v51 }
 0x246   :  { %6367 = vmatmul.msk.f32.gmra.mxu1 %vm93_vm1, %v6350_v23 }
 0x247   :  { %v2245_v17 = vpop.f32.mrf.mxu2  ;;  %v2391_v16 = vpop.f32.mrf.mxu3 }
 0x248   :  { %v2277_v33 = vadd.f32 %v2245_v17, %v2132_v42  ;;  %v1958_v15 = vpop.f32.mrf.mxu0 }
 0x249   :  { %v1988_v57 = vadd.f32 %v1958_v15, %v8306_v40 }
 0x24a   :  { %v8616_v25 = vadd.f32 %v2391_v16, %v2277_v33 }
 0x24b   :  { %v2103_v38 = vpop.f32.mrf.mxu1  ;;  %6335 = vmatmul.msk.f32.gmra.mxu0 %vm93_vm1, %v8043_v63  ;;  %v8632_v63 = vld [vmem:[%s10194_s2 + $0x289] sm:$0xff] }
 0x24c   :  { %6417 = vmatmul.msk.f32.gmra.mxu2 %vm93_vm1, %v8414_v44  ;;  %6434 = vmatmul.msk.f32.gmra.mxu3 %vm93_vm1, %v8353_v54  ;;  %v2133_v47 = vadd.f32 %v2103_v38, %v1988_v57  ;;  %v6352_v54 = vld [vmem:[%s10194_s2 + $0x25a] sm:$0xff] }
 0x24e   :  { %6368 = vmatmul.msk.f32.gmra.mxu1 %vm93_vm1, %v6351_v22  ;;  %v6353_v22 = vld [vmem:[%s10194_s2 + $0x262] sm:$0xff] }
 0x24f   :  { %v2248_v2 = vpop.f32.mrf.mxu2  ;;  %v2394_v5 = vpop.f32.mrf.mxu3 }
 0x250   :  { %v2278_v40 = vadd.f32 %v2248_v2, %v2133_v47  ;;  %v1961_v37 = vpop.f32.mrf.mxu0 }
 0x251   :  { %v1989_v12 = vadd.f32 %v1961_v37, %v8319_v52  ;;  %v8673_v37 = vld [vmem:[%s10194_s2 + $0x2a0] sm:$0xff] }
 0x252   :  { %v8634_v51 = vadd.f32 %v2394_v5, %v2278_v40 }
 0x253   :  { %v2106_v23 = vpop.f32.mrf.mxu1  ;;  %6336 = vmatmul.msk.f32.gmra.mxu0 %vm93_vm1, %v8069_v8  ;;  %v8650_v8 = vld [vmem:[%s10194_s2 + $0x291] sm:$0xff] }
 0x254   :  { %6418 = vmatmul.msk.f32.gmra.mxu2 %vm93_vm1, %v8632_v63  ;;  %6435 = vmatmul.msk.f32.gmra.mxu3 %vm93_vm1, %v8376_v60  ;;  %v2134_v42 = vadd.f32 %v2106_v23, %v1989_v12 }
 0x256   :  { %6369 = vmatmul.msk.f32.gmra.mxu1 %vm93_vm1, %v6352_v54 }
 0x257   :  { %v2251_v17 = vpop.f32.mrf.mxu2  ;;  %v2397_v16 = vpop.f32.mrf.mxu3 }
 0x258   :  { %v2279_v52 = vadd.f32 %v2251_v17, %v2134_v42  ;;  %v1964_v33 = vpop.f32.mrf.mxu0 }
 0x259   :  { %v1990_v57 = vadd.f32 %v1964_v33, %v8337_v19 }
 0x25a   :  { %v8652_v15 = vadd.f32 %v2397_v16, %v2279_v52 }
 0x25b   :  { %v2109_v38 = vpop.f32.mrf.mxu1  ;;  %6337 = vmatmul.msk.f32.gmra.mxu0 %vm93_vm1, %v8095_v45  ;;  %v8668_v45 = vld [vmem:[%s10194_s2 + $0x2a1] sm:$0xff] }
 0x25c   :  { %6419 = vmatmul.msk.f32.gmra.mxu2 %vm93_vm1, %v8650_v8  ;;  %6436 = vmatmul.msk.f32.gmra.mxu3 %vm93_vm1, %v8404_v56  ;;  %v2135_v47 = vadd.f32 %v2109_v38, %v1990_v57 }
 0x25e   :  { %6370 = vmatmul.msk.f32.gmra.mxu1 %vm93_vm1, %v6353_v22 }
 0x25f   :  { %v2254_v2 = vpop.f32.mrf.mxu2  ;;  %v2400_v5 = vpop.f32.mrf.mxu3 }
 0x260   :  { %v2280_v19 = vadd.f32 %v2254_v2, %v2135_v47  ;;  %v1967_v40 = vpop.f32.mrf.mxu0 }
 0x261   :  { %v1991_v23 = vadd.f32 %v1967_v40, %v8355_v4  ;;  %v8689_v4 = vld [vmem:[%s10194_s2 + $0x2a9] sm:$0xff] }
 0x262   :  { %v8675_v12 = vadd.f32 %v2400_v5, %v2280_v19 }
 0x263   :  { %v2112_v54 = vpop.f32.mrf.mxu1  ;;  %6338 = vmatmul.msk.f32.gmra.mxu0 %vm93_vm1, %v8386_v41  ;;  %v8694_v41 = vld [vmem:[%s10194_s2 + $0x2a8] sm:$0xff] }
 0x264   :  { %6420 = vmatmul.msk.f32.gmra.mxu2 %vm93_vm1, %v8668_v45  ;;  %6437 = vmatmul.msk.f32.gmra.mxu3 %vm93_vm1, %v8673_v37  ;;  %v2136_v42 = vadd.f32 %v2112_v54, %v1991_v23 }
 0x266   :  { %6371 = vmatmul.msk.f32.gmra.mxu1 %vm93_vm1, %v8371_v7 }
 0x267   :  { %v2257_v17 = vpop.f32.mrf.mxu2  ;;  %v2403_v16 = vpop.f32.mrf.mxu3 }
 0x268   :  { %v2281_v52 = vadd.f32 %v2257_v17, %v2136_v42  ;;  %v1970_v33 = vpop.f32.mrf.mxu0  ;;  %v8725_v17 = vld [vmem:[%s10194_s2 + $0x28a] sm:$0xff] }
 0x269   :  { %v1992_v38 = vadd.f32 %v1970_v33, %v8378_v53  ;;  %v8710_v53 = vld [vmem:[%s10194_s2 + $0x2b9] sm:$0xff] }
 0x26a   :  { %v8696_v57 = vadd.f32 %v2403_v16, %v2281_v52 }
 0x26b   :  { %v2115_v22 = vpop.f32.mrf.mxu1  ;;  %6339 = vmatmul.msk.f32.gmra.mxu0 %vm93_vm1, %v8414_v44  ;;  %v8715_v44 = vld [vmem:[%s10194_s2 + $0x2b8] sm:$0xff] }
 0x26c   :  { %6421 = vmatmul.msk.f32.gmra.mxu2 %vm93_vm1, %v8689_v4  ;;  %6438 = vmatmul.msk.f32.gmra.mxu3 %vm93_vm1, %v8694_v41  ;;  %v2137_v47 = vadd.f32 %v2115_v22, %v1992_v38  ;;  %v8736_v22 = vld [vmem:[%s10194_s2 + $0x2c1] sm:$0xff] }
 0x26e   :  { %6372 = vmatmul.msk.f32.gmra.mxu1 %vm93_vm1, %v8399_v39 }
 0x26f   :  { %v2260_v2 = vpop.f32.mrf.mxu2  ;;  %v2406_v5 = vpop.f32.mrf.mxu3 }
 0x270   :  { %v2282_v19 = vadd.f32 %v2260_v2, %v2137_v47  ;;  %v1973_v40 = vpop.f32.mrf.mxu0  ;;  %v8741_v47 = vld [vmem:[%s10194_s2 + $0x2c0] sm:$0xff] }
 0x271   :  { %v1993_v54 = vadd.f32 %v1973_v40, %v8406_v6  ;;  %v8751_v40 = vld [vmem:[%s10194_s2 + $0x292] sm:$0xff] }
 0x272   :  { %v8717_v23 = vadd.f32 %v2406_v5, %v2282_v19 }
 0x273   :  { %v2118_v42 = vpop.f32.mrf.mxu1  ;;  %6340 = vmatmul.msk.f32.gmra.mxu0 %vm93_vm1, %v8632_v63 }
 0x274   :  { %6422 = vmatmul.msk.f32.gmra.mxu2 %vm93_vm1, %v8710_v53  ;;  %6439 = vmatmul.msk.f32.gmra.mxu3 %vm93_vm1, %v8715_v44  ;;  %v2138_v16 = vadd.f32 %v2118_v42, %v1993_v54 }
 0x276   :  { %6373 = vmatmul.msk.f32.gmra.mxu1 %vm93_vm1, %v8725_v17 }
 0x277   :  { %v2263_v6 = vpop.f32.mrf.mxu2  ;;  %v2409_v52 = vpop.f32.mrf.mxu3 }
 0x278   :  { %v2283_v33 = vadd.f32 %v2263_v6, %v2138_v16  ;;  %v1976_v38 = vpop.f32.mrf.mxu0 }
 0x279   :  { %v1994_v5 = vadd.f32 %v1976_v38, %v8425_v11 }
 0x27a   :  { %v8743_v2 = vadd.f32 %v2409_v52, %v2283_v33 }
 0x27b   :  { %v2121_v19 = vpop.f32.mrf.mxu1  ;;  %6341 = vmatmul.msk.f32.gmra.mxu0 %vm93_vm1, %v8650_v8 }
 0x27c   :  { %6423 = vmatmul.msk.f32.gmra.mxu2 %vm93_vm1, %v8736_v22  ;;  %6440 = vmatmul.msk.f32.gmra.mxu3 %vm93_vm1, %v8741_v47  ;;  %v2139_v54 = vadd.f32 %v2121_v19, %v1994_v5  ;;  %v7014_v5 = vld [vmem:[%s10195_s3] sm:$0xf] }
 0x27d   :  { %v10212_v19 = vld [vmem:[#allocation5_spill] sm:$0xff] }
 0x27e   :  { %6374 = vmatmul.msk.f32.gmra.mxu1 %vm93_vm1, %v8751_v40 }
 0x27f   :  { %v2266_v11 = vpop.f32.mrf.mxu2  ;;  %v2412_v42 = vpop.f32.mrf.mxu3 }
 0x280   :  { %v2284_v16 = vadd.f32 %v2266_v11, %v2139_v54  ;;  %v2512_v6 = vpop.f32.mrf.mxu0 }
 0x281   :  { %v2560_v33 = vadd.f32 %v2512_v6, %v8460_v24 }
 0x282   :  { %v8759_v52 = vadd.f32 %v2412_v42, %v2284_v16 }
 0x283   :  { %v2657_v38 = vpop.f32.mrf.mxu1  ;;  %6458 = vmatmul.msk.f32.vlgmr.msrb.gmra.mxu0 %vm93_vm1, %v8225_v30 }
 0x284   :  { %6524 = vmatmul.msk.f32.vlgmr.msrb.gmra.mxu2 %vm93_vm1, %v8476_v36  ;;  %6557 = vmatmul.msk.f32.vlgmr.msrb.gmra.mxu3 %vm93_vm1, %v8569_v14  ;;  %v2705_v24 = vadd.f32 %v2657_v38, %v2560_v33 }
 0x285   :  { %6787 = vmatpush.msk.msrb.mxu2 %vm142_vm0, %v8141_v9  ;;  %6721 = vmatpush.msk.msrb.mxu0 %vm142_vm0, %v7014_v5 }
 0x286   :  { %6491 = vmatmul.msk.f32.vlgmr.msrb.gmra.mxu1 %vm93_vm1, %v8230_v0  ;;  %6820 = vmatpush.msk.msrb.mxu3 %vm142_vm0, %v8120_v55  ;;  %v2721_v42 = vadd.f32 %v8109_v27, %v2705_v24 }
 0x287   :  { %v2895_v30 = vpop.f32.mrf.mxu2  ;;  %v3008_v36 = vpop.f32.mrf.mxu3  ;;  %6754 = vmatpush.msk.msrb.mxu1 %vm142_vm0, %v10212_v19 }
 0x288   :  { %v8780_v54 = vadd.f32 %v3008_v36, %v2895_v30  ;;  %v2515_v9 = vpop.f32.mrf.mxu0  ;;  %v2737_v55 = vmax.f32 %v2721_v42, 0.0 }
 0x289   :  { %v2561_v11 = vadd.f32 %v2515_v9, %v8478_v50 }
 0x28a   :  { %v2753_v30 = vsel %vm1400_vm2, %v2737_v55, 0.0 }
 0x28b   :  { %v2660_v16 = vpop.f32.mrf.mxu1  ;;  %6459 = vmatmul.msk.f32.gmra.mxu0 %vm93_vm1, %v8253_v18 }
 0x28c   :  { %v2706_v0 = vadd.f32 %v2660_v16, %v2561_v11  ;;  %6525 = vmatmul.msk.f32.gmra.mxu2 %vm93_vm1, %v8494_v3  ;;  %6558 = vmatmul.msk.f32.gmra.mxu3 %vm93_vm1, %v8595_v61  ;;  %v8799_v3 = vld [vmem:[%s10194_s2 + $0xf2] sm:$0xff] }
 0x28e   :  { %v2722_v6 = vadd.f32 %v8109_v27, %v2706_v0  ;;  %6492 = vmatmul.msk.f32.gmra.mxu1 %vm93_vm1, %v8258_v1 }
 0x28f   :  { %v2898_v50 = vpop.f32.mrf.mxu2  ;;  %v3011_v33 = vpop.f32.mrf.mxu3 }
 0x290   :  { %v2738_v38 = vmax.f32 %v2722_v6, 0.0  ;;  %v8793_v5 = vadd.f32 %v3011_v33, %v2898_v50  ;;  %v2518_v24 = vpop.f32.mrf.mxu0  ;;  %v8823_v6 = vld [vmem:[%s10194_s2 + $0xfa] sm:$0xff] }
 0x291   :  { %v2562_v18 = vadd.f32 %v2518_v24, %v8496_v13  ;;  %v8812_v13 = vld [vmem:[%s10196_s4] ss:$0 sm:$0xff] }
 0x292   :  { %v2754_v27 = vsel %vm1400_vm2, %v2738_v38, 0.0 }
 0x293   :  { %v2755_v36 = vadd.f32 %v2754_v27, %v2753_v30  ;;  %v2663_v19 = vpop.f32.mrf.mxu1  ;;  %6460 = vmatmul.msk.f32.gmra.mxu0 %vm93_vm1, %v8569_v14 }
 0x294   :  { %v2707_v1 = vadd.f32 %v2663_v19, %v2562_v18  ;;  %6526 = vmatmul.msk.f32.gmra.mxu2 %vm93_vm1, %v8512_v10  ;;  %6559 = vmatmul.msk.f32.gmra.mxu3 %vm93_vm1, %v8799_v3 }
 0x296   :  { %v2723_v9 = vadd.f32 %v8812_v13, %v2707_v1  ;;  %6493 = vmatmul.msk.f32.gmra.mxu1 %vm93_vm1, %v8517_v46 }
 0x297   :  { %v2901_v11 = vpop.f32.mrf.mxu2  ;;  %v3014_v42 = vpop.f32.mrf.mxu3 }
 0x298   :  { %v2739_v14 = vmax.f32 %v2723_v9, 0.0  ;;  %v8817_v16 = vadd.f32 %v3014_v42, %v2901_v11  ;;  %v2521_v0 = vpop.f32.mrf.mxu0 }
 0x299   :  { %v2563_v55 = vadd.f32 %v2521_v0, %v8519_v43 }
 0x29a   :  { %v2756_v50 = vsel %vm1400_vm2, %v2739_v14, 0.0 }
 0x29b   :  { %v2757_v33 = vadd.f32 %v2756_v50, %v2755_v36  ;;  %v2666_v38 = vpop.f32.mrf.mxu1  ;;  %6461 = vmatmul.msk.f32.gmra.mxu0 %vm93_vm1, %v8595_v61 }
 0x29c   :  { %v2708_v24 = vadd.f32 %v2666_v38, %v2563_v55  ;;  %6527 = vmatmul.msk.f32.gmra.mxu2 %vm93_vm1, %v8533_v62  ;;  %6560 = vmatmul.msk.f32.gmra.mxu3 %vm93_vm1, %v8823_v6  ;;  %v8841_v62 = vld [vmem:[%s10194_s2 + $0x10a] sm:$0xff] }
 0x29e   :  { %v2724_v43 = vadd.f32 %v8812_v13, %v2708_v24  ;;  %6494 = vmatmul.msk.f32.gmra.mxu1 %vm93_vm1, %v8538_v28 }
 0x29f   :  { %v2904_v18 = vpop.f32.mrf.mxu2  ;;  %v3017_v30 = vpop.f32.mrf.mxu3 }
 0x2a0   :  { %v2740_v27 = vmax.f32 %v2724_v43, 0.0  ;;  %v8835_v36 = vadd.f32 %v3017_v30, %v2904_v18  ;;  %v2524_v19 = vpop.f32.mrf.mxu0 }
 0x2a1   :  { %v2564_v61 = vadd.f32 %v2524_v19, %v8540_v31 }
 0x2a2   :  { %v2758_v1 = vsel %vm1400_vm2, %v2740_v27, 0.0 }
 0x2a3   :  { %v2759_v9 = vadd.f32 %v2758_v1, %v2757_v33  ;;  %v2669_v11 = vpop.f32.mrf.mxu1  ;;  %6462 = vmatmul.msk.f32.gmra.mxu0 %vm93_vm1, %v8799_v3 }
 0x2a4   :  { %v2709_v42 = vadd.f32 %v2669_v11, %v2564_v61  ;;  %6528 = vmatmul.msk.f32.gmra.mxu2 %vm93_vm1, %v8554_v34  ;;  %6561 = vmatmul.msk.f32.gmra.mxu3 %vm93_vm1, %v8841_v62  ;;  %v8859_v34 = vld [vmem:[%s10194_s2 + $0x112] sm:$0xff] }
 0x2a6   :  { %v2725_v31 = vadd.f32 %v8812_v13, %v2709_v42  ;;  %6495 = vmatmul.msk.f32.gmra.mxu1 %vm93_vm1, %v8559_v48  ;;  %v8882_v42 = vld [vmem:[%s10194_s2 + $0x122] sm:$0xff] }
 0x2a7   :  { %v2907_v14 = vpop.f32.mrf.mxu2  ;;  %v3020_v0 = vpop.f32.mrf.mxu3 }
 0x2a8   :  { %v2741_v55 = vmax.f32 %v2725_v31, 0.0  ;;  %v8853_v50 = vadd.f32 %v3020_v0, %v2907_v14  ;;  %v2527_v33 = vpop.f32.mrf.mxu0 }
 0x2a9   :  { %v2565_v38 = vadd.f32 %v2527_v33, %v8561_v26 }
 0x2aa   :  { %v2760_v24 = vsel %vm1400_vm2, %v2741_v55, 0.0 }
 0x2ab   :  { %v2761_v43 = vadd.f32 %v2760_v24, %v2759_v9  ;;  %v2672_v18 = vpop.f32.mrf.mxu1  ;;  %6463 = vmatmul.msk.f32.gmra.mxu0 %vm93_vm1, %v8823_v6 }
 0x2ac   :  { %v2710_v30 = vadd.f32 %v2672_v18, %v2565_v38  ;;  %6529 = vmatmul.msk.f32.gmra.mxu2 %vm93_vm1, %v8580_v58  ;;  %6562 = vmatmul.msk.f32.gmra.mxu3 %vm93_vm1, %v8859_v34  ;;  %v8877_v58 = vld [vmem:[%s10194_s2 + $0x121] sm:$0xff] }
 0x2ae   :  { %v2726_v26 = vadd.f32 %v8812_v13, %v2710_v30  ;;  %6496 = vmatmul.msk.f32.gmra.mxu1 %vm93_vm1, %v8585_v35 }
 0x2af   :  { %v2910_v27 = vpop.f32.mrf.mxu2  ;;  %v3023_v19 = vpop.f32.mrf.mxu3 }
 0x2b0   :  { %v2742_v61 = vmax.f32 %v2726_v26, 0.0  ;;  %v8871_v1 = vadd.f32 %v3023_v19, %v2910_v27  ;;  %v2530_v9 = vpop.f32.mrf.mxu0  ;;  %v8905_v27 = vld [vmem:[%s10194_s2 + $0x129] sm:$0xff] }
 0x2b1   :  { %v2566_v11 = vadd.f32 %v2530_v9, %v8587_v20  ;;  %v8890_v20 = vld [vmem:[%s10194_s2 + $0x120] sm:$0xff]  ;;  %v8910_v19 = vld [vmem:[%s10194_s2 + $0x12a] sm:$0xff]  ;;  %v1416_v9 = vrot.slane %v8277_v29, 4 }
 0x2b2   :  { %v2762_v31 = vsel %vm1400_vm2, %v2742_v61, 0.0  ;;  %10214 = vst [vmem:[#allocation6_spill] sm:$0xff] %v8910_v19 }
 0x2b3   :  { %v2763_v14 = vadd.f32 %v2762_v31, %v2761_v43  ;;  %v2675_v0 = vpop.f32.mrf.mxu1  ;;  %6464 = vmatmul.msk.f32.gmra.mxu0 %vm93_vm1, %v8841_v62 }
 0x2b4   :  { %v2711_v55 = vadd.f32 %v2675_v0, %v2566_v11  ;;  %6530 = vmatmul.msk.f32.gmra.mxu2 %vm93_vm1, %v8877_v58  ;;  %6563 = vmatmul.msk.f32.gmra.mxu3 %vm93_vm1, %v8882_v42 }
 0x2b6   :  { %v2727_v33 = vadd.f32 %v8812_v13, %v2711_v55  ;;  %6497 = vmatmul.msk.f32.gmra.mxu1 %vm93_vm1, %v8890_v20 }
 0x2b7   :  { %v2913_v38 = vpop.f32.mrf.mxu2  ;;  %v3026_v24 = vpop.f32.mrf.mxu3 }
 0x2b8   :  { %v2743_v43 = vmax.f32 %v2727_v33, 0.0  ;;  %v8899_v18 = vadd.f32 %v3026_v24, %v2913_v38  ;;  %v2533_v30 = vpop.f32.mrf.mxu0 }
 0x2b9   :  { %v2567_v26 = vadd.f32 %v2533_v30, %v8603_v32  ;;  %v8919_v32 = vld [vmem:[%s10194_s2 + $0x128] sm:$0xff] }
 0x2ba   :  { %10213 = vst [vmem:[#allocation5_spill] sm:$0xff] %v8899_v18  ;;  %v2764_v61 = vsel %vm1400_vm2, %v2743_v43, 0.0 }
 0x2bb   :  { %v2765_v11 = vadd.f32 %v2764_v61, %v2763_v14  ;;  %v2678_v31 = vpop.f32.mrf.mxu1  ;;  %6465 = vmatmul.msk.f32.gmra.mxu0 %vm93_vm1, %v8859_v34  ;;  %v1417_v14 = vadd.f32 %v1416_v9, %v8277_v29 }
 0x2bc   :  { %v2712_v0 = vadd.f32 %v2678_v31, %v2567_v26  ;;  %6531 = vmatmul.msk.f32.gmra.mxu2 %vm93_vm1, %v8905_v27  ;;  %6564 = vmatmul.msk.f32.gmra.mxu3 %vm93_vm1, %v8910_v19 }
 0x2bd   :  { %v1418_v31 = vrot.slane %v1417_v14, 2 }
 0x2be   :  { %v2728_v55 = vadd.f32 %v8812_v13, %v2712_v0  ;;  %6498 = vmatmul.msk.f32.gmra.mxu1 %vm93_vm1, %v8919_v32 }
 0x2bf   :  { %v2916_v33 = vpop.f32.mrf.mxu2  ;;  %v3029_v38 = vpop.f32.mrf.mxu3  ;;  %v1419_v0 = vadd.f32 %v1418_v31, %v1417_v14 }
 0x2c0   :  { %v2744_v24 = vmax.f32 %v2728_v55, 0.0  ;;  %v8929_v43 = vadd.f32 %v3029_v38, %v2916_v33  ;;  %v2536_v30 = vpop.f32.mrf.mxu0 }
 0x2c1   :  { %v2568_v61 = vadd.f32 %v2536_v30, %v8616_v25  ;;  %v1420_v30 = vrot.slane %v1419_v0, 1 }
 0x2c2   :  { %10215 = vst [vmem:[#allocation7_spill] sm:$0xff] %v8929_v43  ;;  %v2766_v26 = vsel %vm1400_vm2, %v2744_v24, 0.0 }
 0x2c3   :  { %v2767_v18 = vadd.f32 %v2766_v26, %v2765_v11  ;;  %v2681_v19 = vpop.f32.mrf.mxu1  ;;  %6466 = vmatmul.msk.f32.gmra.mxu0 %vm93_vm1, %v8371_v7  ;;  %v1421_v31 = vadd.f32 %v1420_v30, %v1419_v0 }
 0x2c4   :  { %6532 = vmatmul.msk.f32.gmra.mxu2 %vm93_vm1, %v8632_v63  ;;  %6565 = vmatmul.msk.f32.gmra.mxu3 %vm93_vm1, %v8725_v17  ;;  %v2713_v9 = vadd.f32 %v2681_v19, %v2568_v61 }
 0x2c5   :  { %v2768_v29 = vrot.slane %v2767_v18, 4 }
 0x2c6   :  { %6499 = vmatmul.msk.f32.gmra.mxu1 %vm93_vm1, %v8376_v60  ;;  %v2729_v63 = vadd.f32 %v8812_v13, %v2713_v9 }
 0x2c7   :  { %v2769_v55 = vadd.f32 %v2768_v29, %v2767_v18  ;;  %v2919_v25 = vpop.f32.mrf.mxu2  ;;  %v3032_v33 = vpop.f32.mrf.mxu3 }
 0x2c8   :  { %v8941_v11 = vadd.f32 %v3032_v33, %v2919_v25  ;;  %v2539_v38 = vpop.f32.mrf.mxu0  ;;  %v2745_v18 = vmax.f32 %v2729_v63, 0.0 }
 0x2c9   :  { %v2770_v24 = vrot.slane %v2769_v55, 2  ;;  %v2569_v7 = vadd.f32 %v2539_v38, %v8634_v51 }
 0x2ca   :  { %v2774_v33 = vsel %vm1400_vm2, %v2745_v18, 0.0 }
 0x2cb   :  { %v2771_v26 = vadd.f32 %v2770_v24, %v2769_v55  ;;  %v2684_v43 = vpop.f32.mrf.mxu1  ;;  %6467 = vmatmul.msk.f32.gmra.mxu0 %vm93_vm1, %v8399_v39  ;;  %v8960_v55 = vld [vmem:[%s10194_s2 + $0x2a2] sm:$0xff] }
 0x2cc   :  { %v2714_v19 = vadd.f32 %v2684_v43, %v2569_v7  ;;  %6533 = vmatmul.msk.f32.gmra.mxu2 %vm93_vm1, %v8650_v8  ;;  %6566 = vmatmul.msk.f32.gmra.mxu3 %vm93_vm1, %v8751_v40 }
 0x2cd   :  { %v2772_v60 = vrot.slane %v2771_v26, 1 }
 0x2ce   :  { %v2730_v14 = vadd.f32 %v8812_v13, %v2714_v19  ;;  %6500 = vmatmul.msk.f32.gmra.mxu1 %vm93_vm1, %v8404_v56 }
 0x2cf   :  { %v2922_v51 = vpop.f32.mrf.mxu2  ;;  %v3035_v61 = vpop.f32.mrf.mxu3  ;;  %v2773_v29 = vadd.f32 %v2772_v60, %v2771_v26 }
 0x2d0   :  { %v2746_v9 = vmax.f32 %v2730_v14, 0.0  ;;  %v8954_v39 = vadd.f32 %v3035_v61, %v2922_v51  ;;  %v2542_v43 = vpop.f32.mrf.mxu0 }
 0x2d1   :  { %v2570_v8 = vadd.f32 %v2542_v43, %v8652_v15  ;;  %v8962_v25 = vadd.f32 %v2773_v29, %v1421_v31 }
 0x2d2   :  { %v2775_v56 = vsel %vm1400_vm2, %v2746_v9, 0.0 }
 0x2d3   :  { %v2776_v38 = vadd.f32 %v2775_v56, %v2774_v33  ;;  %v2687_v0 = vpop.f32.mrf.mxu1  ;;  %6468 = vmatmul.msk.f32.gmra.mxu0 %vm93_vm1, %v8725_v17 }
 0x2d4   :  { %v2715_v24 = vadd.f32 %v2687_v0, %v2570_v8  ;;  %6534 = vmatmul.msk.f32.gmra.mxu2 %vm93_vm1, %v8668_v45  ;;  %6567 = vmatmul.msk.f32.gmra.mxu3 %vm93_vm1, %v8960_v55  ;;  %v8981_v45 = vld [vmem:[%s10194_s2 + $0x2aa] sm:$0xff] }
 0x2d6   :  { %v2731_v15 = vadd.f32 %v8812_v13, %v2715_v24  ;;  %6501 = vmatmul.msk.f32.gmra.mxu1 %vm93_vm1, %v8673_v37 }
 0x2d7   :  { %v2925_v7 = vpop.f32.mrf.mxu2  ;;  %v3038_v63 = vpop.f32.mrf.mxu3 }
 0x2d8   :  { %v2747_v30 = vmax.f32 %v2731_v15, 0.0  ;;  %v8975_v26 = vadd.f32 %v3038_v63, %v2925_v7  ;;  %v2545_v19 = vpop.f32.mrf.mxu0 }
 0x2d9   :  { %v2571_v17 = vadd.f32 %v2545_v19, %v8675_v12 }
 0x2da   :  { %v2777_v60 = vsel %vm1400_vm2, %v2747_v30, 0.0 }
 0x2db   :  { %v2778_v18 = vadd.f32 %v2777_v60, %v2776_v38  ;;  %v2690_v14 = vpop.f32.mrf.mxu1  ;;  %6469 = vmatmul.msk.f32.gmra.mxu0 %vm93_vm1, %v8751_v40 }
 0x2dc   :  { %v2716_v51 = vadd.f32 %v2690_v14, %v2571_v17  ;;  %6535 = vmatmul.msk.f32.gmra.mxu2 %vm93_vm1, %v8689_v4  ;;  %6568 = vmatmul.msk.f32.gmra.mxu3 %vm93_vm1, %v8981_v45  ;;  %v8999_v4 = vld [vmem:[%s10194_s2 + $0x2ba] sm:$0xff] }
 0x2de   :  { %v2732_v12 = vadd.f32 %v8812_v13, %v2716_v51  ;;  %6502 = vmatmul.msk.f32.gmra.mxu1 %vm93_vm1, %v8694_v41 }
 0x2df   :  { %v2928_v61 = vpop.f32.mrf.mxu2  ;;  %v3041_v31 = vpop.f32.mrf.mxu3 }
 0x2e0   :  { %v2748_v29 = vmax.f32 %v2732_v12, 0.0  ;;  %v8993_v9 = vadd.f32 %v3041_v31, %v2928_v61  ;;  %v2548_v43 = vpop.f32.mrf.mxu0 }
 0x2e1   :  { %v2572_v40 = vadd.f32 %v2548_v43, %v8696_v57  ;;  %v9040_v43 = vld [vmem:[%s10194_s2 + $0x2d2] sm:$0xff] }
 0x2e2   :  { %v2779_v8 = vsel %vm1400_vm2, %v2748_v29, 0.0 }
 0x2e3   :  { %v2780_v33 = vadd.f32 %v2779_v8, %v2778_v18  ;;  %v2693_v56 = vpop.f32.mrf.mxu1  ;;  %6470 = vmatmul.msk.f32.gmra.mxu0 %vm93_vm1, %v8960_v55 }
 0x2e4   :  { %v2717_v38 = vadd.f32 %v2693_v56, %v2572_v40  ;;  %6536 = vmatmul.msk.f32.gmra.mxu2 %vm93_vm1, %v8710_v53  ;;  %6569 = vmatmul.msk.f32.gmra.mxu3 %vm93_vm1, %v8999_v4  ;;  %v9017_v53 = vld [vmem:[%s10194_s2 + $0x2c2] sm:$0xff] }
 0x2e6   :  { %v2733_v57 = vadd.f32 %v8812_v13, %v2717_v38  ;;  %6503 = vmatmul.msk.f32.gmra.mxu1 %vm93_vm1, %v8715_v44 }
 0x2e7   :  { %v2931_v0 = vpop.f32.mrf.mxu2  ;;  %v3044_v24 = vpop.f32.mrf.mxu3 }
 0x2e8   :  { %v2749_v15 = vmax.f32 %v2733_v57, 0.0  ;;  %v9011_v7 = vadd.f32 %v3044_v24, %v2931_v0  ;;  %v2551_v63 = vpop.f32.mrf.mxu0 }
 0x2e9   :  { %v2573_v30 = vadd.f32 %v2551_v63, %v8717_v23 }
 0x2ea   :  { %v2781_v19 = vsel %vm1400_vm2, %v2749_v15, 0.0 }
 0x2eb   :  { %v2782_v17 = vadd.f32 %v2781_v19, %v2780_v33  ;;  %v2696_v60 = vpop.f32.mrf.mxu1  ;;  %6471 = vmatmul.msk.f32.gmra.mxu0 %vm93_vm1, %v8981_v45  ;;  %v9063_v19 = vld [vmem:[%s10194_s2 + $0x2d9] sm:$0xff] }
 0x2ec   :  { %v2718_v18 = vadd.f32 %v2696_v60, %v2573_v30  ;;  %6537 = vmatmul.msk.f32.gmra.mxu2 %vm93_vm1, %v8736_v22  ;;  %6570 = vmatmul.msk.f32.gmra.mxu3 %vm93_vm1, %v9017_v53  ;;  %v9035_v22 = vld [vmem:[%s10194_s2 + $0x2d1] sm:$0xff] }
 0x2ee   :  { %v2734_v23 = vadd.f32 %v8812_v13, %v2718_v18  ;;  %6504 = vmatmul.msk.f32.gmra.mxu1 %vm93_vm1, %v8741_v47  ;;  %v1437_v18 = vrot.slane %v8423_v59, 4 }
 0x2ef   :  { %v2934_v14 = vpop.f32.mrf.mxu2  ;;  %v3047_v51 = vpop.f32.mrf.mxu3 }
 0x2f0   :  { %v2750_v12 = vmax.f32 %v2734_v23, 0.0  ;;  %v9029_v61 = vadd.f32 %v3047_v51, %v2934_v14  ;;  %v2554_v31 = vpop.f32.mrf.mxu0 }
 0x2f1   :  { %v2574_v29 = vadd.f32 %v2554_v31, %v8743_v2  ;;  %v9048_v2 = vld [vmem:[%s10194_s2 + $0x2d0] sm:$0xff]  ;;  %v1438_v31 = vadd.f32 %v1437_v18, %v8423_v59 }
 0x2f2   :  { %v2783_v40 = vsel %vm1400_vm2, %v2750_v12, 0.0 }
 0x2f3   :  { %v2784_v8 = vadd.f32 %v2783_v40, %v2782_v17  ;;  %v2699_v33 = vpop.f32.mrf.mxu1  ;;  %6472 = vmatmul.msk.f32.gmra.mxu0 %vm93_vm1, %v8999_v4  ;;  %v9068_v17 = vld [vmem:[%s10194_s2 + $0x2da] sm:$0xff] }
 0x2f4   :  { %v2719_v56 = vadd.f32 %v2699_v33, %v2574_v29  ;;  %6538 = vmatmul.msk.f32.gmra.mxu2 %vm93_vm1, %v9035_v22  ;;  %6571 = vmatmul.msk.f32.gmra.mxu3 %vm93_vm1, %v9040_v43 }
 0x2f6   :  { %v2735_v38 = vadd.f32 %v8812_v13, %v2719_v56  ;;  %6505 = vmatmul.msk.f32.gmra.mxu1 %vm93_vm1, %v9048_v2 }
 0x2f7   :  { %v2937_v57 = vpop.f32.mrf.mxu2  ;;  %v3050_v0 = vpop.f32.mrf.mxu3 }
 0x2f8   :  { %v2751_v24 = vmax.f32 %v2735_v38, 0.0  ;;  %v9057_v15 = vadd.f32 %v3050_v0, %v2937_v57  ;;  %v2557_v63 = vpop.f32.mrf.mxu0  ;;  %v1439_v0 = vrot.slane %v1438_v31, 2 }
 0x2f9   :  { %v2575_v30 = vadd.f32 %v2557_v63, %v8759_v52  ;;  %v9077_v52 = vld [vmem:[%s10194_s2 + $0x2d8] sm:$0xff] }
 0x2fa   :  { %v2785_v60 = vsel %vm1400_vm2, %v2751_v24, 0.0 }
 0x2fb   :  { %v2786_v23 = vadd.f32 %v2785_v60, %v2784_v8  ;;  %v2702_v14 = vpop.f32.mrf.mxu1  ;;  %6473 = vmatmul.msk.f32.gmra.mxu0 %vm93_vm1, %v9017_v53 }
 0x2fc   :  { %v2720_v51 = vadd.f32 %v2702_v14, %v2575_v30  ;;  %6539 = vmatmul.msk.f32.gmra.mxu2 %vm93_vm1, %v9063_v19  ;;  %6572 = vmatmul.msk.f32.gmra.mxu3 %vm93_vm1, %v9068_v17 }
 0x2fe   :  { %v2736_v12 = vadd.f32 %v8812_v13, %v2720_v51  ;;  %6506 = vmatmul.msk.f32.gmra.mxu1 %vm93_vm1, %v9077_v52 }
 0x2ff   :  { %v2940_v29 = vpop.f32.mrf.mxu2  ;;  %v3053_v40 = vpop.f32.mrf.mxu3 }
 0x300   :  { %v2752_v8 = vmax.f32 %v2736_v12, 0.0  ;;  %v9087_v33 = vadd.f32 %v3053_v40, %v2940_v29  ;;  %v3137_v56 = vpop.f32.mrf.mxu0 }
 0x301   :  { %v3185_v57 = vadd.f32 %v3137_v56, %v8780_v54  ;;  %v7016_v54 = vld [vmem:[%s10195_s3 + $0x14] sm:$0xf] }
 0x302   :  { %v2787_v38 = vsel %vm1400_vm2, %v2752_v8, 0.0 }
 0x303   :  { %v2788_v24 = vadd.f32 %v2787_v38, %v2786_v23  ;;  %v3283_v63 = vpop.f32.mrf.mxu1  ;;  %6590 = vmatmul.msk.f32.vlgmr.msra.gmra.mxu0 %vm93_vm1, %v8517_v46  ;;  %v1440_v46 = vadd.f32 %v1439_v0, %v1438_v31  ;;  %v6607_v31 = vld [vmem:[%s10194_s2 + $0xf9] sm:$0xff] }
 0x304   :  { %6656 = vmatmul.msk.f32.vlgmr.msra.gmra.mxu2 %vm93_vm1, %v8799_v3  ;;  %6705 = vmatmul.msk.f32.vlgmr.msra.gmra.mxu3 %vm93_vm1, %v8877_v58  ;;  %v3331_v30 = vadd.f32 %v3283_v63, %v3185_v57  ;;  %v9127_v63 = vld [vmem:[%s10194_s2 + $0x139] sm:$0xff] }
 0x305   :  { %v2789_v59 = vrot.slane %v2788_v24, 4  ;;  %6919 = vmatpush.msk.msra.mxu2 %vm142_vm0, %v8456_v49  ;;  %6853 = vmatpush.msk.msra.mxu0 %vm142_vm0, %v7016_v54  ;;  %v7017_v49 = vld [vmem:[%s10195_s3 + $0x18] sm:$0xf] }
 0x306   :  { %6623 = vmatmul.msk.f32.vlgmr.msra.gmra.mxu1 %vm93_vm1, %v8512_v10  ;;  %6952 = vmatpush.msk.msra.mxu3 %vm142_vm0, %v8440_v21  ;;  %v1441_v10 = vrot.slane %v1440_v46, 1 }
 0x307   :  { %v2790_v3 = vadd.f32 %v2789_v59, %v2788_v24  ;;  %v3428_v60 = vpop.f32.mrf.mxu2  ;;  %v3573_v18 = vpop.f32.mrf.mxu3  ;;  %6886 = vmatpush.msk.msra.mxu1 %vm142_vm0, %v7017_v49 }
 0x308   :  { %v3476_v23 = vadd.f32 %v3428_v60, %v3331_v30  ;;  %v3140_v14 = vpop.f32.mrf.mxu0  ;;  %v1442_v57 = vadd.f32 %v1441_v10, %v1440_v46  ;;  %v6608_v46 = vld [vmem:[%s10194_s2 + $0x109] sm:$0xff] }
 0x309   :  { %v2791_v51 = vrot.slane %v2790_v3, 2  ;;  %v3186_v12 = vadd.f32 %v3140_v14, %v8793_v5 }
 0x30a   :  { %v9112_v29 = vadd.f32 %v3573_v18, %v3476_v23 }
 0x30b   :  { %v2792_v40 = vadd.f32 %v2791_v51, %v2790_v3  ;;  %v3286_v21 = vpop.f32.mrf.mxu1  ;;  %6591 = vmatmul.msk.f32.gmra.mxu0 %vm93_vm1, %v8538_v28  ;;  %v6609_v51 = vld [vmem:[%s10194_s2 + $0x111] sm:$0xff] }
 0x30c   :  { %6657 = vmatmul.msk.f32.gmra.mxu2 %vm93_vm1, %v8823_v6  ;;  %6706 = vmatmul.msk.f32.gmra.mxu3 %vm93_vm1, %v8905_v27  ;;  %v3332_v5 = vadd.f32 %v3286_v21, %v3186_v12 }
 0x30d   :  { %v2793_v8 = vrot.slane %v2792_v40, 1 }
 0x30e   :  { %6624 = vmatmul.msk.f32.gmra.mxu1 %vm93_vm1, %v6607_v31 }
 0x30f   :  { %v3431_v56 = vpop.f32.mrf.mxu2  ;;  %v3576_v38 = vpop.f32.mrf.mxu3  ;;  %v2794_v0 = vadd.f32 %v2793_v8, %v2792_v40 }
 0x310   :  { %v3477_v24 = vadd.f32 %v3431_v56, %v3332_v5  ;;  %v3143_v28 = vpop.f32.mrf.mxu0 }
 0x311   :  { %v9129_v59 = vadd.f32 %v2794_v0, %v1442_v57  ;;  %v3187_v6 = vadd.f32 %v3143_v28, %v8817_v16  ;;  %v9181_v0 = vld [vmem:[%s10194_s2 + $0x159] sm:$0xff] }
 0x312   :  { %v9132_v54 = vadd.f32 %v3576_v38, %v3477_v24 }
 0x313   :  { %v3289_v30 = vpop.f32.mrf.mxu1  ;;  %6592 = vmatmul.msk.f32.gmra.mxu0 %vm93_vm1, %v8559_v48  ;;  %v9147_v48 = vld [vmem:[%s10194_s2 + $0x141] sm:$0xff] }
 0x314   :  { %6658 = vmatmul.msk.f32.gmra.mxu2 %vm93_vm1, %v8841_v62  ;;  %6707 = vmatmul.msk.f32.gmra.mxu3 %vm93_vm1, %v9127_v63  ;;  %v3333_v3 = vadd.f32 %v3289_v30, %v3187_v6  ;;  %v10216_v30 = vld [vmem:[#allocation6_spill] sm:$0xff] }
 0x316   :  { %6625 = vmatmul.msk.f32.gmra.mxu1 %vm93_vm1, %v6608_v46 }
 0x317   :  { %v3434_v16 = vpop.f32.mrf.mxu2  ;;  %v3579_v60 = vpop.f32.mrf.mxu3 }
 0x318   :  { %v3478_v18 = vadd.f32 %v3434_v16, %v3333_v3  ;;  %v3146_v49 = vpop.f32.mrf.mxu0 }
 0x319   :  { %v3188_v23 = vadd.f32 %v3146_v49, %v8835_v36  ;;  %v9207_v49 = vld [vmem:[%s10194_s2 + $0x169] sm:$0xff] }
 0x31a   :  { %v9150_v14 = vadd.f32 %v3579_v60, %v3478_v18  ;;  %v9197_v60 = vld [vmem:[%s10194_s2 + $0x138] sm:$0xff] }
 0x31b   :  { %v3292_v62 = vpop.f32.mrf.mxu1  ;;  %6593 = vmatmul.msk.f32.gmra.mxu0 %vm93_vm1, %v8585_v35  ;;  %v9165_v35 = vld [vmem:[%s10194_s2 + $0x151] sm:$0xff]  ;;  %v9202_v18 = vld [vmem:[%s10194_s2 + $0x13a] sm:$0xff] }
 0x31c   :  { %6659 = vmatmul.msk.f32.gmra.mxu2 %vm93_vm1, %v8859_v34  ;;  %6708 = vmatmul.msk.f32.gmra.mxu3 %vm93_vm1, %v9147_v48  ;;  %v3334_v12 = vadd.f32 %v3292_v62, %v3188_v23 }
 0x31e   :  { %6626 = vmatmul.msk.f32.gmra.mxu1 %vm93_vm1, %v6609_v51 }
 0x31f   :  { %v3437_v36 = vpop.f32.mrf.mxu2  ;;  %v3582_v10 = vpop.f32.mrf.mxu3 }
 0x320   :  { %v3479_v40 = vadd.f32 %v3437_v36, %v3334_v12  ;;  %v3149_v21 = vpop.f32.mrf.mxu0 }
 0x321   :  { %v3189_v31 = vadd.f32 %v3149_v21, %v8853_v50 }
 0x322   :  { %v9168_v8 = vadd.f32 %v3582_v10, %v3479_v40 }
 0x323   :  { %v3295_v34 = vpop.f32.mrf.mxu1  ;;  %6594 = vmatmul.msk.f32.gmra.mxu0 %vm93_vm1, %v8890_v20 }
 0x324   :  { %6660 = vmatmul.msk.f32.gmra.mxu2 %vm93_vm1, %v8882_v42  ;;  %6709 = vmatmul.msk.f32.gmra.mxu3 %vm93_vm1, %v9165_v35  ;;  %v3335_v5 = vadd.f32 %v3295_v34, %v3189_v31  ;;  %v9223_v31 = vld [vmem:[%s10194_s2 + $0x140] sm:$0xff] }
 0x325   :  { %v9228_v34 = vld [vmem:[%s10194_s2 + $0x142] sm:$0xff] }
 0x326   :  { %6627 = vmatmul.msk.f32.gmra.mxu1 %vm93_vm1, %v8877_v58 }
 0x327   :  { %v3440_v56 = vpop.f32.mrf.mxu2  ;;  %v3585_v38 = vpop.f32.mrf.mxu3 }
 0x328   :  { %v3480_v57 = vadd.f32 %v3440_v56, %v3335_v5  ;;  %v3152_v50 = vpop.f32.mrf.mxu0  ;;  %v9233_v5 = vld [vmem:[%s10194_s2 + $0x171] sm:$0xff] }
 0x329   :  { %v3190_v24 = vadd.f32 %v3152_v50, %v8871_v1  ;;  %v10218_v56 = vld [vmem:[#allocation7_spill] sm:$0xff] }
 0x32a   :  { %v9184_v28 = vadd.f32 %v3585_v38, %v3480_v57 }
 0x32b   :  { %v3298_v6 = vpop.f32.mrf.mxu1  ;;  %6595 = vmatmul.msk.f32.gmra.mxu0 %vm93_vm1, %v8919_v32 }
 0x32c   :  { %6661 = vmatmul.msk.f32.gmra.mxu2 %vm93_vm1, %v10216_v30  ;;  %6710 = vmatmul.msk.f32.gmra.mxu3 %vm93_vm1, %v9181_v0  ;;  %v3336_v58 = vadd.f32 %v3298_v6, %v3190_v24 }
 0x32e   :  { %6628 = vmatmul.msk.f32.gmra.mxu1 %vm93_vm1, %v8905_v27  ;;  %v10217_v27 = vld [vmem:[#allocation5_spill] sm:$0xff] }
 0x32f   :  { %v3443_v46 = vpop.f32.mrf.mxu2  ;;  %v3588_v3 = vpop.f32.mrf.mxu3 }
 0x330   :  { %v3481_v16 = vadd.f32 %v3443_v46, %v3336_v58  ;;  %v3155_v1 = vpop.f32.mrf.mxu0 }
 0x331   :  { %v3191_v23 = vadd.f32 %v3155_v1, %v10217_v27 }
 0x332   :  { %v9210_v62 = vadd.f32 %v3588_v3, %v3481_v16 }
 0x333   :  { %v3301_v51 = vpop.f32.mrf.mxu1  ;;  %6596 = vmatmul.msk.f32.gmra.mxu0 %vm93_vm1, %v9197_v60 }
 0x334   :  { %6662 = vmatmul.msk.f32.gmra.mxu2 %vm93_vm1, %v9202_v18  ;;  %6711 = vmatmul.msk.f32.gmra.mxu3 %vm93_vm1, %v9207_v49  ;;  %v3337_v12 = vadd.f32 %v3301_v51, %v3191_v23  ;;  %v6614_v23 = vld [vmem:[%s10194_s2 + $0x2a1] sm:$0xff] }
 0x336   :  { %6629 = vmatmul.msk.f32.gmra.mxu1 %vm93_vm1, %v9127_v63 }
 0x337   :  { %v3446_v36 = vpop.f32.mrf.mxu2  ;;  %v3591_v10 = vpop.f32.mrf.mxu3 }
 0x338   :  { %v3482_v40 = vadd.f32 %v3446_v36, %v3337_v12  ;;  %v3158_v21 = vpop.f32.mrf.mxu0 }
 0x339   :  { %v3192_v38 = vadd.f32 %v3158_v21, %v10218_v56 }
 0x33a   :  { %v9236_v57 = vadd.f32 %v3591_v10, %v3482_v40 }
 0x33b   :  { %v3304_v50 = vpop.f32.mrf.mxu1  ;;  %6597 = vmatmul.msk.f32.gmra.mxu0 %vm93_vm1, %v9223_v31 }
 0x33c   :  { %6663 = vmatmul.msk.f32.gmra.mxu2 %vm93_vm1, %v9228_v34  ;;  %6712 = vmatmul.msk.f32.gmra.mxu3 %vm93_vm1, %v9233_v5  ;;  %v3338_v24 = vadd.f32 %v3304_v50, %v3192_v38 }
 0x33e   :  { %6630 = vmatmul.msk.f32.gmra.mxu1 %vm93_vm1, %v9147_v48 }
 0x33f   :  { %v3449_v6 = vpop.f32.mrf.mxu2  ;;  %v3594_v58 = vpop.f32.mrf.mxu3 }
 0x340   :  { %v3483_v46 = vadd.f32 %v3449_v6, %v3338_v24  ;;  %v3161_v3 = vpop.f32.mrf.mxu0 }
 0x341   :  { %v3193_v16 = vadd.f32 %v3161_v3, %v8941_v11 }
 0x342   :  { %v9247_v1 = vadd.f32 %v3594_v58, %v3483_v46  ;;  %v6616_v46 = vld [vmem:[%s10194_s2 + $0x2b9] sm:$0xff] }
 0x343   :  { %v3307_v27 = vpop.f32.mrf.mxu1  ;;  %6598 = vmatmul.msk.f32.gmra.mxu0 %vm93_vm1, %v8673_v37 }
 0x344   :  { %6664 = vmatmul.msk.f32.gmra.mxu2 %vm93_vm1, %v8960_v55  ;;  %6713 = vmatmul.msk.f32.gmra.mxu3 %vm93_vm1, %v9035_v22  ;;  %v3339_v51 = vadd.f32 %v3307_v27, %v3193_v16  ;;  %v6615_v55 = vld [vmem:[%s10194_s2 + $0x2a9] sm:$0xff] }
 0x346   :  { %6631 = vmatmul.msk.f32.gmra.mxu1 %vm93_vm1, %v6614_v23 }
 0x347   :  { %v3452_v11 = vpop.f32.mrf.mxu2  ;;  %v3597_v12 = vpop.f32.mrf.mxu3 }
 0x348   :  { %v3484_v36 = vadd.f32 %v3452_v11, %v3339_v51  ;;  %v3164_v10 = vpop.f32.mrf.mxu0 }
 0x349   :  { %v3194_v40 = vadd.f32 %v3164_v10, %v8954_v39 }
 0x34a   :  { %v9260_v37 = vadd.f32 %v3597_v12, %v3484_v36  ;;  %v6617_v12 = vld [vmem:[%s10194_s2 + $0x2c1] sm:$0xff] }
 0x34b   :  { %v3310_v21 = vpop.f32.mrf.mxu1  ;;  %6599 = vmatmul.msk.f32.gmra.mxu0 %vm93_vm1, %v8694_v41  ;;  %v9275_v41 = vld [vmem:[%s10194_s2 + $0x2e9] sm:$0xff] }
 0x34c   :  { %6665 = vmatmul.msk.f32.gmra.mxu2 %vm93_vm1, %v8981_v45  ;;  %6714 = vmatmul.msk.f32.gmra.mxu3 %vm93_vm1, %v9063_v19  ;;  %v3340_v56 = vadd.f32 %v3310_v21, %v3194_v40 }
 0x34e   :  { %6632 = vmatmul.msk.f32.gmra.mxu1 %vm93_vm1, %v6615_v55 }
 0x34f   :  { %v3455_v39 = vpop.f32.mrf.mxu2  ;;  %v3600_v38 = vpop.f32.mrf.mxu3 }
 0x350   :  { %v3485_v50 = vadd.f32 %v3455_v39, %v3340_v56  ;;  %v3167_v24 = vpop.f32.mrf.mxu0  ;;  %v9319_v39 = vld [vmem:[%s10192_s0] sm:$0x3] }
 0x351   :  { %v3195_v6 = vadd.f32 %v3167_v24, %v8975_v26  ;;  %vm5512_vm3 = vcmp.gt.s32.totalorder %v9319_v39, 1 }
 0x352   :  { %v9278_v58 = vadd.f32 %v3600_v38, %v3485_v50 }
 0x353   :  { %v3313_v45 = vpop.f32.mrf.mxu1  ;;  %6600 = vmatmul.msk.f32.gmra.mxu0 %vm93_vm1, %v8715_v44  ;;  %v9293_v44 = vld [vmem:[%s10194_s2 + $0x2f1] sm:$0xff] }
 0x354   :  { %6666 = vmatmul.msk.f32.gmra.mxu2 %vm93_vm1, %v8999_v4  ;;  %6715 = vmatmul.msk.f32.gmra.mxu3 %vm93_vm1, %v9275_v41  ;;  %v3341_v3 = vadd.f32 %v3313_v45, %v3195_v6 }
 0x356   :  { %6633 = vmatmul.msk.f32.gmra.mxu1 %vm93_vm1, %v6616_v46  ;;  %v9333_v46 = vld [vmem:[%s10194_s2 + $0x309] sm:$0xff] }
 0x357   :  { %v3458_v26 = vpop.f32.mrf.mxu2  ;;  %v3603_v16 = vpop.f32.mrf.mxu3 }
 0x358   :  { %v3486_v27 = vadd.f32 %v3458_v26, %v3341_v3  ;;  %v3170_v23 = vpop.f32.mrf.mxu0 }
 0x359   :  { %v3196_v51 = vadd.f32 %v3170_v23, %v8993_v9 }
 0x35a   :  { %v9296_v11 = vadd.f32 %v3603_v16, %v3486_v27 }
 0x35b   :  { %v3316_v4 = vpop.f32.mrf.mxu1  ;;  %6601 = vmatmul.msk.f32.gmra.mxu0 %vm93_vm1, %v8741_v47  ;;  %v9311_v47 = vld [vmem:[%s10194_s2 + $0x301] sm:$0xff] }
 0x35c   :  { %6667 = vmatmul.msk.f32.gmra.mxu2 %vm93_vm1, %v9017_v53  ;;  %6716 = vmatmul.msk.f32.gmra.mxu3 %vm93_vm1, %v9293_v44  ;;  %v3342_v36 = vadd.f32 %v3316_v4, %v3196_v51  ;;  %v7046_v53 = vmov 0   ;;  %v9349_v4 = vld [vmem:[%s10194_s2 + $0x2e8] sm:$0xff] }
 0x35d   :  { %6980 = vset.pattern.permute.xlu0 %v7046_v53 }
 0x35e   :  { %6634 = vmatmul.msk.f32.gmra.mxu1 %vm93_vm1, %v6617_v12  ;;  %5507 = vperm.xlu0 %6980, %v9319_v39   ;;  %v9354_v12 = vld [vmem:[%s10194_s2 + $0x2ea] sm:$0xff] }
 0x35f   :  { %v3461_v9 = vpop.f32.mrf.mxu2  ;;  %v3606_v10 = vpop.f32.mrf.mxu3 }
 0x360   :  { %v3487_v40 = vadd.f32 %v3461_v9, %v3342_v36  ;;  %v3173_v21 = vpop.f32.mrf.mxu0  ;;  %v9359_v36 = vld [vmem:[%s10194_s2 + $0x319] sm:$0xff] }
 0x361   :  { %v3197_v55 = vadd.f32 %v3173_v21, %v9011_v7 }
 0x362   :  { %v9314_v56 = vadd.f32 %v3606_v10, %v3487_v40 }
 0x363   :  { %v3319_v38 = vpop.f32.mrf.mxu1  ;;  %6602 = vmatmul.msk.f32.gmra.mxu0 %vm93_vm1, %v9048_v2 }
 0x364   :  { %6668 = vmatmul.msk.f32.gmra.mxu2 %vm93_vm1, %v9040_v43  ;;  %6717 = vmatmul.msk.f32.gmra.mxu3 %vm93_vm1, %v9311_v47  ;;  %v3343_v7 = vadd.f32 %v3319_v38, %v3197_v55  ;;  %v9375_v38 = vld [vmem:[%s10194_s2 + $0x2f0] sm:$0xff] }
 0x366   :  { %6635 = vmatmul.msk.f32.gmra.mxu1 %vm93_vm1, %v9035_v22 }
 0x367   :  { %v3464_v50 = vpop.f32.mrf.mxu2  ;;  %v3609_v24 = vpop.f32.mrf.mxu3 }
 0x368   :  { %v3488_v6 = vadd.f32 %v3464_v50, %v3343_v7  ;;  %v3176_v45 = vpop.f32.mrf.mxu0  ;;  %v9380_v7 = vld [vmem:[%s10194_s2 + $0x2f2] sm:$0xff]  ;;  %v9385_v50 = vld [vmem:[%s10194_s2 + $0x321] sm:$0xff] }
 0x369   :  { %v3198_v3 = vadd.f32 %v3176_v45, %v9029_v61 }
 0x36a   :  { %v9336_v26 = vadd.f32 %v3609_v24, %v3488_v6 }
 0x36b   :  { %v3322_v16 = vpop.f32.mrf.mxu1  ;;  %6603 = vmatmul.msk.f32.gmra.mxu0 %vm93_vm1, %v9077_v52 }
 0x36c   :  { %6669 = vmatmul.msk.f32.gmra.mxu2 %vm93_vm1, %v9068_v17  ;;  %6718 = vmatmul.msk.f32.gmra.mxu3 %vm93_vm1, %v9333_v46  ;;  %v3344_v22 = vadd.f32 %v3322_v16, %v3198_v3 }
 0x36e   :  { %6636 = vmatmul.msk.f32.gmra.mxu1 %vm93_vm1, %v9063_v19 }
 0x36f   :  { %v3467_v27 = vpop.f32.mrf.mxu2  ;;  %v3612_v23 = vpop.f32.mrf.mxu3 }
 0x370   :  { %v3489_v51 = vadd.f32 %v3467_v27, %v3344_v22  ;;  %v3179_v61 = vpop.f32.mrf.mxu0 }
 0x371   :  { %v3199_v19 = vadd.f32 %v3179_v61, %v9057_v15 }
 0x372   :  { %v9362_v9 = vadd.f32 %v3612_v23, %v3489_v51 }
 0x373   :  { %v3325_v10 = vpop.f32.mrf.mxu1  ;;  %6604 = vmatmul.msk.f32.gmra.mxu0 %vm93_vm1, %v9349_v4 }
 0x374   :  { %6670 = vmatmul.msk.f32.gmra.mxu2 %vm93_vm1, %v9354_v12  ;;  %6719 = vmatmul.msk.f32.gmra.mxu3 %vm93_vm1, %v9359_v36  ;;  %v3345_v40 = vadd.f32 %v3325_v10, %v3199_v19 }
 0x376   :  { %6637 = vmatmul.msk.f32.gmra.mxu1 %vm93_vm1, %v9275_v41 }
 0x377   :  { %v3470_v21 = vpop.f32.mrf.mxu2  ;;  %v3615_v55 = vpop.f32.mrf.mxu3 }
 0x378   :  { %v3490_v53 = vadd.f32 %v3470_v21, %v3345_v40  ;;  %v3182_v15 = vpop.f32.mrf.mxu0 }
 0x379   :  { %v3200_v24 = vadd.f32 %v3182_v15, %v9087_v33 }
 0x37a   :  { %v9388_v6 = vadd.f32 %v3615_v55, %v3490_v53 }
 0x37b   :  { %v3328_v45 = vpop.f32.mrf.mxu1  ;;  %6605 = vmatmul.msk.f32.gmra.mxu0 %vm93_vm1, %v9375_v38 }
 0x37c   :  { %6671 = vmatmul.msk.f32.gmra.mxu2 %vm93_vm1, %v9380_v7  ;;  %6720 = vmatmul.msk.f32.gmra.mxu3 %vm93_vm1, %v9385_v50  ;;  %v3346_v3 = vadd.f32 %v3328_v45, %v3200_v24 }
 0x37e   :  { %6638 = vmatmul.msk.f32.gmra.mxu1 %vm93_vm1, %v9293_v44 }
 0x37f   :  { %v3473_v16 = vpop.f32.mrf.mxu2  ;;  %v3618_v22 = vpop.f32.mrf.mxu3 }
 0x380   :  { %v3491_v27 = vadd.f32 %v3473_v16, %v3346_v3  ;;  %v3719_v33 = vpop.f32.mrf.mxu0 }
 0x381   :  { %v3767_v51 = vadd.f32 %v3719_v33, %v9112_v29 }
 0x382   :  { %v9398_v23 = vadd.f32 %v3618_v22, %v3491_v27 }
 0x383   :  { %v3864_v61 = vpop.f32.mrf.mxu1  ;;  %6722 = vmatmul.msk.f32.vlgmr.msrb.gmra.mxu0 %vm93_vm1, %v8890_v20 }
 0x384   :  { %6788 = vmatmul.msk.f32.vlgmr.msrb.gmra.mxu2 %vm93_vm1, %v9197_v60  ;;  %6821 = vmatmul.msk.f32.vlgmr.msrb.gmra.mxu3 %vm93_vm1, %v9127_v63  ;;  %v3912_v19 = vadd.f32 %v3864_v61, %v3767_v51 }
 0x386   :  { %6755 = vmatmul.msk.f32.vlgmr.msrb.gmra.mxu1 %vm93_vm1, %v8882_v42 }
 0x387   :  { %v4009_v10 = vpop.f32.mrf.mxu2  ;;  %v9409_v40 = vpop.f32.mrf.mxu3 }
 0x388   :  { %v4057_v21 = vadd.f32 %v4009_v10, %v3912_v19  ;;  %v3722_v55 = vpop.f32.mrf.mxu0  ;;  %v9445_v19 = vld [vmem:[%s10194_s2 + $0x158] sm:$0xff] }
 0x389   :  { %v3768_v29 = vadd.f32 %v3722_v55, %v9132_v54 }
 0x38a   :  { %v4073_v20 = vadd.f32 %v8812_v13, %v4057_v21 }
 0x38b   :  { %v3867_v53 = vpop.f32.mrf.mxu1  ;;  %6723 = vmatmul.msk.f32.gmra.mxu0 %vm93_vm1, %v8919_v32  ;;  %v9426_v32 = vld [vmem:[%s10194_s2 + $0x150] sm:$0xff] }
 0x38c   :  { %6789 = vmatmul.msk.f32.gmra.mxu2 %vm93_vm1, %v9223_v31  ;;  %6822 = vmatmul.msk.f32.gmra.mxu3 %vm93_vm1, %v9147_v48  ;;  %v3913_v42 = vadd.f32 %v3867_v53, %v3768_v29  ;;  %v4089_v45 = vmax.f32 %v4073_v20, 0.0 }
 0x38e   :  { %6756 = vmatmul.msk.f32.gmra.mxu1 %vm93_vm1, %v10216_v30  ;;  %v4105_v22 = vsel %vm1400_vm2, %v4089_v45, 0.0 }
 0x38f   :  { %v4012_v63 = vpop.f32.mrf.mxu2  ;;  %v9421_v15 = vpop.f32.mrf.mxu3 }
 0x390   :  { %v4058_v54 = vadd.f32 %v4012_v63, %v3913_v42  ;;  %v3725_v24 = vpop.f32.mrf.mxu0 }
 0x391   :  { %v3769_v48 = vadd.f32 %v3725_v24, %v9150_v14 }
 0x392   :  { %v4074_v3 = vadd.f32 %v8812_v13, %v4058_v54 }
 0x393   :  { %v3870_v16 = vpop.f32.mrf.mxu1  ;;  %6724 = vmatmul.msk.f32.gmra.mxu0 %vm93_vm1, %v9197_v60 }
 0x394   :  { %v4090_v30 = vmax.f32 %v4074_v3, 0.0  ;;  %6790 = vmatmul.msk.f32.gmra.mxu2 %vm93_vm1, %v9426_v32  ;;  %6823 = vmatmul.msk.f32.gmra.mxu3 %vm93_vm1, %v9165_v35  ;;  %v3914_v33 = vadd.f32 %v3870_v16, %v3769_v48  ;;  %v9450_v35 = vld [vmem:[%s10196_s4] ss:$0 sm:$0xff]  ;;  %v9477_v48 = vld [vmem:[%s10194_s2 + $0x152] sm:$0xff] }
 0x396   :  { %v4106_v27 = vsel %vm1400_vm2, %v4090_v30, 0.0  ;;  %6757 = vmatmul.msk.f32.gmra.mxu1 %vm93_vm1, %v9202_v18 }
 0x397   :  { %v4107_v13 = vadd.f32 %v4106_v27, %v4105_v22  ;;  %v4015_v14 = vpop.f32.mrf.mxu2  ;;  %v9440_v51 = vpop.f32.mrf.mxu3 }
 0x398   :  { %v4059_v60 = vadd.f32 %v4015_v14, %v3914_v33  ;;  %v3728_v61 = vpop.f32.mrf.mxu0 }
 0x399   :  { %v3770_v21 = vadd.f32 %v3728_v61, %v9168_v8 }
 0x39a   :  { %v4075_v10 = vadd.f32 %v9450_v35, %v4059_v60  ;;  %v9491_v60 = vld [vmem:[%s10194_s2 + $0x170] sm:$0xff] }
 0x39b   :  { %v3873_v55 = vpop.f32.mrf.mxu1  ;;  %6725 = vmatmul.msk.f32.gmra.mxu0 %vm93_vm1, %v9223_v31  ;;  %v9468_v31 = vld [vmem:[%s10194_s2 + $0x168] sm:$0xff] }
 0x39c   :  { %v4091_v29 = vmax.f32 %v4075_v10, 0.0  ;;  %6791 = vmatmul.msk.f32.gmra.mxu2 %vm93_vm1, %v9445_v19  ;;  %6824 = vmatmul.msk.f32.gmra.mxu3 %vm93_vm1, %v9181_v0  ;;  %v3915_v20 = vadd.f32 %v3873_v55, %v3770_v21  ;;  %v9500_v21 = vld [vmem:[%s10194_s2 + $0x15a] sm:$0xff] }
 0x39e   :  { %v4108_v53 = vsel %vm1400_vm2, %v4091_v29, 0.0  ;;  %6758 = vmatmul.msk.f32.gmra.mxu1 %vm93_vm1, %v9228_v34 }
 0x39f   :  { %v4109_v42 = vadd.f32 %v4108_v53, %v4107_v13  ;;  %v4018_v63 = vpop.f32.mrf.mxu2  ;;  %v9463_v8 = vpop.f32.mrf.mxu3 }
 0x3a0   :  { %v4060_v54 = vadd.f32 %v4018_v63, %v3915_v20  ;;  %v3731_v24 = vpop.f32.mrf.mxu0 }
 0x3a1   :  { %v3771_v0 = vadd.f32 %v3731_v24, %v9184_v28  ;;  %v9514_v24 = vld [vmem:[%s10194_s2 + $0x180] sm:$0xff] }
 0x3a2   :  { %v4076_v45 = vadd.f32 %v9450_v35, %v4060_v54 }
 0x3a3   :  { %v3876_v3 = vpop.f32.mrf.mxu1  ;;  %6726 = vmatmul.msk.f32.gmra.mxu0 %vm93_vm1, %v9426_v32 }
 0x3a4   :  { %v4092_v16 = vmax.f32 %v4076_v45, 0.0  ;;  %6792 = vmatmul.msk.f32.gmra.mxu2 %vm93_vm1, %v9468_v31  ;;  %6825 = vmatmul.msk.f32.gmra.mxu3 %vm93_vm1, %v9207_v49  ;;  %v3916_v22 = vadd.f32 %v3876_v3, %v3771_v0 }
 0x3a6   :  { %v4110_v30 = vsel %vm1400_vm2, %v4092_v16, 0.0  ;;  %6759 = vmatmul.msk.f32.gmra.mxu1 %vm93_vm1, %v9477_v48  ;;  %v9528_v16 = vld [vmem:[%s10194_s2 + $0x16a] sm:$0xff] }
 0x3a7   :  { %v4111_v28 = vadd.f32 %v4110_v30, %v4109_v42  ;;  %v4021_v27 = vpop.f32.mrf.mxu2  ;;  %v9486_v33 = vpop.f32.mrf.mxu3 }
 0x3a8   :  { %v4061_v13 = vadd.f32 %v4021_v27, %v3916_v22  ;;  %v3734_v14 = vpop.f32.mrf.mxu0 }
 0x3a9   :  { %v3772_v49 = vadd.f32 %v3734_v14, %v9210_v62 }
 0x3aa   :  { %v4077_v61 = vadd.f32 %v9450_v35, %v4061_v13 }
 0x3ab   :  { %v3879_v10 = vpop.f32.mrf.mxu1  ;;  %6727 = vmatmul.msk.f32.gmra.mxu0 %vm93_vm1, %v9445_v19 }
 0x3ac   :  { %v4093_v55 = vmax.f32 %v4077_v61, 0.0  ;;  %6793 = vmatmul.msk.f32.gmra.mxu2 %vm93_vm1, %v9491_v60  ;;  %6826 = vmatmul.msk.f32.gmra.mxu3 %vm93_vm1, %v9233_v5  ;;  %v3917_v53 = vadd.f32 %v3879_v10, %v3772_v49  ;;  %v9519_v5 = vld [vmem:[%s10194_s2 + $0x181] sm:$0xff]  ;;  %v9547_v10 = vld [vmem:[%s10194_s2 + $0x189] sm:$0xff] }
 0x3ad   :  { %v9542_v49 = vld [vmem:[%s10194_s2 + $0x188] sm:$0xff] }
 0x3ae   :  { %v4112_v29 = vsel %vm1400_vm2, %v4093_v55, 0.0  ;;  %6760 = vmatmul.msk.f32.gmra.mxu1 %vm93_vm1, %v9500_v21 }
 0x3af   :  { %v4113_v62 = vadd.f32 %v4112_v29, %v4111_v28  ;;  %v4024_v20 = vpop.f32.mrf.mxu2  ;;  %v9509_v42 = vpop.f32.mrf.mxu3 }
 0x3b0   :  { %v4062_v63 = vadd.f32 %v4024_v20, %v3917_v53  ;;  %v3737_v54 = vpop.f32.mrf.mxu0 }
 0x3b1   :  { %v3773_v0 = vadd.f32 %v3737_v54, %v9236_v57 }
 0x3b2   :  { %v4078_v45 = vadd.f32 %v9450_v35, %v4062_v63 }
 0x3b3   :  { %v3882_v3 = vpop.f32.mrf.mxu1  ;;  %6728 = vmatmul.msk.f32.gmra.mxu0 %vm93_vm1, %v9468_v31 }
 0x3b4   :  { %v4094_v30 = vmax.f32 %v4078_v45, 0.0  ;;  %6794 = vmatmul.msk.f32.gmra.mxu2 %vm93_vm1, %v9514_v24  ;;  %6827 = vmatmul.msk.f32.gmra.mxu3 %vm93_vm1, %v9519_v5  ;;  %v3918_v28 = vadd.f32 %v3882_v3, %v3773_v0 }
 0x3b6   :  { %v4114_v22 = vsel %vm1400_vm2, %v4094_v30, 0.0  ;;  %6761 = vmatmul.msk.f32.gmra.mxu1 %vm93_vm1, %v9528_v16 }
 0x3b7   :  { %v4115_v57 = vadd.f32 %v4114_v22, %v4113_v62  ;;  %v4027_v27 = vpop.f32.mrf.mxu2  ;;  %v9537_v13 = vpop.f32.mrf.mxu3  ;;  %v9556_v62 = vld [vmem:[%s10194_s2 + $0x172] sm:$0xff] }
 0x3b8   :  { %v4063_v14 = vadd.f32 %v4027_v27, %v3918_v28  ;;  %v3740_v61 = vpop.f32.mrf.mxu0 }
 0x3b9   :  { %v3774_v29 = vadd.f32 %v3740_v61, %v9247_v1 }
 0x3ba   :  { %v4079_v55 = vadd.f32 %v9450_v35, %v4063_v14 }
 0x3bb   :  { %v3885_v53 = vpop.f32.mrf.mxu1  ;;  %6729 = vmatmul.msk.f32.gmra.mxu0 %vm93_vm1, %v9491_v60 }
 0x3bc   :  { %v4095_v20 = vmax.f32 %v4079_v55, 0.0  ;;  %6795 = vmatmul.msk.f32.gmra.mxu2 %vm93_vm1, %v9542_v49  ;;  %6828 = vmatmul.msk.f32.gmra.mxu3 %vm93_vm1, %v9547_v10  ;;  %v3919_v54 = vadd.f32 %v3885_v53, %v3774_v29 }
 0x3be   :  { %v4116_v63 = vsel %vm1400_vm2, %v4095_v20, 0.0  ;;  %6762 = vmatmul.msk.f32.gmra.mxu1 %vm93_vm1, %v9556_v62 }
 0x3bf   :  { %v4117_v1 = vadd.f32 %v4116_v63, %v4115_v57  ;;  %v4030_v45 = vpop.f32.mrf.mxu2  ;;  %v9565_v0 = vpop.f32.mrf.mxu3 }
 0x3c0   :  { %v4064_v3 = vadd.f32 %v4030_v45, %v3919_v54  ;;  %v3743_v30 = vpop.f32.mrf.mxu0 }
 0x3c1   :  { %v3775_v28 = vadd.f32 %v3743_v30, %v9260_v37 }
 0x3c2   :  { %v4080_v22 = vadd.f32 %v9450_v35, %v4064_v3 }
 0x3c3   :  { %v3888_v27 = vpop.f32.mrf.mxu1  ;;  %6730 = vmatmul.msk.f32.gmra.mxu0 %vm93_vm1, %v9048_v2 }
 0x3c4   :  { %v4096_v14 = vmax.f32 %v4080_v22, 0.0  ;;  %6796 = vmatmul.msk.f32.gmra.mxu2 %vm93_vm1, %v9349_v4  ;;  %6829 = vmatmul.msk.f32.gmra.mxu3 %vm93_vm1, %v9275_v41  ;;  %v3920_v61 = vadd.f32 %v3888_v27, %v3775_v28  ;;  %v5504_v28 = vlaneseq  ;;  %v5513_v27 = vsel %vm5512_vm3, %v9319_v39, 1 }
 0x3c5   :  { %vm5514_vm4 = vcmp.lt.s32.totalorder %v5513_v27, 8 }
 0x3c6   :  { %v4118_v57 = vsel %vm1400_vm2, %v4096_v14, 0.0  ;;  %6763 = vmatmul.msk.f32.gmra.mxu1 %vm93_vm1, %v9040_v43  ;;  %v5505_v39 = vand.u32 127, %v5504_v28 }
 0x3c7   :  { %v4119_v55 = vadd.f32 %v4118_v57, %v4117_v1  ;;  %v4033_v29 = vpop.f32.mrf.mxu2  ;;  %v9578_v37 = vpop.f32.mrf.mxu3 }
 0x3c8   :  { %v4065_v53 = vadd.f32 %v4033_v29, %v3920_v61  ;;  %v3746_v20 = vpop.f32.mrf.mxu0 }
 0x3c9   :  { %v4120_v2 = vrot.slane %v4119_v55, 4  ;;  %v3776_v63 = vadd.f32 %v3746_v20, %v9278_v58 }
 0x3ca   :  { %v4081_v41 = vadd.f32 %v9450_v35, %v4065_v53 }
 0x3cb   :  { %v4121_v54 = vadd.f32 %v4120_v2, %v4119_v55  ;;  %v3891_v45 = vpop.f32.mrf.mxu1  ;;  %6731 = vmatmul.msk.f32.gmra.mxu0 %vm93_vm1, %v9077_v52  ;;  %v5521_v55 = vshrl.u32 %v5504_v28, 7 }
 0x3cc   :  { %6797 = vmatmul.msk.f32.gmra.mxu2 %vm93_vm1, %v9375_v38  ;;  %6830 = vmatmul.msk.f32.gmra.mxu3 %vm93_vm1, %v9293_v44  ;;  %v3921_v1 = vadd.f32 %v3891_v45, %v3776_v63  ;;  %v4097_v14 = vmax.f32 %v4081_v41, 0.0  ;;  %v9597_v44 = vld [vmem:[%s10194_s2 + $0x300] sm:$0xff] }
 0x3cd   :  { %v4122_v43 = vrot.slane %v4121_v54, 2  ;;  %6981 = vset.pattern.permute.xlu1 %v5521_v55 }
 0x3ce   :  { %6764 = vmatmul.msk.f32.gmra.mxu1 %vm93_vm1, %v9068_v17  ;;  %v4126_v2 = vsel %vm1400_vm2, %v4097_v14, 0.0  ;;  %v9620_v14 = vld [vmem:[%s10194_s2 + $0x308] sm:$0xff] }
 0x3cf   :  { %v4123_v58 = vadd.f32 %v4122_v43, %v4121_v54  ;;  %v4036_v3 = vpop.f32.mrf.mxu2  ;;  %v9591_v30 = vpop.f32.mrf.mxu3 }
 0x3d0   :  { %v4066_v52 = vadd.f32 %v4036_v3, %v3921_v1  ;;  %v3749_v22 = vpop.f32.mrf.mxu0  ;;  %v5508_v63 = vpop.permute.xlu0 %5507 }
 0x3d1   :  { %v4124_v57 = vrot.slane %v4123_v58, 1  ;;  %v3777_v17 = vadd.f32 %v3749_v22, %v9296_v11  ;;  %vm5509_vm5 = vcmp.lt.s32.totalorder %v5505_v39, %v5508_v63  ;;  %v9638_v63 = vld [vmem:[%s10194_s2 + $0x318] sm:$0xff] }
 0x3d2   :  { %v4082_v61 = vadd.f32 %v9450_v35, %v4066_v52 }
 0x3d3   :  { %v3894_v29 = vpop.f32.mrf.mxu1  ;;  %6732 = vmatmul.msk.f32.gmra.mxu0 %vm93_vm1, %v9349_v4  ;;  %v4125_v53 = vadd.f32 %v4124_v57, %v4123_v58  ;;  %v5515_v58 = vsel %vm5514_vm4, %v5513_v27, 8 }
 0x3d4   :  { %v4098_v20 = vmax.f32 %v4082_v61, 0.0  ;;  %6798 = vmatmul.msk.f32.gmra.mxu2 %vm93_vm1, %v9597_v44  ;;  %6831 = vmatmul.msk.f32.gmra.mxu3 %vm93_vm1, %v9311_v47  ;;  %v3922_v4 = vadd.f32 %v3894_v29, %v3777_v17  ;;  %v7047_v47 = vmov 0.0   ;;  %v5516_v28 = vcvt.s32.f32 %v5515_v58 }
 0x3d5   :  { %v9609_v11 = vadd.f32 %v4125_v53, %v8962_v25  ;;  %v6969_v1 = vsel %vm5509_vm5, 1.0, %v7047_v47  ;;  %vm5737_vm5 = vcmask 517120  }
 0x3d6   :  { %v4127_v54 = vsel %vm1400_vm2, %v4098_v20, 0.0  ;;  %6765 = vmatmul.msk.f32.gmra.mxu1 %vm93_vm1, %v9354_v12  ;;  %v5519_v22 = vperm.slane %v6969_v1, 0  ;;  %v5526_v25 = vperm.slane %v6969_v1, 1  ;;  %5551 = vperm.xlu0 %6980, %v5516_v28  }
 0x3d7   :  { %v4128_v45 = vadd.f32 %v4127_v54, %v4126_v2  ;;  %v4039_v43 = vpop.f32.mrf.mxu2  ;;  %v9614_v41 = vpop.f32.mrf.mxu3 }
 0x3d8   :  { %v4067_v3 = vadd.f32 %v4039_v43, %v3922_v4  ;;  %v3752_v52 = vpop.f32.mrf.mxu0  ;;  %v6982_v17 = vpack.i.bf16 %v5519_v22, %v5526_v25  ;;  %v9661_v25 = vld [vmem:[%s10194_s2 + $0x320] sm:$0xff] }
 0x3d9   :  { %v3778_v61 = vadd.f32 %v3752_v52, %v9314_v56 }
 0x3da   :  { %v4083_v57 = vadd.f32 %v9450_v35, %v4067_v3  ;;  %6983 = vperm.xlu1 %6981, %v6982_v17  }
 0x3db   :  { %v3897_v55 = vpop.f32.mrf.mxu1  ;;  %6733 = vmatmul.msk.f32.gmra.mxu0 %vm93_vm1, %v9375_v38 }
 0x3dc   :  { %v4099_v27 = vmax.f32 %v4083_v57, 0.0  ;;  %6799 = vmatmul.msk.f32.gmra.mxu2 %vm93_vm1, %v9620_v14  ;;  %6832 = vmatmul.msk.f32.gmra.mxu3 %vm93_vm1, %v9333_v46  ;;  %v3923_v53 = vadd.f32 %v3897_v55, %v3778_v61  ;;  %v9670_v61 = vld [vmem:[%s10194_s2 + $0x30a] sm:$0xff] }
 0x3de   :  { %v4129_v29 = vsel %vm1400_vm2, %v4099_v27, 0.0  ;;  %6766 = vmatmul.msk.f32.gmra.mxu1 %vm93_vm1, %v9380_v7 }
 0x3df   :  { %v4130_v56 = vadd.f32 %v4129_v29, %v4128_v45  ;;  %v4042_v20 = vpop.f32.mrf.mxu2  ;;  %v9633_v39 = vpop.f32.mrf.mxu3  ;;  %v9647_v45 = vld [vmem:[%s10194_s2 + $0x302] sm:$0xff] }
 0x3e0   :  { %v4068_v2 = vadd.f32 %v4042_v20, %v3923_v53  ;;  %v3755_v38 = vpop.f32.mrf.mxu0 }
 0x3e1   :  { %v3779_v54 = vadd.f32 %v3755_v38, %v9336_v26 }
 0x3e2   :  { %v4084_v46 = vadd.f32 %v9450_v35, %v4068_v2  ;;  %v9684_v2 = vld [vmem:[%s10194_s2 + $0x330] sm:$0xff] }
 0x3e3   :  { %v3900_v4 = vpop.f32.mrf.mxu1  ;;  %6734 = vmatmul.msk.f32.gmra.mxu0 %vm93_vm1, %v9597_v44 }
 0x3e4   :  { %v4100_v43 = vmax.f32 %v4084_v46, 0.0  ;;  %6800 = vmatmul.msk.f32.gmra.mxu2 %vm93_vm1, %v9638_v63  ;;  %6833 = vmatmul.msk.f32.gmra.mxu3 %vm93_vm1, %v9359_v36  ;;  %v3924_v1 = vadd.f32 %v3900_v4, %v3779_v54  ;;  %v9698_v4 = vld [vmem:[%s10194_s2 + $0x31a] sm:$0xff] }
 0x3e6   :  { %v4131_v47 = vsel %vm1400_vm2, %v4100_v43, 0.0  ;;  %6767 = vmatmul.msk.f32.gmra.mxu1 %vm93_vm1, %v9647_v45 }
 0x3e7   :  { %v4132_v26 = vadd.f32 %v4131_v47, %v4130_v56  ;;  %v4045_v58 = vpop.f32.mrf.mxu2  ;;  %v9656_v3 = vpop.f32.mrf.mxu3 }
 0x3e8   :  { %v4069_v52 = vadd.f32 %v4045_v58, %v3924_v1  ;;  %v3758_v22 = vpop.f32.mrf.mxu0 }
 0x3e9   :  { %v3780_v36 = vadd.f32 %v3758_v22, %v9362_v9 }
 0x3ea   :  { %v4085_v28 = vadd.f32 %v9450_v35, %v4069_v52 }
 0x3eb   :  { %v3903_v57 = vpop.f32.mrf.mxu1  ;;  %6735 = vmatmul.msk.f32.gmra.mxu0 %vm93_vm1, %v9620_v14 }
 0x3ec   :  { %v4101_v17 = vmax.f32 %v4085_v28, 0.0  ;;  %6801 = vmatmul.msk.f32.gmra.mxu2 %vm93_vm1, %v9661_v25  ;;  %6834 = vmatmul.msk.f32.gmra.mxu3 %vm93_vm1, %v9385_v50  ;;  %v3925_v27 = vadd.f32 %v3903_v57, %v3780_v36  ;;  %v9689_v50 = vld [vmem:[%s10194_s2 + $0x331] sm:$0xff]  ;;  %v9717_v36 = vld [vmem:[%s10194_s2 + $0x339] sm:$0xff] }
 0x3ed   :  { %v9712_v28 = vld [vmem:[%s10194_s2 + $0x338] sm:$0xff] }
 0x3ee   :  { %v4133_v55 = vsel %vm1400_vm2, %v4101_v17, 0.0  ;;  %6768 = vmatmul.msk.f32.gmra.mxu1 %vm93_vm1, %v9670_v61 }
 0x3ef   :  { %v4134_v9 = vadd.f32 %v4133_v55, %v4132_v26  ;;  %v4048_v29 = vpop.f32.mrf.mxu2  ;;  %v9679_v53 = vpop.f32.mrf.mxu3 }
 0x3f0   :  { %v4070_v56 = vadd.f32 %v4048_v29, %v3925_v27  ;;  %v3761_v20 = vpop.f32.mrf.mxu0  ;;  %v9726_v27 = vld [vmem:[%s10194_s2 + $0x322] sm:$0xff] }
 0x3f1   :  { %v3781_v46 = vadd.f32 %v3761_v20, %v9388_v6 }
 0x3f2   :  { %v4086_v38 = vadd.f32 %v9450_v35, %v4070_v56 }
 0x3f3   :  { %v3906_v54 = vpop.f32.mrf.mxu1  ;;  %6736 = vmatmul.msk.f32.gmra.mxu0 %vm93_vm1, %v9638_v63 }
 0x3f4   :  { %v4102_v43 = vmax.f32 %v4086_v38, 0.0  ;;  %6802 = vmatmul.msk.f32.gmra.mxu2 %vm93_vm1, %v9684_v2  ;;  %6835 = vmatmul.msk.f32.gmra.mxu3 %vm93_vm1, %v9689_v50  ;;  %v3926_v1 = vadd.f32 %v3906_v54, %v3781_v46 }
 0x3f6   :  { %v4135_v47 = vsel %vm1400_vm2, %v4102_v43, 0.0  ;;  %6769 = vmatmul.msk.f32.gmra.mxu1 %vm93_vm1, %v9698_v4  ;;  %v6903_v43 = vld [vmem:[%s10194_s2 + $0x151] sm:$0xff] }
 0x3f7   :  { %v4136_v6 = vadd.f32 %v4135_v47, %v4134_v9  ;;  %v4051_v26 = vpop.f32.mrf.mxu2  ;;  %v9707_v58 = vpop.f32.mrf.mxu3 }
 0x3f8   :  { %v4071_v52 = vadd.f32 %v4051_v26, %v3926_v1  ;;  %v3764_v22 = vpop.f32.mrf.mxu0 }
 0x3f9   :  { %v3782_v17 = vadd.f32 %v3764_v22, %v9398_v23 }
 0x3fa   :  { %v4087_v57 = vadd.f32 %v9450_v35, %v4071_v52 }
 0x3fb   :  { %v3909_v55 = vpop.f32.mrf.mxu1  ;;  %6737 = vmatmul.msk.f32.gmra.mxu0 %vm93_vm1, %v9661_v25 }
 0x3fc   :  { %v4103_v9 = vmax.f32 %v4087_v57, 0.0  ;;  %6803 = vmatmul.msk.f32.gmra.mxu2 %vm93_vm1, %v9712_v28  ;;  %6836 = vmatmul.msk.f32.gmra.mxu3 %vm93_vm1, %v9717_v36  ;;  %v3927_v56 = vadd.f32 %v3909_v55, %v3782_v17 }
 0x3fe   :  { %v4137_v29 = vsel %vm1400_vm2, %v4103_v9, 0.0  ;;  %6770 = vmatmul.msk.f32.gmra.mxu1 %vm93_vm1, %v9726_v27 }
 0x3ff   :  { %v4138_v23 = vadd.f32 %v4137_v29, %v4136_v6  ;;  %v4054_v20 = vpop.f32.mrf.mxu2  ;;  %v9735_v38 = vpop.f32.mrf.mxu3 }
 0x400   :  { %v4072_v46 = vadd.f32 %v4054_v20, %v3927_v56  ;;  %v4360_v54 = vpop.f32.mrf.mxu0 }
 0x401   :  { %v4361_v1 = vadd.f32 %v4360_v54, %v9409_v40 }
 0x402   :  { %v4088_v47 = vadd.f32 %v9450_v35, %v4072_v46 }
 0x403   :  { %v4489_v26 = vpop.f32.mrf.mxu1  ;;  %6854 = vmatmul.msk.f32.vlgmr.msra.gmra.mxu0 %vm93_vm1, %v9202_v18  ;;  %v6904_v18 = vld [vmem:[%s10194_s2 + $0x159] sm:$0xff] }
 0x404   :  { %v4104_v52 = vmax.f32 %v4088_v47, 0.0  ;;  %6920 = vmatmul.msk.f32.vlgmr.msra.gmra.mxu2 %vm93_vm1, %v6903_v43  ;;  %6953 = vmatmul.msk.f32.vlgmr.msra.gmra.mxu3 %vm93_vm1, %v9477_v48  ;;  %v4537_v22 = vadd.f32 %v4489_v26, %v4361_v1  ;;  %v6905_v26 = vld [vmem:[%s10194_s2 + $0x169] sm:$0xff] }
 0x406   :  { %v4139_v6 = vsel %vm1400_vm2, %v4104_v52, 0.0  ;;  %6887 = vmatmul.msk.f32.vlgmr.msra.gmra.mxu1 %vm93_vm1, %v9426_v32 }
 0x407   :  { %v4140_v57 = vadd.f32 %v4139_v6, %v4138_v23  ;;  %v4635_v35 = vpop.f32.mrf.mxu2  ;;  %v4780_v17 = vpop.f32.mrf.mxu3 }
 0x408   :  { %v4683_v40 = vadd.f32 %v4635_v35, %v4537_v22  ;;  %v4363_v55 = vpop.f32.mrf.mxu0 }
 0x409   :  { %v4141_v9 = vrot.slane %v4140_v57, 4  ;;  %v4364_v29 = vadd.f32 %v4363_v55, %v9421_v15 }
 0x40a   :  { %v9754_v56 = vadd.f32 %v4780_v17, %v4683_v40 }
 0x40b   :  { %v4142_v20 = vadd.f32 %v4141_v9, %v4140_v57  ;;  %v4492_v46 = vpop.f32.mrf.mxu1  ;;  %6855 = vmatmul.msk.f32.gmra.mxu0 %vm93_vm1, %v9228_v34 }
 0x40c   :  { %6921 = vmatmul.msk.f32.gmra.mxu2 %vm93_vm1, %v6904_v18  ;;  %6954 = vmatmul.msk.f32.gmra.mxu3 %vm93_vm1, %v9500_v21  ;;  %v4538_v23 = vadd.f32 %v4492_v46, %v4364_v29 }
 0x40d   :  { %v4143_v32 = vrot.slane %v4142_v20, 2 }
 0x40e   :  { %6888 = vmatmul.msk.f32.gmra.mxu1 %vm93_vm1, %v9445_v19 }
 0x40f   :  { %v4144_v54 = vadd.f32 %v4143_v32, %v4142_v20  ;;  %v4638_v43 = vpop.f32.mrf.mxu2  ;;  %v4783_v15 = vpop.f32.mrf.mxu3 }
 0x410   :  { %v4684_v47 = vadd.f32 %v4638_v43, %v4538_v23  ;;  %v4366_v1 = vpop.f32.mrf.mxu0 }
 0x411   :  { %v4145_v34 = vrot.slane %v4144_v54, 1  ;;  %v4367_v52 = vadd.f32 %v4366_v1, %v9440_v51 }
 0x412   :  { %v9767_v6 = vadd.f32 %v4783_v15, %v4684_v47 }
 0x413   :  { %v4495_v22 = vpop.f32.mrf.mxu1  ;;  %6856 = vmatmul.msk.f32.gmra.mxu0 %vm93_vm1, %v9477_v48  ;;  %v4146_v57 = vadd.f32 %v4145_v34, %v4144_v54  ;;  %v6906_v48 = vld [vmem:[%s10194_s2 + $0x171] sm:$0xff] }
 0x414   :  { %6922 = vmatmul.msk.f32.gmra.mxu2 %vm93_vm1, %v6905_v26  ;;  %6955 = vmatmul.msk.f32.gmra.mxu3 %vm93_vm1, %v9528_v16  ;;  %v4539_v35 = vadd.f32 %v4495_v22, %v4367_v52 }
 0x415   :  { %v9775_v19 = vadd.f32 %v4146_v57, %v9129_v59 }
 0x416   :  { %6889 = vmatmul.msk.f32.gmra.mxu1 %vm93_vm1, %v9468_v31 }
 0x417   :  { %v4641_v51 = vpop.f32.mrf.mxu2  ;;  %v4786_v17 = vpop.f32.mrf.mxu3 }
 0x418   :  { %v4685_v40 = vadd.f32 %v4641_v51, %v4539_v35  ;;  %v4369_v55 = vpop.f32.mrf.mxu0 }
 0x419   :  { %v4370_v9 = vadd.f32 %v4369_v55, %v9463_v8  ;;  %v6940_v8 = vld [vmem:[%s10194_s2 + $0x182] sm:$0xff] }
 0x41a   :  { %v9783_v18 = vadd.f32 %v4786_v17, %v4685_v40 }
 0x41b   :  { %v4498_v29 = vpop.f32.mrf.mxu1  ;;  %6857 = vmatmul.msk.f32.gmra.mxu0 %vm93_vm1, %v9500_v21 }
 0x41c   :  { %6923 = vmatmul.msk.f32.gmra.mxu2 %vm93_vm1, %v6906_v48  ;;  %6956 = vmatmul.msk.f32.gmra.mxu3 %vm93_vm1, %v9556_v62  ;;  %v4540_v59 = vadd.f32 %v4498_v29, %v4370_v9  ;;  %v6910_v9 = vld [vmem:[%s10194_s2 + $0x1a1] sm:$0xff] }
 0x41d   :  { %v6943_v29 = vld [vmem:[%s10194_s2 + $0x1a2] sm:$0xff] }
 0x41e   :  { %6890 = vmatmul.msk.f32.gmra.mxu1 %vm93_vm1, %v9491_v60 }
 0x41f   :  { %v4644_v31 = vpop.f32.mrf.mxu2  ;;  %v4789_v20 = vpop.f32.mrf.mxu3 }
 0x420   :  { %v4686_v46 = vadd.f32 %v4644_v31, %v4540_v59  ;;  %v4372_v32 = vpop.f32.mrf.mxu0 }
 0x421   :  { %v4373_v23 = vadd.f32 %v4372_v32, %v9486_v33  ;;  %v6941_v33 = vld [vmem:[%s10194_s2 + $0x18a] sm:$0xff] }
 0x422   :  { %v9796_v21 = vadd.f32 %v4789_v20, %v4686_v46  ;;  %v6877_v46 = vld [vmem:[%s10194_s2 + $0x1a0] sm:$0xff] }
 0x423   :  { %v4501_v54 = vpop.f32.mrf.mxu1  ;;  %6858 = vmatmul.msk.f32.gmra.mxu0 %vm93_vm1, %v9528_v16 }
 0x424   :  { %6924 = vmatmul.msk.f32.gmra.mxu2 %vm93_vm1, %v9519_v5  ;;  %6957 = vmatmul.msk.f32.gmra.mxu3 %vm93_vm1, %v6940_v8  ;;  %v4541_v60 = vadd.f32 %v4501_v54, %v4373_v23 }
 0x426   :  { %6891 = vmatmul.msk.f32.gmra.mxu1 %vm93_vm1, %v9514_v24 }
 0x427   :  { %v4647_v43 = vpop.f32.mrf.mxu2  ;;  %v4792_v15 = vpop.f32.mrf.mxu3 }
 0x428   :  { %v4687_v47 = vadd.f32 %v4647_v43, %v4541_v60  ;;  %v4375_v1 = vpop.f32.mrf.mxu0  ;;  %v6911_v60 = vld [vmem:[%s10194_s2 + $0x301] sm:$0xff] }
 0x429   :  { %v4376_v26 = vadd.f32 %v4375_v1, %v9509_v42  ;;  %v6909_v42 = vld [vmem:[%s10194_s2 + $0x199] sm:$0xff] }
 0x42a   :  { %v9809_v16 = vadd.f32 %v4792_v15, %v4687_v47 }
 0x42b   :  { %v4504_v34 = vpop.f32.mrf.mxu1  ;;  %6859 = vmatmul.msk.f32.gmra.mxu0 %vm93_vm1, %v9556_v62  ;;  %v6942_v62 = vld [vmem:[%s10194_s2 + $0x19a] sm:$0xff] }
 0x42c   :  { %6925 = vmatmul.msk.f32.gmra.mxu2 %vm93_vm1, %v9547_v10  ;;  %6958 = vmatmul.msk.f32.gmra.mxu3 %vm93_vm1, %v6941_v33  ;;  %v4542_v24 = vadd.f32 %v4504_v34, %v4376_v26  ;;  %v6912_v34 = vld [vmem:[%s10194_s2 + $0x309] sm:$0xff] }
 0x42e   :  { %6892 = vmatmul.msk.f32.gmra.mxu1 %vm93_vm1, %v9542_v49  ;;  %v6876_v49 = vld [vmem:[%s10194_s2 + $0x198] sm:$0xff] }
 0x42f   :  { %v4650_v5 = vpop.f32.mrf.mxu2  ;;  %v4795_v52 = vpop.f32.mrf.mxu3 }
 0x430   :  { %v4688_v22 = vadd.f32 %v4650_v5, %v4542_v24  ;;  %v4378_v57 = vpop.f32.mrf.mxu0 }
 0x431   :  { %v4379_v10 = vadd.f32 %v4378_v57, %v9537_v13  ;;  %v6913_v57 = vld [vmem:[%s10194_s2 + $0x319] sm:$0xff] }
 0x432   :  { %v9825_v35 = vadd.f32 %v4795_v52, %v4688_v22 }
 0x433   :  { %v4507_v51 = vpop.f32.mrf.mxu1  ;;  %6860 = vmatmul.msk.f32.gmra.mxu0 %vm93_vm1, %v6940_v8 }
 0x434   :  { %6926 = vmatmul.msk.f32.gmra.mxu2 %vm93_vm1, %v6909_v42  ;;  %6959 = vmatmul.msk.f32.gmra.mxu3 %vm93_vm1, %v6942_v62  ;;  %v4543_v17 = vadd.f32 %v4507_v51, %v4379_v10 }
 0x436   :  { %6893 = vmatmul.msk.f32.gmra.mxu1 %vm93_vm1, %v6876_v49  ;;  %v5518_v49 = vld [vmem:[%s10193_s1 + $0x8] sm:$0xff] }
 0x437   :  { %v4653_v40 = vpop.f32.mrf.mxu2  ;;  %v4798_v55 = vpop.f32.mrf.mxu3 }
 0x438   :  { %v4689_v48 = vadd.f32 %v4653_v40, %v4543_v17  ;;  %v4381_v13 = vpop.f32.mrf.mxu0 }
 0x439   :  { %v4382_v59 = vadd.f32 %v4381_v13, %v9565_v0  ;;  %v6914_v13 = vld [vmem:[%s10194_s2 + $0x321] sm:$0xff] }
 0x43a   :  { %v9841_v31 = vadd.f32 %v4798_v55, %v4689_v48 }
 0x43b   :  { %v4510_v20 = vpop.f32.mrf.mxu1  ;;  %6861 = vmatmul.msk.f32.gmra.mxu0 %vm93_vm1, %v6941_v33 }
 0x43c   :  { %6927 = vmatmul.msk.f32.gmra.mxu2 %vm93_vm1, %v6910_v9  ;;  %6960 = vmatmul.msk.f32.gmra.mxu3 %vm93_vm1, %v6943_v29  ;;  %v4544_v32 = vadd.f32 %v4510_v20, %v4382_v59 }
 0x43e   :  { %6894 = vmatmul.msk.f32.gmra.mxu1 %vm93_vm1, %v6877_v46 }
 0x43f   :  { %v4656_v8 = vpop.f32.mrf.mxu2  ;;  %v4801_v23 = vpop.f32.mrf.mxu3 }
 0x440   :  { %v4690_v54 = vadd.f32 %v4656_v8, %v4544_v32  ;;  %v9850_v0 = vpop.f32.mrf.mxu0  ;;  %v5589_v8 = vld [vmem:[%s10197_s5 + $0x18] sm:$0xff] }
 0x441   :  { %5613 = vmatpush.msrb.mxu0 %v5589_v8 }
 0x442   :  { %v9855_v43 = vadd.f32 %v4801_v23, %v4690_v54 }
 0x443   :  { %v9857_v15 = vpop.f32.mrf.mxu1  ;;  %6862 = vmatmul.msk.f32.gmra.mxu0 %vm93_vm1, %v9354_v12 }
 0x444   :  { %6928 = vmatmul.msk.f32.gmra.mxu2 %vm93_vm1, %v6911_v60  ;;  %6961 = vmatmul.msk.f32.gmra.mxu3 %vm93_vm1, %v9647_v45  ;;  %v5588_v60 = vld [vmem:[%s10197_s5 + $0x10] sm:$0xff] }
 0x445   :  { %5614 = vmatpush.msrb.mxu0 %v5588_v60 }
 0x446   :  { %6895 = vmatmul.msk.f32.gmra.mxu1 %vm93_vm1, %v9597_v44 }
 0x447   :  { %v9866_v47 = vpop.f32.mrf.mxu2  ;;  %v9868_v1 = vpop.f32.mrf.mxu3 }
 0x448   :  { %v4387_v33 = vpop.f32.mrf.mxu0  ;;  %v9887_v42 = vpop.permute.xlu0 %5551 }
 0x449   :  { %v4388_v26 = vadd.f32 %v4387_v33, %v9591_v30  ;;  %vm5561_vm8 = vweird.f32 %v9887_v42 }
 0x44b   :  { %v4516_v12 = vpop.f32.mrf.mxu1  ;;  %6863 = vmatmul.msk.f32.gmra.mxu0 %vm93_vm1, %v9380_v7 }
 0x44c   :  { %v4546_v24 = vadd.f32 %v4516_v12, %v4388_v26  ;;  %6929 = vmatmul.msk.f32.gmra.mxu2 %vm93_vm1, %v6912_v34  ;;  %6962 = vmatmul.msk.f32.gmra.mxu3 %vm93_vm1, %v9670_v61  ;;  %v6984_v62 = vpop.permute.xlu1 %6983 }
 0x44d   :  { %v6985_v51 = vunpack.i.l.bf16 %v6984_v62  ;;  %v6986_v9 = vunpack.i.h.bf16 %v6984_v62 }
 0x44e   :  { %6896 = vmatmul.msk.f32.gmra.mxu1 %vm93_vm1, %v9620_v14 }
 0x44f   :  { %v4662_v44 = vpop.f32.mrf.mxu2  ;;  %v4807_v5 = vpop.f32.mrf.mxu3  ;;  %v5534_v29 = vmul.f32 %v6985_v51, %v5518_v49 }
 0x450   :  { %v4692_v30 = vadd.f32 %v4662_v44, %v4546_v24  ;;  %v4390_v52 = vpop.f32.mrf.mxu0  ;;  %v9933_v24 = vld [vmem:[%s10194_s2 + $0x332] sm:$0xff]  ;;  %v5587_v44 = vld [vmem:[%s10197_s5 + $0x8] sm:$0xff] }
 0x451   :  { %v4391_v22 = vadd.f32 %v4390_v52, %v9614_v41  ;;  %v9895_v41 = vrot.slane %v9887_v42, 1  ;;  %v5542_v32 = vsel %vm1400_vm2, %v5534_v29, 0.0  ;;  %5615 = vmatpush.msrb.mxu0 %v5587_v44  ;;  %v6950_v44 = vld [vmem:[%s10194_s2 + $0x34a] sm:$0xff] }
 0x452   :  { %v9885_v7 = vadd.f32 %v4807_v5, %v4692_v30  ;;  %v5543_v34 = vrot.slane %v5542_v32, 4 }
 0x453   :  { %v4519_v10 = vpop.f32.mrf.mxu1  ;;  %6864 = vmatmul.msk.f32.gmra.mxu0 %vm93_vm1, %v9647_v45  ;;  %6994 = vrcp.f32 %v9895_v41  ;;  %vm5576_vm6 = vweird.f32 %v9895_v41 }
 0x454   :  { %v4547_v14 = vadd.f32 %v4519_v10, %v4391_v22  ;;  %6930 = vmatmul.msk.f32.gmra.mxu2 %vm93_vm1, %v6913_v57  ;;  %6963 = vmatmul.msk.f32.gmra.mxu3 %vm93_vm1, %v9698_v4  ;;  %6996 = vrcp.f32 %v9887_v42  ;;  %v5586_v22 = vld [vmem:[%s10197_s5] sm:$0xff]  ;;  %v5544_v10 = vadd.f32 %v5543_v34, %v5542_v32  ;;  %v5565_v34 = vand.u32 2147483647, %v9887_v42  ;;  %s5818_s5 = sshll.u32 %s7051_s29, 4  ;;  %s5819_s5 = int_to_ptr.vmem [resolvable:$true] %s5818_s5 }
 0x455   :  { %5616 = vmatpush.msrb.mxu0 %v5586_v22 }
 0x456   :  { %6897 = vmatmul.msk.f32.gmra.mxu1 %vm93_vm1, %v9638_v63  ;;  %v5517_v63 = vld [vmem:[%s10193_s1] sm:$0xff]  ;;  %vm5566_vm13 = vcmp.eq.f32.partialorder %v5565_v34, 8.507059e+37  ;;  %s7048_s1 = smov 32  }
 0x457   :  { %v4665_v17 = vpop.f32.mrf.mxu2  ;;  %v4810_v40 = vpop.f32.mrf.mxu3 }
 0x458   :  { %v4693_v45 = vadd.f32 %v4665_v17, %v4547_v14  ;;  %v4393_v55 = vpop.f32.mrf.mxu0 }
 0x459   :  { %v4394_v48 = vadd.f32 %v4393_v55, %v9633_v39  ;;  %v5533_v39 = vmul.f32 %v6986_v9, %v5517_v63  ;;  %v5545_v55 = vrot.slane %v5544_v10, 2 }
 0x45a   :  { %v9907_v59 = vadd.f32 %v4810_v40, %v4693_v45 }
 0x45b   :  { %v4522_v20 = vpop.f32.mrf.mxu1  ;;  %6865 = vmatmul.msk.f32.gmra.mxu0 %vm93_vm1, %v9670_v61  ;;  %v9924_v61 = vpop.eup %6994 }
 0x45c   :  { %v4548_v46 = vadd.f32 %v4522_v20, %v4394_v48  ;;  %6931 = vmatmul.msk.f32.gmra.mxu2 %vm93_vm1, %v6914_v13  ;;  %6964 = vmatmul.msk.f32.gmra.mxu3 %vm93_vm1, %v9726_v27  ;;  %v5572_v30 = vmul.f32 %v9924_v61, %v9895_v41  ;;  %v9943_v52 = vpop.eup %6996  ;;  %v9962_v48 = vld [vmem:[%s10194_s2 + $0x33a] sm:$0xff]  ;;  %v5546_v20 = vadd.f32 %v5545_v55, %v5544_v10  ;;  %vm5577_vm7 = vweird.f32 %v9924_v61 }
 0x45d   :  { %vm9982_vm9 = vmor %vm5576_vm6, %vm5577_vm7  ;;  %vm5562_vm10 = vweird.f32 %v9943_v52 }
 0x45e   :  { %6898 = vmatmul.msk.f32.gmra.mxu1 %vm93_vm1, %v9661_v25  ;;  %v5535_v25 = vsel %vm1400_vm2, %v5533_v39, 0.0  ;;  %v5573_v14 = vsub.f32 1.0, %v5572_v30  ;;  %v5547_v60 = vrot.slane %v5546_v20, 1  ;;  %vm10006_vm12 = vmor %vm5561_vm8, %vm5562_vm10 }
 0x45f   :  { %v4668_v23 = vpop.f32.mrf.mxu2  ;;  %v4813_v54 = vpop.f32.mrf.mxu3  ;;  %v5536_v62 = vrot.slane %v5535_v25, 4 }
 0x460   :  { %v4694_v33 = vadd.f32 %v4668_v23, %v4548_v46  ;;  %v4396_v26 = vpop.f32.mrf.mxu0  ;;  %v5574_v9 = vmul.f32 %v9924_v61, %v5573_v14  ;;  %v5582_v46 = vand.u32 2147483648, %v9895_v41  ;;  %v5548_v10 = vadd.f32 %v5547_v60, %v5546_v20 }
 0x461   :  { %v4397_v12 = vadd.f32 %v4396_v26, %v9656_v3  ;;  %v5537_v45 = vadd.f32 %v5536_v62, %v5535_v25  ;;  %v6917_v25 = vld [vmem:[%s10194_s2 + $0x349] sm:$0xff] }
 0x462   :  { %v9939_v5 = vadd.f32 %v4813_v54, %v4694_v33  ;;  %v5575_v32 = vadd.f32 %v9924_v61, %v5574_v9  ;;  %v6884_v62 = vld [vmem:[%s10194_s2 + $0x348] sm:$0xff]  ;;  %v6918_v9 = vld [vmem:[%s10194_s2 + $0x351] sm:$0xff] }
 0x463   :  { %v4525_v3 = vpop.f32.mrf.mxu1  ;;  %6866 = vmatmul.msk.f32.gmra.mxu0 %vm93_vm1, %v9698_v4  ;;  %v5557_v4 = vmul.f32 %v9943_v52, %v9887_v42 }
 0x464   :  { %v4549_v57 = vadd.f32 %v4525_v3, %v4397_v12  ;;  %6932 = vmatmul.msk.f32.gmra.mxu2 %vm93_vm1, %v9689_v50  ;;  %6965 = vmatmul.msk.f32.gmra.mxu3 %vm93_vm1, %v9933_v24  ;;  %v5583_v12 = vor.u32 1.1754944e-38, %v5582_v46  ;;  %v5579_v3 = vsel %vm9982_vm9, %v9924_v61, %v5575_v32 }
 0x466   :  { %6899 = vmatmul.msk.f32.gmra.mxu1 %vm93_vm1, %v9684_v2  ;;  %v5558_v2 = vsub.f32 1.0, %v5557_v4 }
 0x467   :  { %v4671_v51 = vpop.f32.mrf.mxu2  ;;  %v4816_v49 = vpop.f32.mrf.mxu3 }
 0x468   :  { %v4695_v17 = vadd.f32 %v4671_v51, %v4549_v57  ;;  %v4399_v40 = vpop.f32.mrf.mxu0  ;;  %v5559_v39 = vmul.f32 %v9943_v52, %v5558_v2 }
 0x469   :  { %v4400_v50 = vadd.f32 %v4399_v40, %v9679_v53  ;;  %v5538_v53 = vrot.slane %v5537_v45, 2 }
 0x46a   :  { %v9964_v13 = vadd.f32 %v4816_v49, %v4695_v17  ;;  %v5560_v30 = vadd.f32 %v9943_v52, %v5559_v39 }
 0x46b   :  { %v4528_v29 = vpop.f32.mrf.mxu1  ;;  %6867 = vmatmul.msk.f32.gmra.mxu0 %vm93_vm1, %v9726_v27  ;;  %v5580_v27 = vand.u32 2147483647, %v9895_v41  ;;  %v5539_v54 = vadd.f32 %v5538_v53, %v5537_v45  ;;  %v5567_v41 = vand.u32 2147483648, %v9887_v42  ;;  %v6885_v53 = vld [vmem:[%s10194_s2 + $0x350] sm:$0xff] }
 0x46c   :  { %v4550_v63 = vadd.f32 %v4528_v29, %v4400_v50  ;;  %6933 = vmatmul.msk.f32.gmra.mxu2 %vm93_vm1, %v9717_v36  ;;  %6966 = vmatmul.msk.f32.gmra.mxu3 %vm93_vm1, %v9962_v48  ;;  %v5564_v51 = vsel %vm10006_vm12, %v9943_v52, %v5560_v30  ;;  %v6951_v52 = vld [vmem:[%s10194_s2 + $0x352] sm:$0xff] }
 0x46d   :  { %vm5581_vm11 = vcmp.eq.f32.partialorder %v5580_v27, 8.507059e+37  ;;  %v5540_v61 = vrot.slane %v5539_v54, 1  ;;  %v5568_v42 = vor.u32 1.1754944e-38, %v5567_v41 }
 0x46e   :  { %6900 = vmatmul.msk.f32.gmra.mxu1 %vm93_vm1, %v9712_v28  ;;  %v5584_v14 = vsel %vm5581_vm11, %v5583_v12, %v5579_v3 }
 0x46f   :  { %v4674_v8 = vpop.f32.mrf.mxu2  ;;  %v4819_v23 = vpop.f32.mrf.mxu3  ;;  %v5541_v17 = vadd.f32 %v5540_v61, %v5539_v54  ;;  %v5585_v40 = vmul.f32 %v5584_v14, %v5548_v10  ;;  %v5569_v50 = vsel %vm5566_vm13, %v5568_v42, %v5564_v51 }
 0x470   :  { %v4696_v33 = vadd.f32 %v4674_v8, %v4550_v63  ;;  %v4402_v26 = vpop.f32.mrf.mxu0 }
 0x471   :  { %v4403_v28 = vadd.f32 %v4402_v26, %v9707_v58  ;;  %v5570_v20 = vmul.f32 %v5569_v50, %v5541_v17  ;;  %v5596_v46 = vrot.slane %v5585_v40, 7 }
 0x472   :  { %v10000_v22 = vadd.f32 %v4819_v23, %v4696_v33 }
 0x473   :  { %v4531_v57 = vpop.f32.mrf.mxu1  ;;  %6868 = vmatmul.msk.f32.gmra.mxu0 %vm93_vm1, %v9933_v24 }
 0x474   :  { %v4551_v4 = vadd.f32 %v4531_v57, %v4403_v28  ;;  %6934 = vmatmul.msk.f32.gmra.mxu2 %vm93_vm1, %v6917_v25  ;;  %6967 = vmatmul.msk.f32.gmra.mxu3 %vm93_vm1, %v6950_v44 }
 0x476   :  { %6901 = vmatmul.msk.f32.gmra.mxu1 %vm93_vm1, %v6884_v62 }
 0x477   :  { %v4677_v24 = vpop.f32.mrf.mxu2  ;;  %v4822_v49 = vpop.f32.mrf.mxu3 }
 0x478   :  { %v4697_v45 = vadd.f32 %v4677_v24, %v4551_v4  ;;  %v4405_v55 = vpop.f32.mrf.mxu0 }
 0x479   :  { %v4406_v2 = vadd.f32 %v4405_v55, %v9735_v38 }
 0x47a   :  { %v10028_v29 = vadd.f32 %v4822_v49, %v4697_v45 }
 0x47b   :  { %v4534_v63 = vpop.f32.mrf.mxu1  ;;  %6869 = vmatmul.msk.f32.gmra.mxu0 %vm93_vm1, %v9962_v48  ;;  %v5598_v48 = vsel %vm5597_vm14, %v5596_v46, %v5570_v20 }
 0x47c   :  { %v4552_v38 = vadd.f32 %v4534_v63, %v4406_v2  ;;  %6935 = vmatmul.msk.f32.gmra.mxu2 %vm93_vm1, %v6918_v9  ;;  %6968 = vmatmul.msk.f32.gmra.mxu3 %vm93_vm1, %v6951_v52 }
 0x47e   :  { %6902 = vmatmul.msk.f32.gmra.mxu1 %vm93_vm1, %v6885_v53 }
 0x47f   :  { %v4680_v39 = vpop.f32.mrf.mxu2  ;;  %v4825_v32 = vpop.f32.mrf.mxu3 }
 0x480   :  { %v4698_v27 = vadd.f32 %v4680_v39, %v4552_v38  ;;  %v4925_v36 = vpop.f32.mrf.mxu0 }
 0x481   :  { %v4973_v8 = vadd.f32 %v4925_v36, %v9754_v56  ;;  %v10047_v56 = vld [vmem:[%s10196_s4] ss:$0 sm:$0xff] }
 0x482   :  { %v10040_v23 = vadd.f32 %v4825_v32, %v4698_v27 }
 0x483   :  { %v5071_v54 = vpop.f32.mrf.mxu1  ;;  %6970 = vmatmul.msk.f32.vlgmr.msrb.gmra.mxu0 %vm1400_vm2, %v5598_v48 }
 0x484   :  { %v5119_v60 = vadd.f32 %v5071_v54, %v4973_v8 }
 0x487   :  { %v5216_v33 = vpop.f32.mrf.mxu2  ;;  %v5361_v26 = vpop.f32.mrf.mxu3 }
 0x488   :  { %v5264_v34 = vadd.f32 %v5216_v33, %v5119_v60  ;;  %v4928_v41 = vpop.f32.mrf.mxu0 }
 0x489   :  { %v4974_v12 = vadd.f32 %v4928_v41, %v9767_v6 }
 0x48a   :  { %v5409_v28 = vadd.f32 %v5361_v26, %v5264_v34 }
 0x48b   :  { %v5074_v25 = vpop.f32.mrf.mxu1 }
 0x48c   :  { %v5120_v44 = vadd.f32 %v5074_v25, %v4974_v12  ;;  %v5425_v58 = vadd.f32 %v10047_v56, %v5409_v28 }
 0x48e   :  { %v5441_v42 = vmax.f32 %v5425_v58, 0.0 }
 0x48f   :  { %v5219_v30 = vpop.f32.mrf.mxu2  ;;  %v5364_v3 = vpop.f32.mrf.mxu3 }
 0x490   :  { %v5265_v57 = vadd.f32 %v5219_v30, %v5120_v44  ;;  %v4931_v62 = vpop.f32.mrf.mxu0  ;;  %v5457_v17 = vsel %vm1400_vm2, %v5441_v42, 0.0 }
 0x491   :  { %v4975_v61 = vadd.f32 %v4931_v62, %v9783_v18 }
 0x492   :  { %v5410_v10 = vadd.f32 %v5364_v3, %v5265_v57 }
 0x493   :  { %v5077_v4 = vpop.f32.mrf.mxu1 }
 0x494   :  { %v5426_v6 = vadd.f32 %v10047_v56, %v5410_v10  ;;  %v5121_v14 = vadd.f32 %v5077_v4, %v4975_v61 }
 0x496   :  { %v5442_v51 = vmax.f32 %v5426_v6, 0.0 }
 0x497   :  { %v5222_v24 = vpop.f32.mrf.mxu2  ;;  %v5367_v49 = vpop.f32.mrf.mxu3 }
 0x498   :  { %v5458_v40 = vsel %vm1400_vm2, %v5442_v51, 0.0  ;;  %v5266_v45 = vadd.f32 %v5222_v24, %v5121_v14  ;;  %v4934_v55 = vpop.f32.mrf.mxu0 }
 0x499   :  { %v5459_v50 = vadd.f32 %v5458_v40, %v5457_v17  ;;  %v4976_v2 = vadd.f32 %v4934_v55, %v9796_v21 }
 0x49a   :  { %v5411_v9 = vadd.f32 %v5367_v49, %v5266_v45 }
 0x49b   :  { %v5080_v18 = vpop.f32.mrf.mxu1 }
 0x49c   :  { %v5427_v52 = vadd.f32 %v10047_v56, %v5411_v9  ;;  %v5122_v63 = vadd.f32 %v5080_v18, %v4976_v2 }
 0x49e   :  { %v5443_v53 = vmax.f32 %v5427_v52, 0.0 }
 0x49f   :  { %v5225_v20 = vpop.f32.mrf.mxu2  ;;  %v5370_v38 = vpop.f32.mrf.mxu3 }
 0x4a0   :  { %v5460_v46 = vsel %vm1400_vm2, %v5443_v53, 0.0  ;;  %v5267_v39 = vadd.f32 %v5225_v20, %v5122_v63  ;;  %v4937_v32 = vpop.f32.mrf.mxu0 }
 0x4a1   :  { %v5461_v27 = vadd.f32 %v5460_v46, %v5459_v50  ;;  %v4977_v36 = vadd.f32 %v4937_v32, %v9809_v16 }
 0x4a2   :  { %v5412_v48 = vadd.f32 %v5370_v38, %v5267_v39 }
 0x4a3   :  { %v5083_v8 = vpop.f32.mrf.mxu1 }
 0x4a4   :  { %v5428_v54 = vadd.f32 %v10047_v56, %v5412_v48  ;;  %v5123_v21 = vadd.f32 %v5083_v8, %v4977_v36 }
 0x4a6   :  { %v5444_v60 = vmax.f32 %v5428_v54, 0.0 }
 0x4a7   :  { %v5228_v33 = vpop.f32.mrf.mxu2  ;;  %v5373_v26 = vpop.f32.mrf.mxu3 }
 0x4a8   :  { %v5462_v34 = vsel %vm1400_vm2, %v5444_v60, 0.0  ;;  %v5268_v41 = vadd.f32 %v5228_v33, %v5123_v21  ;;  %v4940_v12 = vpop.f32.mrf.mxu0 }
 0x4a9   :  { %v5463_v28 = vadd.f32 %v5462_v34, %v5461_v27  ;;  %v4978_v25 = vadd.f32 %v4940_v12, %v9825_v35 }
 0x4aa   :  { %v5413_v44 = vadd.f32 %v5373_v26, %v5268_v41 }
 0x4ab   :  { %v5086_v30 = vpop.f32.mrf.mxu1 }
 0x4ac   :  { %v5429_v3 = vadd.f32 %v10047_v56, %v5413_v44  ;;  %v5124_v16 = vadd.f32 %v5086_v30, %v4978_v25 }
 0x4ae   :  { %v5445_v58 = vmax.f32 %v5429_v3, 0.0 }
 0x4af   :  { %v5231_v57 = vpop.f32.mrf.mxu2  ;;  %v5376_v62 = vpop.f32.mrf.mxu3 }
 0x4b0   :  { %v5464_v61 = vsel %vm1400_vm2, %v5445_v58, 0.0  ;;  %v5269_v10 = vadd.f32 %v5231_v57, %v5124_v16  ;;  %v4943_v4 = vpop.f32.mrf.mxu0 }
 0x4b1   :  { %v5465_v42 = vadd.f32 %v5464_v61, %v5463_v28  ;;  %v4979_v6 = vadd.f32 %v4943_v4, %v9841_v31  ;;  %v4385_v31 = vadd.f32 %v9850_v0, %v9578_v37 }
 0x4b2   :  { %v5414_v14 = vadd.f32 %v5376_v62, %v5269_v10 }
 0x4b3   :  { %v5089_v51 = vpop.f32.mrf.mxu1  ;;  %v4545_v39 = vadd.f32 %v9857_v15, %v4385_v31 }
 0x4b4   :  { %v5430_v24 = vadd.f32 %v10047_v56, %v5414_v14  ;;  %v5125_v35 = vadd.f32 %v5089_v51, %v4979_v6 }
 0x4b6   :  { %v5446_v49 = vmax.f32 %v5430_v24, 0.0 }
 0x4b7   :  { %v5234_v17 = vpop.f32.mrf.mxu2  ;;  %v5379_v40 = vpop.f32.mrf.mxu3 }
 0x4b8   :  { %v5466_v45 = vsel %vm1400_vm2, %v5446_v49, 0.0  ;;  %v5270_v55 = vadd.f32 %v5234_v17, %v5125_v35  ;;  %v4946_v50 = vpop.f32.mrf.mxu0 }
 0x4b9   :  { %v5467_v2 = vadd.f32 %v5466_v45, %v5465_v42  ;;  %v4980_v9 = vadd.f32 %v4946_v50, %v9855_v43  ;;  %v4691_v43 = vadd.f32 %v9866_v47, %v4545_v39 }
 0x4ba   :  { %v5415_v18 = vadd.f32 %v5379_v40, %v5270_v55 }
 0x4bb   :  { %v5092_v52 = vpop.f32.mrf.mxu1  ;;  %v4836_v37 = vadd.f32 %v9868_v1, %v4691_v43 }
 0x4bc   :  { %v5431_v63 = vadd.f32 %v10047_v56, %v5415_v18  ;;  %v5126_v53 = vadd.f32 %v5092_v52, %v4980_v9 }
 0x4be   :  { %v5447_v20 = vmax.f32 %v5431_v63, 0.0 }
 0x4bf   :  { %v5237_v38 = vpop.f32.mrf.mxu2  ;;  %v5382_v46 = vpop.f32.mrf.mxu3 }
 0x4c0   :  { %v5468_v32 = vsel %vm1400_vm2, %v5447_v20, 0.0  ;;  %v5271_v27 = vadd.f32 %v5237_v38, %v5126_v53  ;;  %v4949_v36 = vpop.f32.mrf.mxu0 }
 0x4c1   :  { %v5469_v48 = vadd.f32 %v5468_v32, %v5467_v2  ;;  %v4981_v26 = vadd.f32 %v4949_v36, %v4836_v37 }
 0x4c2   :  { %v5416_v8 = vadd.f32 %v5382_v46, %v5271_v27 }
 0x4c3   :  { %v5095_v54 = vpop.f32.mrf.mxu1 }
 0x4c4   :  { %v5432_v21 = vadd.f32 %v10047_v56, %v5416_v8  ;;  %v5127_v44 = vadd.f32 %v5095_v54, %v4981_v26 }
 0x4c6   :  { %v5448_v0 = vmax.f32 %v5432_v21, 0.0 }
 0x4c7   :  { %v5240_v60 = vpop.f32.mrf.mxu2  ;;  %v5385_v33 = vpop.f32.mrf.mxu3 }
 0x4c8   :  { %v5470_v34 = vsel %vm1400_vm2, %v5448_v0, 0.0  ;;  %v4952_v15 = vpop.f32.mrf.mxu0  ;;  %v5272_v30 = vadd.f32 %v5240_v60, %v5127_v44 }
 0x4c9   :  { %v5471_v41 = vadd.f32 %v5470_v34, %v5469_v48  ;;  %v4982_v12 = vadd.f32 %v4952_v15, %v9885_v7 }
 0x4ca   :  { %v5417_v10 = vadd.f32 %v5385_v33, %v5272_v30 }
 0x4cb   :  { %v5472_v28 = vrot.slane %v5471_v41, 4  ;;  %v5098_v25 = vpop.f32.mrf.mxu1 }
 0x4cc   :  { %v5128_v3 = vadd.f32 %v5098_v25, %v4982_v12  ;;  %v5433_v24 = vadd.f32 %v10047_v56, %v5417_v10 }
 0x4cd   :  { %v5473_v47 = vadd.f32 %v5472_v28, %v5471_v41 }
 0x4ce   :  { %v5449_v2 = vmax.f32 %v5433_v24, 0.0 }
 0x4cf   :  { %v5474_v16 = vrot.slane %v5473_v47, 2  ;;  %v5243_v58 = vpop.f32.mrf.mxu2  ;;  %v5388_v57 = vpop.f32.mrf.mxu3 }
 0x4d0   :  { %v5273_v1 = vadd.f32 %v5243_v58, %v5128_v3  ;;  %v4955_v62 = vpop.f32.mrf.mxu0  ;;  %v5478_v63 = vsel %vm1400_vm2, %v5449_v2, 0.0 }
 0x4d1   :  { %v5475_v61 = vadd.f32 %v5474_v16, %v5473_v47  ;;  %v4983_v4 = vadd.f32 %v4955_v62, %v9907_v59 }
 0x4d2   :  { %v5418_v42 = vadd.f32 %v5388_v57, %v5273_v1  ;;  %v5636_v57 = vld [vmem:[%s10199_s7 + $0x38] sm:$0xff] }
 0x4d3   :  { %v5101_v6 = vpop.f32.mrf.mxu1  ;;  %v5476_v14 = vrot.slane %v5475_v61, 1  ;;  %5653 = vmatpush.msrb.mxu1 %v5636_v57 }
 0x4d4   :  { %v5434_v7 = vadd.f32 %v10047_v56, %v5418_v42  ;;  %v5129_v35 = vadd.f32 %v5101_v6, %v4983_v4 }
 0x4d5   :  { %v5477_v51 = vadd.f32 %v5476_v14, %v5475_v61 }
 0x4d6   :  { %v5450_v45 = vmax.f32 %v5434_v7, 0.0 }
 0x4d7   :  { %v5246_v49 = vpop.f32.mrf.mxu2  ;;  %v5391_v17 = vpop.f32.mrf.mxu3  ;;  %v10081_v40 = vadd.f32 %v5477_v51, %v9609_v11 }
 0x4d8   :  { %v5274_v55 = vadd.f32 %v5246_v49, %v5129_v35  ;;  %v4958_v50 = vpop.f32.mrf.mxu0  ;;  %v5479_v52 = vsel %vm1400_vm2, %v5450_v45, 0.0  ;;  %v5635_v45 = vld [vmem:[%s10199_s7 + $0x30] sm:$0xff] }
 0x4d9   :  { %v4984_v59 = vadd.f32 %v4958_v50, %v9939_v5  ;;  %v5480_v38 = vadd.f32 %v5479_v52, %v5478_v63  ;;  %5654 = vmatpush.msrb.mxu1 %v5635_v45 }
 0x4da   :  { %v5419_v9 = vadd.f32 %v5391_v17, %v5274_v55  ;;  %v5634_v55 = vld [vmem:[%s10199_s7 + $0x28] sm:$0xff] }
 0x4db   :  { %v5104_v18 = vpop.f32.mrf.mxu1  ;;  %5655 = vmatpush.msrb.mxu1 %v5634_v55 }
 0x4dc   :  { %v5435_v31 = vadd.f32 %v10047_v56, %v5419_v9  ;;  %v5130_v20 = vadd.f32 %v5104_v18, %v4984_v59  ;;  %v5633_v59 = vld [vmem:[%s10199_s7 + $0x20] sm:$0xff] }
 0x4dd   :  { %5656 = vmatpush.msrb.mxu1 %v5633_v59 }
 0x4de   :  { %v5451_v53 = vmax.f32 %v5435_v31, 0.0  ;;  %v5632_v31 = vld [vmem:[%s10199_s7 + $0x18] sm:$0xff] }
 0x4df   :  { %v5249_v46 = vpop.f32.mrf.mxu2  ;;  %v5394_v11 = vpop.f32.mrf.mxu3  ;;  %5657 = vmatpush.msrb.mxu1 %v5632_v31 }
 0x4e0   :  { %v5481_v39 = vsel %vm1400_vm2, %v5451_v53, 0.0  ;;  %v5275_v32 = vadd.f32 %v5249_v46, %v5130_v20  ;;  %v4961_v27 = vpop.f32.mrf.mxu0  ;;  %v5631_v20 = vld [vmem:[%s10199_s7 + $0x10] sm:$0xff]  ;;  %v5630_v46 = vld [vmem:[%s10199_s7 + $0x8] sm:$0xff] }
 0x4e1   :  { %v5482_v36 = vadd.f32 %v5481_v39, %v5480_v38  ;;  %v4985_v5 = vadd.f32 %v4961_v27, %v9964_v13  ;;  %5658 = vmatpush.msrb.mxu1 %v5631_v20  ;;  %v5629_v39 = vld [vmem:[%s10199_s7] sm:$0xff] }
 0x4e2   :  { %v5420_v48 = vadd.f32 %v5394_v11, %v5275_v32 }
 0x4e3   :  { %v5107_v43 = vpop.f32.mrf.mxu1  ;;  %5659 = vmatpush.msrb.mxu1 %v5630_v46 }
 0x4e4   :  { %v5436_v8 = vadd.f32 %v10047_v56, %v5420_v48  ;;  %v5131_v21 = vadd.f32 %v5107_v43, %v4985_v5 }
 0x4e5   :  { %5660 = vmatpush.msrb.mxu1 %v5629_v39 }
 0x4e6   :  { %v5452_v54 = vmax.f32 %v5436_v8, 0.0 }
 0x4e7   :  { %v5252_v37 = vpop.f32.mrf.mxu2  ;;  %v5397_v0 = vpop.f32.mrf.mxu3 }
 0x4e8   :  { %v5483_v60 = vsel %vm1400_vm2, %v5452_v54, 0.0  ;;  %v5276_v33 = vadd.f32 %v5252_v37, %v5131_v21  ;;  %v4964_v26 = vpop.f32.mrf.mxu0  ;;  %v5501_v21 = vmul.f32 0.00390625, %v10081_v40  ;;  %v5666_v40 = vld [vmem:[%s10201_s9] sm:$0xff] }
 0x4e9   :  { %v5484_v34 = vadd.f32 %v5483_v60, %v5482_v36  ;;  %v4986_v15 = vadd.f32 %v4964_v26, %v10000_v22  ;;  %v5669_v60 = vld [vmem:[%s10201_s9 + $0x18] sm:$0xff]  ;;  %v6988_v26 = vld [vmem:[%s10198_s6] ss:$0 sm:$0xff] }
 0x4ea   :  { %v5421_v41 = vadd.f32 %v5397_v0, %v5276_v33  ;;  %v5668_v33 = vld [vmem:[%s10201_s9 + $0x10] sm:$0xff]  ;;  %5689 = vmatpush.msrb.mxu2 %v5669_v60 }
 0x4eb   :  { %v5110_v12 = vpop.f32.mrf.mxu1 }
 0x4ec   :  { %v5437_v28 = vadd.f32 %v10047_v56, %v5421_v41  ;;  %v5132_v25 = vadd.f32 %v5110_v12, %v4986_v15  ;;  %5690 = vmatpush.msrb.mxu2 %v5668_v33 }
 0x4ee   :  { %v5453_v13 = vmax.f32 %v5437_v28, 0.0 }
 0x4ef   :  { %v5255_v44 = vpop.f32.mrf.mxu2  ;;  %v5400_v47 = vpop.f32.mrf.mxu3 }
 0x4f0   :  { %v5485_v30 = vsel %vm1400_vm2, %v5453_v13, 0.0  ;;  %v5277_v3 = vadd.f32 %v5255_v44, %v5132_v25  ;;  %v4967_v16 = vpop.f32.mrf.mxu0  ;;  %v6989_v13 = vld [vmem:[%s10200_s8] ss:$0 sm:$0xff] }
 0x4f1   :  { %v5486_v58 = vadd.f32 %v5485_v30, %v5484_v34  ;;  %v4987_v1 = vadd.f32 %v4967_v16, %v10028_v29  ;;  %v6990_v30 = vld [vmem:[%s10202_s10] ss:$0 sm:$0xff] }
 0x4f2   :  { %v5422_v22 = vadd.f32 %v5400_v47, %v5277_v3 }
 0x4f3   :  { %v5113_v62 = vpop.f32.mrf.mxu1 }
 0x4f4   :  { %v5438_v61 = vadd.f32 %v10047_v56, %v5422_v22  ;;  %v5133_v4 = vadd.f32 %v5113_v62, %v4987_v1 }
 0x4f6   :  { %v5454_v10 = vmax.f32 %v5438_v61, 0.0 }
 0x4f7   :  { %v5258_v42 = vpop.f32.mrf.mxu2  ;;  %v5403_v6 = vpop.f32.mrf.mxu3 }
 0x4f8   :  { %v5487_v14 = vsel %vm1400_vm2, %v5454_v10, 0.0  ;;  %v5278_v7 = vadd.f32 %v5258_v42, %v5133_v4  ;;  %v4970_v51 = vpop.f32.mrf.mxu0 }
 0x4f9   :  { %v5488_v24 = vadd.f32 %v5487_v14, %v5486_v58  ;;  %v4988_v35 = vadd.f32 %v4970_v51, %v10040_v23 }
 0x4fa   :  { %v5423_v49 = vadd.f32 %v5403_v6, %v5278_v7 }
 0x4fb   :  { %v5116_v17 = vpop.f32.mrf.mxu1 }
 0x4fc   :  { %v5439_v29 = vadd.f32 %v10047_v56, %v5423_v49  ;;  %v5134_v2 = vadd.f32 %v5116_v17, %v4988_v35 }
 0x4fe   :  { %v5455_v50 = vmax.f32 %v5439_v29, 0.0 }
 0x4ff   :  { %v5261_v23 = vpop.f32.mrf.mxu2  ;;  %v5406_v9 = vpop.f32.mrf.mxu3 }
 0x500   :  { %v5489_v18 = vsel %vm1400_vm2, %v5455_v50, 0.0  ;;  %v5279_v52 = vadd.f32 %v5261_v23, %v5134_v2  ;;  %v5618_v34 = vpop.f32.mrf.mxu0 }
 0x501   :  { %v5490_v63 = vadd.f32 %v5489_v18, %v5488_v24  ;;  %v5619_v15 = vadd.f32 %v6988_v26, %v5618_v34 }
 0x502   :  { %v5424_v53 = vadd.f32 %v5406_v9, %v5279_v52 }
 0x503   :  { %v5621_v41 = vmax.f32 %v5619_v15, 0.0 }
 0x504   :  { %v5440_v38 = vadd.f32 %v10047_v56, %v5424_v53  ;;  %v7049_v53 = vmov -1.0  }
 0x506   :  { %v5456_v11 = vmax.f32 %v5440_v38, 0.0 }
 0x508   :  { %v5491_v32 = vsel %vm1400_vm2, %v5456_v11, 0.0 }
 0x509   :  { %v5492_v27 = vadd.f32 %v5491_v32, %v5490_v63 }
 0x50b   :  { %v5493_v36 = vrot.slane %v5492_v27, 4 }
 0x50d   :  { %v5494_v5 = vadd.f32 %v5493_v36, %v5492_v27  ;;  %v7050_v27 = vmov 64.0   ;;  %v5784_v36 = vld [vmem:[%s10205_s13 + $0x38] sm:$0xff] }
 0x50e   :  { %5800 = vmatpush.msrb.mxu3 %v5784_v36 }
 0x50f   :  { %v5495_v48 = vrot.slane %v5494_v5, 2 }
 0x511   :  { %v5496_v43 = vadd.f32 %v5495_v48, %v5494_v5  ;;  %v5783_v5 = vld [vmem:[%s10205_s13 + $0x30] sm:$0xff]  ;;  %v5782_v48 = vld [vmem:[%s10205_s13 + $0x28] sm:$0xff] }
 0x512   :  { %5801 = vmatpush.msrb.mxu3 %v5783_v5 }
 0x513   :  { %v5497_v56 = vrot.slane %v5496_v43, 1 }
 0x514   :  { %5802 = vmatpush.msrb.mxu3 %v5782_v48 }
 0x515   :  { %v5498_v8 = vadd.f32 %v5497_v56, %v5496_v43  ;;  %v5781_v56 = vld [vmem:[%s10205_s13 + $0x20] sm:$0xff] }
 0x516   :  { %5803 = vmatpush.msrb.mxu3 %v5781_v56 }
 0x517   :  { %v5500_v54 = vadd.f32 %v5498_v8, %v9775_v19  ;;  %v5667_v19 = vld [vmem:[%s10201_s9 + $0x8] sm:$0xff] }
 0x518   :  { %5691 = vmatpush.msrb.mxu2 %v5667_v19 }
 0x519   :  { %v5502_v37 = vmul.f32 0.00390625, %v5500_v54  ;;  %v5780_v54 = vld [vmem:[%s10205_s13 + $0x18] sm:$0xff] }
 0x51a   :  { %5692 = vmatpush.msrb.mxu2 %v5666_v40  ;;  %5804 = vmatpush.msrb.mxu3 %v5780_v54 }
 0x51b   :  { %v5624_v0 = vsel %vm5597_vm14, %v5502_v37, %v5501_v21  ;;  %v5779_v21 = vld [vmem:[%s10205_s13 + $0x10] sm:$0xff] }
 0x51c   :  { %5625 = vrot.lane.b32.xlu1 %v5624_v0, %s7048_s1  ;;  %v5778_v0 = vld [vmem:[%s10205_s13 + $0x8] sm:$0xff]  ;;  %5805 = vmatpush.msrb.mxu3 %v5779_v21 }
 0x51e   :  { %5806 = vmatpush.msrb.mxu3 %v5778_v0 }
 0x58e   :  { %v5626_v12 = vpop.permute.xlu1 %5625 }
 0x58f   :  { %v5628_v28 = vsel %vm1400_vm2, %v5621_v41, %v5626_v12  ;;  %v5777_v12 = vld [vmem:[%s10205_s13] sm:$0xff] }
 0x590   :  { %6971 = vmatmul.msk.f32.vlgmr.msrb.gmra.mxu1 %vm5641_vm15, %v5628_v28  ;;  %5807 = vmatpush.msrb.mxu3 %v5777_v12 }
 0x60d   :  { %v5662_v25 = vpop.f32.mrf.mxu1 }
 0x60e   :  { %v5663_v44 = vadd.f32 %v6989_v13, %v5662_v25 }
 0x610   :  { %v5665_v47 = vmax.f32 %v5663_v44, 0.0 }
 0x612   :  { %6972 = vmatmul.msk.f32.vlgmr.msrb.gmra.mxu2 %vm1400_vm2, %v5665_v47 }
 0x695   :  { %v5694_v3 = vpop.f32.mrf.mxu2 }
 0x696   :  { %v5695_v16 = vadd.f32 %v6990_v30, %v5694_v3 }
 0x698   :  { %v5698_v58 = vmul.f32 0.70710677, %v5695_v16  ;;  %v5697_v46 = vmul.f32 0.5, %v5695_v16 }
 0x69a   :  { %v5701_v57 = vand.u32 2147483647, %v5698_v58  ;;  %vm5699_vm4 = vcmp.ge.f32.partialorder %v5698_v58, 0.0 }
 0x69b   :  { %v5700_v20 = vsel %vm5699_vm4, 1.0, %v7049_v53 }
 0x69c   :  { %v5702_v1 = vmul.f32 0.3275911, %v5701_v57  ;;  %v5728_v24 = vsub.f32 0.0, %v5701_v57 }
 0x69e   :  { %v5703_v22 = vadd.f32 1.0, %v5702_v1  ;;  %v5729_v29 = vmul.f32 %v5728_v24, %v5701_v57  ;;  %v6991_v57 = vld [vmem:[%s10203_s11] ss:$0 sm:$0xff]  ;;  %s5820_s11 = sshll.u32 %s10207_s15, 4  ;;  %s5821_s11 = int_to_ptr.hbm [resolvable:$true] %s5820_s11 }
 0x6a0   :  { %6998 = vrcp.f32 %v5703_v22  ;;  %v5715_v4 = vand.u32 2147483648, %v5703_v22  ;;  %v5713_v6 = vand.u32 2147483647, %v5703_v22  ;;  %vm5709_vm1 = vweird.f32 %v5703_v22 }
 0x6a1   :  { %v5730_v50 = vmul.f32 1.442695, %v5729_v29 }
 0x6a2   :  { %v5716_v7 = vor.u32 1.1754944e-38, %v5715_v4  ;;  %vm5714_vm3 = vcmp.eq.f32.partialorder %v5713_v6, 8.507059e+37  ;;  %v6993_v4 = vld [vmem:[%s10206_s14] ss:$0 sm:$0xff] }
 0x6a3   :  { %7000 = vpow2.f32 %v5730_v50 }
 0x6a4   :  { %7002 = vrcp.f32 %v7050_v27 }
 0x6a6   :  { %v6999_v62 = vpop.eup %6998 }
 0x6a7   :  { %v5705_v61 = vmul.f32 %v6999_v62, %v5703_v22  ;;  %vm5710_vm0 = vweird.f32 %v6999_v62  ;;  %v6992_v22 = vld [vmem:[%s10204_s12] ss:$0 sm:$0xff] }
 0x6a8   :  { %vm5711_vm2 = vmor %vm5709_vm1, %vm5710_vm0 }
 0x6a9   :  { %v5706_v10 = vsub.f32 1.0, %v5705_v61  ;;  %v7001_v52 = vpop.eup %7000 }
 0x6aa   :  { %v7003_v43 = vpop.eup %7002 }
 0x6ab   :  { %v5707_v42 = vmul.f32 %v6999_v62, %v5706_v10  ;;  %v5742_v8 = vmul.f32 64.0, %v7003_v43  ;;  %vm5746_vm6 = vweird.f32 %v7003_v43 }
 0x6ad   :  { %v5708_v14 = vadd.f32 %v6999_v62, %v5707_v42  ;;  %v5743_v37 = vsub.f32 1.0, %v5742_v8 }
 0x6af   :  { %v5712_v51 = vsel %vm5711_vm2, %v6999_v62, %v5708_v14  ;;  %v5744_v60 = vmul.f32 %v7003_v43, %v5743_v37 }
 0x6b0   :  { %v5717_v35 = vsel %vm5714_vm3, %v5716_v7, %v5712_v51 }
 0x6b1   :  { %v5719_v49 = vmul.f32 1.0614054, %v5717_v35  ;;  %v5745_v33 = vadd.f32 %v7003_v43, %v5744_v60 }
 0x6b3   :  { %v5720_v17 = vadd.f32 -1.4531521, %v5719_v49  ;;  %v5747_v19 = vsel %vm5746_vm6, %v7003_v43, %v5745_v33 }
 0x6b5   :  { %v5721_v45 = vmul.f32 %v5720_v17, %v5717_v35 }
 0x6b7   :  { %v5722_v55 = vadd.f32 1.4214138, %v5721_v45 }
 0x6b9   :  { %v5723_v2 = vmul.f32 %v5722_v55, %v5717_v35 }
 0x6bb   :  { %v5724_v59 = vadd.f32 -0.28449672, %v5723_v2 }
 0x6bd   :  { %v5725_v23 = vmul.f32 %v5724_v59, %v5717_v35 }
 0x6bf   :  { %v5726_v9 = vadd.f32 0.2548296, %v5725_v23 }
 0x6c1   :  { %v5727_v18 = vmul.f32 %v5726_v9, %v5717_v35 }
 0x6c3   :  { %v5732_v31 = vmul.f32 %v7001_v52, %v5727_v18 }
 0x6c5   :  { %v5733_v63 = vsub.f32 1.0, %v5732_v31 }
 0x6c7   :  { %v5734_v38 = vmul.f32 %v5733_v63, %v5700_v20 }
 0x6c9   :  { %v5735_v11 = vadd.f32 1.0, %v5734_v38 }
 0x6cb   :  { %v5736_v39 = vmul.f32 %v5735_v11, %v5697_v46 }
 0x6cd   :  { %v5738_v32 = vsel %vm5737_vm5, %v5736_v39, 0.0 }
 0x6ce   :  { %5739 = vadd.xlane.f32.xlu2 %v5738_v32 }
 0x741   :  { %v5740_v40 = vpop.xlane.xlu2 %5739 }
 0x742   :  { %v5748_v26 = vmul.f32 %v5747_v19, %v5740_v40 }
 0x744   :  { %v5749_v34 = vsub.f32 %v5736_v39, %v5748_v26 }
 0x746   :  { %v5750_v15 = vmul.f32 %v5749_v34, %v5749_v34 }
 0x748   :  { %v5751_v41 = vsel %vm5737_vm5, %v5750_v15, 0.0 }
 0x749   :  { %5752 = vadd.xlane.f32.xlu2 %v5751_v41 }
 0x7bc   :  { %v5753_v28 = vpop.xlane.xlu2 %5752 }
 0x7bd   :  { %v5754_v13 = vmul.f32 %v5753_v28, %v5747_v19 }
 0x7bf   :  { %v5755_v25 = vadd.f32 1e-12, %v5754_v13 }
 0x7c1   :  { %7004 = vrsqrt.f32 %v5755_v25  ;;  %vm5762_vm8 = vweird.f32 %v5755_v25 }
 0x7c7   :  { %v7005_v44 = vpop.eup %7004 }
 0x7c8   :  { %v5757_v47 = vmul.f32 %v7005_v44, %v5755_v25  ;;  %vm5763_vm7 = vweird.f32 %v7005_v44 }
 0x7c9   :  { %vm5764_vm9 = vmor %vm5762_vm8, %vm5763_vm7 }
 0x7ca   :  { %v5758_v30 = vmul.f32 %v7005_v44, %v5757_v47 }
 0x7cc   :  { %v5759_v3 = vmul.f32 0.5, %v5758_v30 }
 0x7ce   :  { %v5760_v16 = vsub.f32 1.5, %v5759_v3 }
 0x7d0   :  { %v5761_v58 = vmul.f32 %v7005_v44, %v5760_v16 }
 0x7d2   :  { %v5765_v1 = vsel %vm5764_vm9, %v7005_v44, %v5761_v58 }
 0x7d3   :  { %v5766_v62 = vmul.f32 %v5765_v1, %v5749_v34 }
 0x7d5   :  { %v5771_v61 = vmul.f32 %v6991_v57, %v5766_v62 }
 0x7d7   :  { %v5776_v10 = vadd.f32 %v6992_v22, %v5771_v61 }
 0x7d9   :  { %6973 = vmatmul.msk.f32.vlgmr.msrb.gmra.mxu3 %vm5641_vm15, %v5776_v10 }
 0x85c   :  { %v5809_v42 = vpop.f32.mrf.mxu3 }
 0x85d   :  { %v5810_v6 = vadd.f32 %v6993_v4, %v5809_v42 }
 0x85f   :  { %5812 = vst [vmem:[#allocation2] sm:$0x3] %v5810_v6 }
 0x860   :  { %5823 = dma.vmem_to_hbm [thread:$0]  %s5819_s5, 32, %s5821_s11, [#allocation3]  }
 0x861   :  { %7044 = dma.done.wait [#allocation3], 32  }
 0x862   :  { %7045 = vsyncadd [#allocation3], 4294967264 }
 0x863   :  { %5828 = vsyncpa [#allocation3], 1 }

</bundles_post_ra>
